<compile_context>
chip_gen: v7x
topology: tpu7x:2x2x1
jax: 0.10.0
libtpu: 0.0.40
codegen_flags: <defaults>
</compile_context>

<pallas_src>
import functools

import jax
import jax.numpy as jnp
from jax.experimental import pallas as pl
from jax.experimental.pallas import tpu as pltpu

KH, KW, SH, SW = 5, 5, 3, 3
COUT, OH, OW = 8, 8, 8
FEAT = COUT * OH * OW          # 512
HIDDEN, NCLS = 64, 10
H_IN = (OH - 1) * SH + KH      # 26
W_IN = (OW - 1) * SW + KW      # 26


def _fcn3_fused_kernel(wc_ref, bc_ref, x_ref, w0_ref, b0_ref, w1_ref, b1_ref, o_ref):
    """Fused forward for one batch tile.

    wc_ref : SMEM f32[200]        conv weight, index c*25 + kh*5 + kw
    bc_ref : SMEM f32[8]          conv bias
    x_ref  : VMEM f32[9, TB, 81]  de-strided input: x_ref[i, b, (rh*3+rw)*9 + j] = x_pad[b, 3i+rh, 3j+rw]
    w0_ref : VMEM f32[512, 64]    ln0 weight transposed (rows = PyTorch flatten index c*64 + oh*8 + ow)
    b0_ref : VMEM f32[1, 64]
    w1_ref : VMEM f32[64, 10]     ln1 weight transposed
    b1_ref : VMEM f32[1, 10]
    o_ref  : VMEM f32[TB, 10]
    """
    tb = x_ref.shape[1]

    # The 9 de-strided "row" slabs, each [TB, 81].
    rows = [x_ref[i] for i in range(OH + 1)]

    # Build the 25 conv taps, each [TB, 64] with lane index p = oh*8 + ow:
    #   tap(kh, kw)[b, p] == x[b, 3*oh + kh, 3*ow + kw]
    taps = []
    for kh in range(KH):
        qh, rh = divmod(kh, SH)
        for kw in range(KW):
            qw, rw = divmod(kw, SW)
            base = (rh * SW + rw) * (OW + 1) + qw
            pieces = [rows[oh + qh][:, base:base + OW] for oh in range(OH)]
            taps.append(jnp.concatenate(pieces, axis=1))           # [TB, 64]

    # Conv (per-channel scalar MACs on the VPU) fused straight into ln0: the conv result
    # stays in VMEM/vregs and each channel's 64 features hit the matching 64-row slab of
    # w0^T -- this reproduces PyTorch's NCHW flatten order with no data transpose.
    h_acc = jnp.zeros((tb, HIDDEN), jnp.float32)
    for c in range(COUT):
        conv_c = bc_ref[c] + wc_ref[c * (KH * KW)] * taps[0]
        for t in range(1, KH * KW):
            conv_c = conv_c + wc_ref[c * (KH * KW) + t] * taps[t]
        conv_c = jnp.maximum(conv_c, 0.0)                          # ReLU(conv)
        w0_blk = w0_ref[pl.ds(c * OH * OW, OH * OW), :]            # [64, 64]
        h_acc = h_acc + jnp.dot(conv_c, w0_blk, preferred_element_type=jnp.float32)

    h = jnp.maximum(h_acc + b0_ref[...], 0.0)                      # ReLU(ln0)
    out = jnp.dot(h, w1_ref[...], preferred_element_type=jnp.float32) + b1_ref[...]
    o_ref[...] = out.astype(o_ref.dtype)


def fcn3_forward(x, conv_w, conv_b, w0, b0, w1, b1, *, block_b=256):
    """x: [B, 1, 26, 26] (NCHW). Returns logits [B, 10]."""
    B = x.shape[0]

    # ---- wrapper glue: pad 26->27 and factor the stride-3 grid (~1.08x data, NOT im2col) ----
    x2 = x[:, 0].astype(jnp.float32)                               # [B, 26, 26]
    x2p = jnp.pad(x2, ((0, 0), (0, 1), (0, 1)))                    # [B, 27, 27]
    xr = (x2p.reshape(B, OH + 1, SH, OW + 1, SW)
              .transpose(1, 0, 2, 4, 3)                            # [9, B, 3, 3, 9]
              .reshape(OH + 1, B, SH * SW * (OW + 1)))             # [9, B, 81]

    # Parameter reshapes/transposes (tiny, constant-shaped; effectively free).
    wc = conv_w.reshape(COUT * KH * KW).astype(jnp.float32)        # [200]
    bc = conv_b.astype(jnp.float32)                                # [8]
    w0t = w0.T.astype(jnp.float32)                                 # [512, 64]
    b0r = b0.reshape(1, HIDDEN).astype(jnp.float32)                # [1, 64]
    w1t = w1.T.astype(jnp.float32)                                 # [64, 10]
    b1r = b1.reshape(1, NCLS).astype(jnp.float32)                  # [1, 10]

    # ---- batch tiling: "parallel" grid axis -> both TCs on v7x + pipelined block DMA ----
    # block_b=256 keeps the double-buffered footprint well under v7x's scoped VMEM default;
    # it can be raised (e.g. 512) on v5e/v6e's 128 MiB VMEM.
    if B <= block_b:
        tb, bp = B, B
    else:
        tb = block_b                                               # multiple of 8
        bp = -(-B // tb) * tb
        if bp != B:
            xr = jnp.pad(xr, ((0, 0), (0, bp - B), (0, 0)))
    grid = (bp // tb,)

    flops = 2 * bp * (OH * OW * KH * KW * COUT + FEAT * HIDDEN + HIDDEN * NCLS)
    bytes_accessed = 4 * (xr.size + wc.size + bc.size + w0t.size + b0r.size
                          + w1t.size + b1r.size + bp * NCLS)

    out = pl.pallas_call(
        _fcn3_fused_kernel,
        grid=grid,
        in_specs=[
            pl.BlockSpec(memory_space=pltpu.MemorySpace.SMEM),     # conv weights (scalars)
            pl.BlockSpec(memory_space=pltpu.MemorySpace.SMEM),     # conv bias (scalars)
            pl.BlockSpec((OH + 1, tb, 81), lambda i: (0, i, 0)),   # de-strided input tile
            pl.BlockSpec((FEAT, HIDDEN), lambda i: (0, 0)),        # w0^T
            pl.BlockSpec((1, HIDDEN), lambda i: (0, 0)),           # b0
            pl.BlockSpec((HIDDEN, NCLS), lambda i: (0, 0)),        # w1^T
            pl.BlockSpec((1, NCLS), lambda i: (0, 0)),             # b1
        ],
        out_specs=pl.BlockSpec((tb, NCLS), lambda i: (i, 0)),
        out_shape=jax.ShapeDtypeStruct((bp, NCLS), jnp.float32),
        compiler_params=pltpu.CompilerParams(
            dimension_semantics=("parallel",)),
        cost_estimate=pl.CostEstimate(
            flops=flops, transcendentals=0, bytes_accessed=bytes_accessed),
    )(wc, bc, xr, w0t, b0r, w1t, b1r)

    return out[:B]


# ---------------- pure-JAX reference for verification ----------------

def fcn3_reference(x, conv_w, conv_b, w0, b0, w1, b1):
    y = jax.lax.conv_general_dilated(
        x.astype(jnp.float32), conv_w.astype(jnp.float32),
        window_strides=(SH, SW), padding="VALID",
        dimension_numbers=("NCHW", "OIHW", "NCHW"),
        precision=jax.lax.Precision.HIGHEST)
    y = jnp.maximum(y + conv_b[None, :, None, None], 0.0)
    f = y.reshape(x.shape[0], -1)
    h = jnp.maximum(jnp.dot(f, w0.T, precision=jax.lax.Precision.HIGHEST) + b0, 0.0)
    return jnp.dot(h, w1.T, precision=jax.lax.Precision.HIGHEST) + b1


# ---------------- main ----------------

if __name__ == "__main__":
    key = jax.random.PRNGKey(0)
    kx, k1, k2, k3, k4, k5, k6 = jax.random.split(key, 7)

    B = 2
    x = jax.random.normal(kx, (B, 1, H_IN, W_IN), jnp.float32)

    # Deterministic synthetic parameters (shapes from the PyTorch module).
    conv_w = jax.random.normal(k1, (COUT, 1, KH, KW), jnp.float32) * 0.1
    conv_b = jax.random.normal(k2, (COUT,), jnp.float32) * 0.1
    w0 = jax.random.normal(k3, (HIDDEN, FEAT), jnp.float32) * (1.0 / jnp.sqrt(512.0))
    b0 = jax.random.normal(k4, (HIDDEN,), jnp.float32) * 0.05
    w1 = jax.random.normal(k5, (NCLS, HIDDEN), jnp.float32) * (1.0 / 8.0)
    b1 = jax.random.normal(k6, (NCLS,), jnp.float32) * 0.05

    # Single-block path (B <= block_b).
    fwd = jax.jit(fcn3_forward)
    out = jax.block_until_ready(fwd(x, conv_w, conv_b, w0, b0, w1, b1))
    ref = fcn3_reference(x, conv_w, conv_b, w0, b0, w1, b1)
    assert out.shape == (B, NCLS), out.shape
    assert jnp.allclose(out, ref, rtol=1e-2, atol=1e-2), (out, ref)

    # Batch-tiled path (multiple grid steps + batch padding).
    B2 = 40
    x_big = jax.random.normal(kx, (B2, 1, H_IN, W_IN), jnp.float32)
    fwd_tiled = jax.jit(functools.partial(fcn3_forward, block_b=16))
    out2 = jax.block_until_ready(fwd_tiled(x_big, conv_w, conv_b, w0, b0, w1, b1))
    ref2 = fcn3_reference(x_big, conv_w, conv_b, w0, b0, w1, b1)
    assert out2.shape == (B2, NCLS), out2.shape
    assert jnp.allclose(out2, ref2, rtol=1e-2, atol=1e-2)

    print("KERNEL_OK")
</pallas_src>

<mosaic_0001>
module attributes {stable_mosaic.version = 11 : i64} {
  func.func @_fcn3_fused_kernel(%arg0: i32, %arg1: memref<200xf32, #tpu.memory_space<smem>>, %arg2: memref<8xf32, #tpu.memory_space<smem>>, %arg3: memref<9x2x81xf32, #tpu.memory_space<vmem>>, %arg4: memref<512x64xf32, #tpu.memory_space<vmem>>, %arg5: memref<1x64xf32, #tpu.memory_space<vmem>>, %arg6: memref<64x10xf32, #tpu.memory_space<vmem>>, %arg7: memref<1x10xf32, #tpu.memory_space<vmem>>, %arg8: memref<2x10xf32, #tpu.memory_space<vmem>>) attributes {dimension_semantics = [#tpu.dimension_semantics<parallel>], iteration_bounds = array<i64: 1>, scalar_prefetch = 0 : i64, scratch_operands = 0 : i64, tpu.core_type = #tpu.core_type<tc>, window_params = [{transform_indices = @transform_0, window_bounds = array<i64: 200>}, {transform_indices = @transform_1, window_bounds = array<i64: 8>}, {transform_indices = @transform_2, window_bounds = array<i64: 9, 2, 81>}, {pipeline_mode = #tpu.pipeline_mode<synchronous>, transform_indices = @transform_3, window_bounds = array<i64: 512, 64>}, {pipeline_mode = #tpu.pipeline_mode<synchronous>, transform_indices = @transform_4, window_bounds = array<i64: 1, 64>}, {pipeline_mode = #tpu.pipeline_mode<synchronous>, transform_indices = @transform_5, window_bounds = array<i64: 64, 10>}, {pipeline_mode = #tpu.pipeline_mode<synchronous>, transform_indices = @transform_6, window_bounds = array<i64: 1, 10>}, {transform_indices = @transform_7, window_bounds = array<i64: 2, 10>}]} {
    %c0 = arith.constant 0 : index
    %c0_0 = arith.constant 0 : index
    %c0_1 = arith.constant 0 : index
    %0 = vector.load %arg3[%c0, %c0_0, %c0_1] : memref<9x2x81xf32, #tpu.memory_space<vmem>>, vector<1x2x81xf32>
    %1 = vector.shape_cast %0 : vector<1x2x81xf32> to vector<2x81xf32>
    %c1 = arith.constant 1 : index
    %c0_2 = arith.constant 0 : index
    %c0_3 = arith.constant 0 : index
    %2 = vector.load %arg3[%c1, %c0_2, %c0_3] : memref<9x2x81xf32, #tpu.memory_space<vmem>>, vector<1x2x81xf32>
    %3 = vector.shape_cast %2 : vector<1x2x81xf32> to vector<2x81xf32>
    %c2 = arith.constant 2 : index
    %c0_4 = arith.constant 0 : index
    %c0_5 = arith.constant 0 : index
    %4 = vector.load %arg3[%c2, %c0_4, %c0_5] : memref<9x2x81xf32, #tpu.memory_space<vmem>>, vector<1x2x81xf32>
    %5 = vector.shape_cast %4 : vector<1x2x81xf32> to vector<2x81xf32>
    %c3 = arith.constant 3 : index
    %c0_6 = arith.constant 0 : index
    %c0_7 = arith.constant 0 : index
    %6 = vector.load %arg3[%c3, %c0_6, %c0_7] : memref<9x2x81xf32, #tpu.memory_space<vmem>>, vector<1x2x81xf32>
    %7 = vector.shape_cast %6 : vector<1x2x81xf32> to vector<2x81xf32>
    %c4 = arith.constant 4 : index
    %c0_8 = arith.constant 0 : index
    %c0_9 = arith.constant 0 : index
    %8 = vector.load %arg3[%c4, %c0_8, %c0_9] : memref<9x2x81xf32, #tpu.memory_space<vmem>>, vector<1x2x81xf32>
    %9 = vector.shape_cast %8 : vector<1x2x81xf32> to vector<2x81xf32>
    %c5 = arith.constant 5 : index
    %c0_10 = arith.constant 0 : index
    %c0_11 = arith.constant 0 : index
    %10 = vector.load %arg3[%c5, %c0_10, %c0_11] : memref<9x2x81xf32, #tpu.memory_space<vmem>>, vector<1x2x81xf32>
    %11 = vector.shape_cast %10 : vector<1x2x81xf32> to vector<2x81xf32>
    %c6 = arith.constant 6 : index
    %c0_12 = arith.constant 0 : index
    %c0_13 = arith.constant 0 : index
    %12 = vector.load %arg3[%c6, %c0_12, %c0_13] : memref<9x2x81xf32, #tpu.memory_space<vmem>>, vector<1x2x81xf32>
    %13 = vector.shape_cast %12 : vector<1x2x81xf32> to vector<2x81xf32>
    %c7 = arith.constant 7 : index
    %c0_14 = arith.constant 0 : index
    %c0_15 = arith.constant 0 : index
    %14 = vector.load %arg3[%c7, %c0_14, %c0_15] : memref<9x2x81xf32, #tpu.memory_space<vmem>>, vector<1x2x81xf32>
    %15 = vector.shape_cast %14 : vector<1x2x81xf32> to vector<2x81xf32>
    %c8 = arith.constant 8 : index
    %c0_16 = arith.constant 0 : index
    %c0_17 = arith.constant 0 : index
    %16 = vector.load %arg3[%c8, %c0_16, %c0_17] : memref<9x2x81xf32, #tpu.memory_space<vmem>>, vector<1x2x81xf32>
    %17 = vector.shape_cast %16 : vector<1x2x81xf32> to vector<2x81xf32>
    %18 = vector.extract_strided_slice %1 {offsets = [0, 0], sizes = [2, 8], strides = [1, 1]} : vector<2x81xf32> to vector<2x8xf32>
    %19 = vector.extract_strided_slice %3 {offsets = [0, 0], sizes = [2, 8], strides = [1, 1]} : vector<2x81xf32> to vector<2x8xf32>
    %20 = vector.extract_strided_slice %5 {offsets = [0, 0], sizes = [2, 8], strides = [1, 1]} : vector<2x81xf32> to vector<2x8xf32>
    %21 = vector.extract_strided_slice %7 {offsets = [0, 0], sizes = [2, 8], strides = [1, 1]} : vector<2x81xf32> to vector<2x8xf32>
    %22 = vector.extract_strided_slice %9 {offsets = [0, 0], sizes = [2, 8], strides = [1, 1]} : vector<2x81xf32> to vector<2x8xf32>
    %23 = vector.extract_strided_slice %11 {offsets = [0, 0], sizes = [2, 8], strides = [1, 1]} : vector<2x81xf32> to vector<2x8xf32>
    %24 = vector.extract_strided_slice %13 {offsets = [0, 0], sizes = [2, 8], strides = [1, 1]} : vector<2x81xf32> to vector<2x8xf32>
    %25 = vector.extract_strided_slice %15 {offsets = [0, 0], sizes = [2, 8], strides = [1, 1]} : vector<2x81xf32> to vector<2x8xf32>
    %26 = tpu.concatenate %18, %19, %20, %21, %22, %23, %24, %25 in 1 : vector<2x8xf32>, vector<2x8xf32>, vector<2x8xf32>, vector<2x8xf32>, vector<2x8xf32>, vector<2x8xf32>, vector<2x8xf32>, vector<2x8xf32> -> vector<2x64xf32>
    %27 = vector.extract_strided_slice %1 {offsets = [0, 9], sizes = [2, 8], strides = [1, 1]} : vector<2x81xf32> to vector<2x8xf32>
    %28 = vector.extract_strided_slice %3 {offsets = [0, 9], sizes = [2, 8], strides = [1, 1]} : vector<2x81xf32> to vector<2x8xf32>
    %29 = vector.extract_strided_slice %5 {offsets = [0, 9], sizes = [2, 8], strides = [1, 1]} : vector<2x81xf32> to vector<2x8xf32>
    %30 = vector.extract_strided_slice %7 {offsets = [0, 9], sizes = [2, 8], strides = [1, 1]} : vector<2x81xf32> to vector<2x8xf32>
    %31 = vector.extract_strided_slice %9 {offsets = [0, 9], sizes = [2, 8], strides = [1, 1]} : vector<2x81xf32> to vector<2x8xf32>
    %32 = vector.extract_strided_slice %11 {offsets = [0, 9], sizes = [2, 8], strides = [1, 1]} : vector<2x81xf32> to vector<2x8xf32>
    %33 = vector.extract_strided_slice %13 {offsets = [0, 9], sizes = [2, 8], strides = [1, 1]} : vector<2x81xf32> to vector<2x8xf32>
    %34 = vector.extract_strided_slice %15 {offsets = [0, 9], sizes = [2, 8], strides = [1, 1]} : vector<2x81xf32> to vector<2x8xf32>
    %35 = tpu.concatenate %27, %28, %29, %30, %31, %32, %33, %34 in 1 : vector<2x8xf32>, vector<2x8xf32>, vector<2x8xf32>, vector<2x8xf32>, vector<2x8xf32>, vector<2x8xf32>, vector<2x8xf32>, vector<2x8xf32> -> vector<2x64xf32>
    %36 = vector.extract_strided_slice %1 {offsets = [0, 18], sizes = [2, 8], strides = [1, 1]} : vector<2x81xf32> to vector<2x8xf32>
    %37 = vector.extract_strided_slice %3 {offsets = [0, 18], sizes = [2, 8], strides = [1, 1]} : vector<2x81xf32> to vector<2x8xf32>
    %38 = vector.extract_strided_slice %5 {offsets = [0, 18], sizes = [2, 8], strides = [1, 1]} : vector<2x81xf32> to vector<2x8xf32>
    %39 = vector.extract_strided_slice %7 {offsets = [0, 18], sizes = [2, 8], strides = [1, 1]} : vector<2x81xf32> to vector<2x8xf32>
    %40 = vector.extract_strided_slice %9 {offsets = [0, 18], sizes = [2, 8], strides = [1, 1]} : vector<2x81xf32> to vector<2x8xf32>
    %41 = vector.extract_strided_slice %11 {offsets = [0, 18], sizes = [2, 8], strides = [1, 1]} : vector<2x81xf32> to vector<2x8xf32>
    %42 = vector.extract_strided_slice %13 {offsets = [0, 18], sizes = [2, 8], strides = [1, 1]} : vector<2x81xf32> to vector<2x8xf32>
    %43 = vector.extract_strided_slice %15 {offsets = [0, 18], sizes = [2, 8], strides = [1, 1]} : vector<2x81xf32> to vector<2x8xf32>
    %44 = tpu.concatenate %36, %37, %38, %39, %40, %41, %42, %43 in 1 : vector<2x8xf32>, vector<2x8xf32>, vector<2x8xf32>, vector<2x8xf32>, vector<2x8xf32>, vector<2x8xf32>, vector<2x8xf32>, vector<2x8xf32> -> vector<2x64xf32>
    %45 = vector.extract_strided_slice %1 {offsets = [0, 1], sizes = [2, 8], strides = [1, 1]} : vector<2x81xf32> to vector<2x8xf32>
    %46 = vector.extract_strided_slice %3 {offsets = [0, 1], sizes = [2, 8], strides = [1, 1]} : vector<2x81xf32> to vector<2x8xf32>
    %47 = vector.extract_strided_slice %5 {offsets = [0, 1], sizes = [2, 8], strides = [1, 1]} : vector<2x81xf32> to vector<2x8xf32>
    %48 = vector.extract_strided_slice %7 {offsets = [0, 1], sizes = [2, 8], strides = [1, 1]} : vector<2x81xf32> to vector<2x8xf32>
    %49 = vector.extract_strided_slice %9 {offsets = [0, 1], sizes = [2, 8], strides = [1, 1]} : vector<2x81xf32> to vector<2x8xf32>
    %50 = vector.extract_strided_slice %11 {offsets = [0, 1], sizes = [2, 8], strides = [1, 1]} : vector<2x81xf32> to vector<2x8xf32>
    %51 = vector.extract_strided_slice %13 {offsets = [0, 1], sizes = [2, 8], strides = [1, 1]} : vector<2x81xf32> to vector<2x8xf32>
    %52 = vector.extract_strided_slice %15 {offsets = [0, 1], sizes = [2, 8], strides = [1, 1]} : vector<2x81xf32> to vector<2x8xf32>
    %53 = tpu.concatenate %45, %46, %47, %48, %49, %50, %51, %52 in 1 : vector<2x8xf32>, vector<2x8xf32>, vector<2x8xf32>, vector<2x8xf32>, vector<2x8xf32>, vector<2x8xf32>, vector<2x8xf32>, vector<2x8xf32> -> vector<2x64xf32>
    %54 = vector.extract_strided_slice %1 {offsets = [0, 10], sizes = [2, 8], strides = [1, 1]} : vector<2x81xf32> to vector<2x8xf32>
    %55 = vector.extract_strided_slice %3 {offsets = [0, 10], sizes = [2, 8], strides = [1, 1]} : vector<2x81xf32> to vector<2x8xf32>
    %56 = vector.extract_strided_slice %5 {offsets = [0, 10], sizes = [2, 8], strides = [1, 1]} : vector<2x81xf32> to vector<2x8xf32>
    %57 = vector.extract_strided_slice %7 {offsets = [0, 10], sizes = [2, 8], strides = [1, 1]} : vector<2x81xf32> to vector<2x8xf32>
    %58 = vector.extract_strided_slice %9 {offsets = [0, 10], sizes = [2, 8], strides = [1, 1]} : vector<2x81xf32> to vector<2x8xf32>
    %59 = vector.extract_strided_slice %11 {offsets = [0, 10], sizes = [2, 8], strides = [1, 1]} : vector<2x81xf32> to vector<2x8xf32>
    %60 = vector.extract_strided_slice %13 {offsets = [0, 10], sizes = [2, 8], strides = [1, 1]} : vector<2x81xf32> to vector<2x8xf32>
    %61 = vector.extract_strided_slice %15 {offsets = [0, 10], sizes = [2, 8], strides = [1, 1]} : vector<2x81xf32> to vector<2x8xf32>
    %62 = tpu.concatenate %54, %55, %56, %57, %58, %59, %60, %61 in 1 : vector<2x8xf32>, vector<2x8xf32>, vector<2x8xf32>, vector<2x8xf32>, vector<2x8xf32>, vector<2x8xf32>, vector<2x8xf32>, vector<2x8xf32> -> vector<2x64xf32>
    %63 = vector.extract_strided_slice %1 {offsets = [0, 27], sizes = [2, 8], strides = [1, 1]} : vector<2x81xf32> to vector<2x8xf32>
    %64 = vector.extract_strided_slice %3 {offsets = [0, 27], sizes = [2, 8], strides = [1, 1]} : vector<2x81xf32> to vector<2x8xf32>
    %65 = vector.extract_strided_slice %5 {offsets = [0, 27], sizes = [2, 8], strides = [1, 1]} : vector<2x81xf32> to vector<2x8xf32>
    %66 = vector.extract_strided_slice %7 {offsets = [0, 27], sizes = [2, 8], strides = [1, 1]} : vector<2x81xf32> to vector<2x8xf32>
    %67 = vector.extract_strided_slice %9 {offsets = [0, 27], sizes = [2, 8], strides = [1, 1]} : vector<2x81xf32> to vector<2x8xf32>
    %68 = vector.extract_strided_slice %11 {offsets = [0, 27], sizes = [2, 8], strides = [1, 1]} : vector<2x81xf32> to vector<2x8xf32>
    %69 = vector.extract_strided_slice %13 {offsets = [0, 27], sizes = [2, 8], strides = [1, 1]} : vector<2x81xf32> to vector<2x8xf32>
    %70 = vector.extract_strided_slice %15 {offsets = [0, 27], sizes = [2, 8], strides = [1, 1]} : vector<2x81xf32> to vector<2x8xf32>
    %71 = tpu.concatenate %63, %64, %65, %66, %67, %68, %69, %70 in 1 : vector<2x8xf32>, vector<2x8xf32>, vector<2x8xf32>, vector<2x8xf32>, vector<2x8xf32>, vector<2x8xf32>, vector<2x8xf32>, vector<2x8xf32> -> vector<2x64xf32>
    %72 = vector.extract_strided_slice %1 {offsets = [0, 36], sizes = [2, 8], strides = [1, 1]} : vector<2x81xf32> to vector<2x8xf32>
    %73 = vector.extract_strided_slice %3 {offsets = [0, 36], sizes = [2, 8], strides = [1, 1]} : vector<2x81xf32> to vector<2x8xf32>
    %74 = vector.extract_strided_slice %5 {offsets = [0, 36], sizes = [2, 8], strides = [1, 1]} : vector<2x81xf32> to vector<2x8xf32>
    %75 = vector.extract_strided_slice %7 {offsets = [0, 36], sizes = [2, 8], strides = [1, 1]} : vector<2x81xf32> to vector<2x8xf32>
    %76 = vector.extract_strided_slice %9 {offsets = [0, 36], sizes = [2, 8], strides = [1, 1]} : vector<2x81xf32> to vector<2x8xf32>
    %77 = vector.extract_strided_slice %11 {offsets = [0, 36], sizes = [2, 8], strides = [1, 1]} : vector<2x81xf32> to vector<2x8xf32>
    %78 = vector.extract_strided_slice %13 {offsets = [0, 36], sizes = [2, 8], strides = [1, 1]} : vector<2x81xf32> to vector<2x8xf32>
    %79 = vector.extract_strided_slice %15 {offsets = [0, 36], sizes = [2, 8], strides = [1, 1]} : vector<2x81xf32> to vector<2x8xf32>
    %80 = tpu.concatenate %72, %73, %74, %75, %76, %77, %78, %79 in 1 : vector<2x8xf32>, vector<2x8xf32>, vector<2x8xf32>, vector<2x8xf32>, vector<2x8xf32>, vector<2x8xf32>, vector<2x8xf32>, vector<2x8xf32> -> vector<2x64xf32>
    %81 = vector.extract_strided_slice %1 {offsets = [0, 45], sizes = [2, 8], strides = [1, 1]} : vector<2x81xf32> to vector<2x8xf32>
    %82 = vector.extract_strided_slice %3 {offsets = [0, 45], sizes = [2, 8], strides = [1, 1]} : vector<2x81xf32> to vector<2x8xf32>
    %83 = vector.extract_strided_slice %5 {offsets = [0, 45], sizes = [2, 8], strides = [1, 1]} : vector<2x81xf32> to vector<2x8xf32>
    %84 = vector.extract_strided_slice %7 {offsets = [0, 45], sizes = [2, 8], strides = [1, 1]} : vector<2x81xf32> to vector<2x8xf32>
    %85 = vector.extract_strided_slice %9 {offsets = [0, 45], sizes = [2, 8], strides = [1, 1]} : vector<2x81xf32> to vector<2x8xf32>
    %86 = vector.extract_strided_slice %11 {offsets = [0, 45], sizes = [2, 8], strides = [1, 1]} : vector<2x81xf32> to vector<2x8xf32>
    %87 = vector.extract_strided_slice %13 {offsets = [0, 45], sizes = [2, 8], strides = [1, 1]} : vector<2x81xf32> to vector<2x8xf32>
    %88 = vector.extract_strided_slice %15 {offsets = [0, 45], sizes = [2, 8], strides = [1, 1]} : vector<2x81xf32> to vector<2x8xf32>
    %89 = tpu.concatenate %81, %82, %83, %84, %85, %86, %87, %88 in 1 : vector<2x8xf32>, vector<2x8xf32>, vector<2x8xf32>, vector<2x8xf32>, vector<2x8xf32>, vector<2x8xf32>, vector<2x8xf32>, vector<2x8xf32> -> vector<2x64xf32>
    %90 = vector.extract_strided_slice %1 {offsets = [0, 28], sizes = [2, 8], strides = [1, 1]} : vector<2x81xf32> to vector<2x8xf32>
    %91 = vector.extract_strided_slice %3 {offsets = [0, 28], sizes = [2, 8], strides = [1, 1]} : vector<2x81xf32> to vector<2x8xf32>
    %92 = vector.extract_strided_slice %5 {offsets = [0, 28], sizes = [2, 8], strides = [1, 1]} : vector<2x81xf32> to vector<2x8xf32>
    %93 = vector.extract_strided_slice %7 {offsets = [0, 28], sizes = [2, 8], strides = [1, 1]} : vector<2x81xf32> to vector<2x8xf32>
    %94 = vector.extract_strided_slice %9 {offsets = [0, 28], sizes = [2, 8], strides = [1, 1]} : vector<2x81xf32> to vector<2x8xf32>
    %95 = vector.extract_strided_slice %11 {offsets = [0, 28], sizes = [2, 8], strides = [1, 1]} : vector<2x81xf32> to vector<2x8xf32>
    %96 = vector.extract_strided_slice %13 {offsets = [0, 28], sizes = [2, 8], strides = [1, 1]} : vector<2x81xf32> to vector<2x8xf32>
    %97 = vector.extract_strided_slice %15 {offsets = [0, 28], sizes = [2, 8], strides = [1, 1]} : vector<2x81xf32> to vector<2x8xf32>
    %98 = tpu.concatenate %90, %91, %92, %93, %94, %95, %96, %97 in 1 : vector<2x8xf32>, vector<2x8xf32>, vector<2x8xf32>, vector<2x8xf32>, vector<2x8xf32>, vector<2x8xf32>, vector<2x8xf32>, vector<2x8xf32> -> vector<2x64xf32>
    %99 = vector.extract_strided_slice %1 {offsets = [0, 37], sizes = [2, 8], strides = [1, 1]} : vector<2x81xf32> to vector<2x8xf32>
    %100 = vector.extract_strided_slice %3 {offsets = [0, 37], sizes = [2, 8], strides = [1, 1]} : vector<2x81xf32> to vector<2x8xf32>
    %101 = vector.extract_strided_slice %5 {offsets = [0, 37], sizes = [2, 8], strides = [1, 1]} : vector<2x81xf32> to vector<2x8xf32>
    %102 = vector.extract_strided_slice %7 {offsets = [0, 37], sizes = [2, 8], strides = [1, 1]} : vector<2x81xf32> to vector<2x8xf32>
    %103 = vector.extract_strided_slice %9 {offsets = [0, 37], sizes = [2, 8], strides = [1, 1]} : vector<2x81xf32> to vector<2x8xf32>
    %104 = vector.extract_strided_slice %11 {offsets = [0, 37], sizes = [2, 8], strides = [1, 1]} : vector<2x81xf32> to vector<2x8xf32>
    %105 = vector.extract_strided_slice %13 {offsets = [0, 37], sizes = [2, 8], strides = [1, 1]} : vector<2x81xf32> to vector<2x8xf32>
    %106 = vector.extract_strided_slice %15 {offsets = [0, 37], sizes = [2, 8], strides = [1, 1]} : vector<2x81xf32> to vector<2x8xf32>
    %107 = tpu.concatenate %99, %100, %101, %102, %103, %104, %105, %106 in 1 : vector<2x8xf32>, vector<2x8xf32>, vector<2x8xf32>, vector<2x8xf32>, vector<2x8xf32>, vector<2x8xf32>, vector<2x8xf32>, vector<2x8xf32> -> vector<2x64xf32>
    %108 = vector.extract_strided_slice %1 {offsets = [0, 54], sizes = [2, 8], strides = [1, 1]} : vector<2x81xf32> to vector<2x8xf32>
    %109 = vector.extract_strided_slice %3 {offsets = [0, 54], sizes = [2, 8], strides = [1, 1]} : vector<2x81xf32> to vector<2x8xf32>
    %110 = vector.extract_strided_slice %5 {offsets = [0, 54], sizes = [2, 8], strides = [1, 1]} : vector<2x81xf32> to vector<2x8xf32>
    %111 = vector.extract_strided_slice %7 {offsets = [0, 54], sizes = [2, 8], strides = [1, 1]} : vector<2x81xf32> to vector<2x8xf32>
    %112 = vector.extract_strided_slice %9 {offsets = [0, 54], sizes = [2, 8], strides = [1, 1]} : vector<2x81xf32> to vector<2x8xf32>
    %113 = vector.extract_strided_slice %11 {offsets = [0, 54], sizes = [2, 8], strides = [1, 1]} : vector<2x81xf32> to vector<2x8xf32>
    %114 = vector.extract_strided_slice %13 {offsets = [0, 54], sizes = [2, 8], strides = [1, 1]} : vector<2x81xf32> to vector<2x8xf32>
    %115 = vector.extract_strided_slice %15 {offsets = [0, 54], sizes = [2, 8], strides = [1, 1]} : vector<2x81xf32> to vector<2x8xf32>
    %116 = tpu.concatenate %108, %109, %110, %111, %112, %113, %114, %115 in 1 : vector<2x8xf32>, vector<2x8xf32>, vector<2x8xf32>, vector<2x8xf32>, vector<2x8xf32>, vector<2x8xf32>, vector<2x8xf32>, vector<2x8xf32> -> vector<2x64xf32>
    %117 = vector.extract_strided_slice %1 {offsets = [0, 63], sizes = [2, 8], strides = [1, 1]} : vector<2x81xf32> to vector<2x8xf32>
    %118 = vector.extract_strided_slice %3 {offsets = [0, 63], sizes = [2, 8], strides = [1, 1]} : vector<2x81xf32> to vector<2x8xf32>
    %119 = vector.extract_strided_slice %5 {offsets = [0, 63], sizes = [2, 8], strides = [1, 1]} : vector<2x81xf32> to vector<2x8xf32>
    %120 = vector.extract_strided_slice %7 {offsets = [0, 63], sizes = [2, 8], strides = [1, 1]} : vector<2x81xf32> to vector<2x8xf32>
    %121 = vector.extract_strided_slice %9 {offsets = [0, 63], sizes = [2, 8], strides = [1, 1]} : vector<2x81xf32> to vector<2x8xf32>
    %122 = vector.extract_strided_slice %11 {offsets = [0, 63], sizes = [2, 8], strides = [1, 1]} : vector<2x81xf32> to vector<2x8xf32>
    %123 = vector.extract_strided_slice %13 {offsets = [0, 63], sizes = [2, 8], strides = [1, 1]} : vector<2x81xf32> to vector<2x8xf32>
    %124 = vector.extract_strided_slice %15 {offsets = [0, 63], sizes = [2, 8], strides = [1, 1]} : vector<2x81xf32> to vector<2x8xf32>
    %125 = tpu.concatenate %117, %118, %119, %120, %121, %122, %123, %124 in 1 : vector<2x8xf32>, vector<2x8xf32>, vector<2x8xf32>, vector<2x8xf32>, vector<2x8xf32>, vector<2x8xf32>, vector<2x8xf32>, vector<2x8xf32> -> vector<2x64xf32>
    %126 = vector.extract_strided_slice %1 {offsets = [0, 72], sizes = [2, 8], strides = [1, 1]} : vector<2x81xf32> to vector<2x8xf32>
    %127 = vector.extract_strided_slice %3 {offsets = [0, 72], sizes = [2, 8], strides = [1, 1]} : vector<2x81xf32> to vector<2x8xf32>
    %128 = vector.extract_strided_slice %5 {offsets = [0, 72], sizes = [2, 8], strides = [1, 1]} : vector<2x81xf32> to vector<2x8xf32>
    %129 = vector.extract_strided_slice %7 {offsets = [0, 72], sizes = [2, 8], strides = [1, 1]} : vector<2x81xf32> to vector<2x8xf32>
    %130 = vector.extract_strided_slice %9 {offsets = [0, 72], sizes = [2, 8], strides = [1, 1]} : vector<2x81xf32> to vector<2x8xf32>
    %131 = vector.extract_strided_slice %11 {offsets = [0, 72], sizes = [2, 8], strides = [1, 1]} : vector<2x81xf32> to vector<2x8xf32>
    %132 = vector.extract_strided_slice %13 {offsets = [0, 72], sizes = [2, 8], strides = [1, 1]} : vector<2x81xf32> to vector<2x8xf32>
    %133 = vector.extract_strided_slice %15 {offsets = [0, 72], sizes = [2, 8], strides = [1, 1]} : vector<2x81xf32> to vector<2x8xf32>
    %134 = tpu.concatenate %126, %127, %128, %129, %130, %131, %132, %133 in 1 : vector<2x8xf32>, vector<2x8xf32>, vector<2x8xf32>, vector<2x8xf32>, vector<2x8xf32>, vector<2x8xf32>, vector<2x8xf32>, vector<2x8xf32> -> vector<2x64xf32>
    %135 = vector.extract_strided_slice %1 {offsets = [0, 55], sizes = [2, 8], strides = [1, 1]} : vector<2x81xf32> to vector<2x8xf32>
    %136 = vector.extract_strided_slice %3 {offsets = [0, 55], sizes = [2, 8], strides = [1, 1]} : vector<2x81xf32> to vector<2x8xf32>
    %137 = vector.extract_strided_slice %5 {offsets = [0, 55], sizes = [2, 8], strides = [1, 1]} : vector<2x81xf32> to vector<2x8xf32>
    %138 = vector.extract_strided_slice %7 {offsets = [0, 55], sizes = [2, 8], strides = [1, 1]} : vector<2x81xf32> to vector<2x8xf32>
    %139 = vector.extract_strided_slice %9 {offsets = [0, 55], sizes = [2, 8], strides = [1, 1]} : vector<2x81xf32> to vector<2x8xf32>
    %140 = vector.extract_strided_slice %11 {offsets = [0, 55], sizes = [2, 8], strides = [1, 1]} : vector<2x81xf32> to vector<2x8xf32>
    %141 = vector.extract_strided_slice %13 {offsets = [0, 55], sizes = [2, 8], strides = [1, 1]} : vector<2x81xf32> to vector<2x8xf32>
    %142 = vector.extract_strided_slice %15 {offsets = [0, 55], sizes = [2, 8], strides = [1, 1]} : vector<2x81xf32> to vector<2x8xf32>
    %143 = tpu.concatenate %135, %136, %137, %138, %139, %140, %141, %142 in 1 : vector<2x8xf32>, vector<2x8xf32>, vector<2x8xf32>, vector<2x8xf32>, vector<2x8xf32>, vector<2x8xf32>, vector<2x8xf32>, vector<2x8xf32> -> vector<2x64xf32>
    %144 = vector.extract_strided_slice %1 {offsets = [0, 64], sizes = [2, 8], strides = [1, 1]} : vector<2x81xf32> to vector<2x8xf32>
    %145 = vector.extract_strided_slice %3 {offsets = [0, 64], sizes = [2, 8], strides = [1, 1]} : vector<2x81xf32> to vector<2x8xf32>
    %146 = vector.extract_strided_slice %5 {offsets = [0, 64], sizes = [2, 8], strides = [1, 1]} : vector<2x81xf32> to vector<2x8xf32>
    %147 = vector.extract_strided_slice %7 {offsets = [0, 64], sizes = [2, 8], strides = [1, 1]} : vector<2x81xf32> to vector<2x8xf32>
    %148 = vector.extract_strided_slice %9 {offsets = [0, 64], sizes = [2, 8], strides = [1, 1]} : vector<2x81xf32> to vector<2x8xf32>
    %149 = vector.extract_strided_slice %11 {offsets = [0, 64], sizes = [2, 8], strides = [1, 1]} : vector<2x81xf32> to vector<2x8xf32>
    %150 = vector.extract_strided_slice %13 {offsets = [0, 64], sizes = [2, 8], strides = [1, 1]} : vector<2x81xf32> to vector<2x8xf32>
    %151 = vector.extract_strided_slice %15 {offsets = [0, 64], sizes = [2, 8], strides = [1, 1]} : vector<2x81xf32> to vector<2x8xf32>
    %152 = tpu.concatenate %144, %145, %146, %147, %148, %149, %150, %151 in 1 : vector<2x8xf32>, vector<2x8xf32>, vector<2x8xf32>, vector<2x8xf32>, vector<2x8xf32>, vector<2x8xf32>, vector<2x8xf32>, vector<2x8xf32> -> vector<2x64xf32>
    %153 = vector.extract_strided_slice %3 {offsets = [0, 0], sizes = [2, 8], strides = [1, 1]} : vector<2x81xf32> to vector<2x8xf32>
    %154 = vector.extract_strided_slice %5 {offsets = [0, 0], sizes = [2, 8], strides = [1, 1]} : vector<2x81xf32> to vector<2x8xf32>
    %155 = vector.extract_strided_slice %7 {offsets = [0, 0], sizes = [2, 8], strides = [1, 1]} : vector<2x81xf32> to vector<2x8xf32>
    %156 = vector.extract_strided_slice %9 {offsets = [0, 0], sizes = [2, 8], strides = [1, 1]} : vector<2x81xf32> to vector<2x8xf32>
    %157 = vector.extract_strided_slice %11 {offsets = [0, 0], sizes = [2, 8], strides = [1, 1]} : vector<2x81xf32> to vector<2x8xf32>
    %158 = vector.extract_strided_slice %13 {offsets = [0, 0], sizes = [2, 8], strides = [1, 1]} : vector<2x81xf32> to vector<2x8xf32>
    %159 = vector.extract_strided_slice %15 {offsets = [0, 0], sizes = [2, 8], strides = [1, 1]} : vector<2x81xf32> to vector<2x8xf32>
    %160 = vector.extract_strided_slice %17 {offsets = [0, 0], sizes = [2, 8], strides = [1, 1]} : vector<2x81xf32> to vector<2x8xf32>
    %161 = tpu.concatenate %153, %154, %155, %156, %157, %158, %159, %160 in 1 : vector<2x8xf32>, vector<2x8xf32>, vector<2x8xf32>, vector<2x8xf32>, vector<2x8xf32>, vector<2x8xf32>, vector<2x8xf32>, vector<2x8xf32> -> vector<2x64xf32>
    %162 = vector.extract_strided_slice %3 {offsets = [0, 9], sizes = [2, 8], strides = [1, 1]} : vector<2x81xf32> to vector<2x8xf32>
    %163 = vector.extract_strided_slice %5 {offsets = [0, 9], sizes = [2, 8], strides = [1, 1]} : vector<2x81xf32> to vector<2x8xf32>
    %164 = vector.extract_strided_slice %7 {offsets = [0, 9], sizes = [2, 8], strides = [1, 1]} : vector<2x81xf32> to vector<2x8xf32>
    %165 = vector.extract_strided_slice %9 {offsets = [0, 9], sizes = [2, 8], strides = [1, 1]} : vector<2x81xf32> to vector<2x8xf32>
    %166 = vector.extract_strided_slice %11 {offsets = [0, 9], sizes = [2, 8], strides = [1, 1]} : vector<2x81xf32> to vector<2x8xf32>
    %167 = vector.extract_strided_slice %13 {offsets = [0, 9], sizes = [2, 8], strides = [1, 1]} : vector<2x81xf32> to vector<2x8xf32>
    %168 = vector.extract_strided_slice %15 {offsets = [0, 9], sizes = [2, 8], strides = [1, 1]} : vector<2x81xf32> to vector<2x8xf32>
    %169 = vector.extract_strided_slice %17 {offsets = [0, 9], sizes = [2, 8], strides = [1, 1]} : vector<2x81xf32> to vector<2x8xf32>
    %170 = tpu.concatenate %162, %163, %164, %165, %166, %167, %168, %169 in 1 : vector<2x8xf32>, vector<2x8xf32>, vector<2x8xf32>, vector<2x8xf32>, vector<2x8xf32>, vector<2x8xf32>, vector<2x8xf32>, vector<2x8xf32> -> vector<2x64xf32>
    %171 = vector.extract_strided_slice %3 {offsets = [0, 18], sizes = [2, 8], strides = [1, 1]} : vector<2x81xf32> to vector<2x8xf32>
    %172 = vector.extract_strided_slice %5 {offsets = [0, 18], sizes = [2, 8], strides = [1, 1]} : vector<2x81xf32> to vector<2x8xf32>
    %173 = vector.extract_strided_slice %7 {offsets = [0, 18], sizes = [2, 8], strides = [1, 1]} : vector<2x81xf32> to vector<2x8xf32>
    %174 = vector.extract_strided_slice %9 {offsets = [0, 18], sizes = [2, 8], strides = [1, 1]} : vector<2x81xf32> to vector<2x8xf32>
    %175 = vector.extract_strided_slice %11 {offsets = [0, 18], sizes = [2, 8], strides = [1, 1]} : vector<2x81xf32> to vector<2x8xf32>
    %176 = vector.extract_strided_slice %13 {offsets = [0, 18], sizes = [2, 8], strides = [1, 1]} : vector<2x81xf32> to vector<2x8xf32>
    %177 = vector.extract_strided_slice %15 {offsets = [0, 18], sizes = [2, 8], strides = [1, 1]} : vector<2x81xf32> to vector<2x8xf32>
    %178 = vector.extract_strided_slice %17 {offsets = [0, 18], sizes = [2, 8], strides = [1, 1]} : vector<2x81xf32> to vector<2x8xf32>
    %179 = tpu.concatenate %171, %172, %173, %174, %175, %176, %177, %178 in 1 : vector<2x8xf32>, vector<2x8xf32>, vector<2x8xf32>, vector<2x8xf32>, vector<2x8xf32>, vector<2x8xf32>, vector<2x8xf32>, vector<2x8xf32> -> vector<2x64xf32>
    %180 = vector.extract_strided_slice %3 {offsets = [0, 1], sizes = [2, 8], strides = [1, 1]} : vector<2x81xf32> to vector<2x8xf32>
    %181 = vector.extract_strided_slice %5 {offsets = [0, 1], sizes = [2, 8], strides = [1, 1]} : vector<2x81xf32> to vector<2x8xf32>
    %182 = vector.extract_strided_slice %7 {offsets = [0, 1], sizes = [2, 8], strides = [1, 1]} : vector<2x81xf32> to vector<2x8xf32>
    %183 = vector.extract_strided_slice %9 {offsets = [0, 1], sizes = [2, 8], strides = [1, 1]} : vector<2x81xf32> to vector<2x8xf32>
    %184 = vector.extract_strided_slice %11 {offsets = [0, 1], sizes = [2, 8], strides = [1, 1]} : vector<2x81xf32> to vector<2x8xf32>
    %185 = vector.extract_strided_slice %13 {offsets = [0, 1], sizes = [2, 8], strides = [1, 1]} : vector<2x81xf32> to vector<2x8xf32>
    %186 = vector.extract_strided_slice %15 {offsets = [0, 1], sizes = [2, 8], strides = [1, 1]} : vector<2x81xf32> to vector<2x8xf32>
    %187 = vector.extract_strided_slice %17 {offsets = [0, 1], sizes = [2, 8], strides = [1, 1]} : vector<2x81xf32> to vector<2x8xf32>
    %188 = tpu.concatenate %180, %181, %182, %183, %184, %185, %186, %187 in 1 : vector<2x8xf32>, vector<2x8xf32>, vector<2x8xf32>, vector<2x8xf32>, vector<2x8xf32>, vector<2x8xf32>, vector<2x8xf32>, vector<2x8xf32> -> vector<2x64xf32>
    %189 = vector.extract_strided_slice %3 {offsets = [0, 10], sizes = [2, 8], strides = [1, 1]} : vector<2x81xf32> to vector<2x8xf32>
    %190 = vector.extract_strided_slice %5 {offsets = [0, 10], sizes = [2, 8], strides = [1, 1]} : vector<2x81xf32> to vector<2x8xf32>
    %191 = vector.extract_strided_slice %7 {offsets = [0, 10], sizes = [2, 8], strides = [1, 1]} : vector<2x81xf32> to vector<2x8xf32>
    %192 = vector.extract_strided_slice %9 {offsets = [0, 10], sizes = [2, 8], strides = [1, 1]} : vector<2x81xf32> to vector<2x8xf32>
    %193 = vector.extract_strided_slice %11 {offsets = [0, 10], sizes = [2, 8], strides = [1, 1]} : vector<2x81xf32> to vector<2x8xf32>
    %194 = vector.extract_strided_slice %13 {offsets = [0, 10], sizes = [2, 8], strides = [1, 1]} : vector<2x81xf32> to vector<2x8xf32>
    %195 = vector.extract_strided_slice %15 {offsets = [0, 10], sizes = [2, 8], strides = [1, 1]} : vector<2x81xf32> to vector<2x8xf32>
    %196 = vector.extract_strided_slice %17 {offsets = [0, 10], sizes = [2, 8], strides = [1, 1]} : vector<2x81xf32> to vector<2x8xf32>
    %197 = tpu.concatenate %189, %190, %191, %192, %193, %194, %195, %196 in 1 : vector<2x8xf32>, vector<2x8xf32>, vector<2x8xf32>, vector<2x8xf32>, vector<2x8xf32>, vector<2x8xf32>, vector<2x8xf32>, vector<2x8xf32> -> vector<2x64xf32>
    %198 = vector.extract_strided_slice %3 {offsets = [0, 27], sizes = [2, 8], strides = [1, 1]} : vector<2x81xf32> to vector<2x8xf32>
    %199 = vector.extract_strided_slice %5 {offsets = [0, 27], sizes = [2, 8], strides = [1, 1]} : vector<2x81xf32> to vector<2x8xf32>
    %200 = vector.extract_strided_slice %7 {offsets = [0, 27], sizes = [2, 8], strides = [1, 1]} : vector<2x81xf32> to vector<2x8xf32>
    %201 = vector.extract_strided_slice %9 {offsets = [0, 27], sizes = [2, 8], strides = [1, 1]} : vector<2x81xf32> to vector<2x8xf32>
    %202 = vector.extract_strided_slice %11 {offsets = [0, 27], sizes = [2, 8], strides = [1, 1]} : vector<2x81xf32> to vector<2x8xf32>
    %203 = vector.extract_strided_slice %13 {offsets = [0, 27], sizes = [2, 8], strides = [1, 1]} : vector<2x81xf32> to vector<2x8xf32>
    %204 = vector.extract_strided_slice %15 {offsets = [0, 27], sizes = [2, 8], strides = [1, 1]} : vector<2x81xf32> to vector<2x8xf32>
    %205 = vector.extract_strided_slice %17 {offsets = [0, 27], sizes = [2, 8], strides = [1, 1]} : vector<2x81xf32> to vector<2x8xf32>
    %206 = tpu.concatenate %198, %199, %200, %201, %202, %203, %204, %205 in 1 : vector<2x8xf32>, vector<2x8xf32>, vector<2x8xf32>, vector<2x8xf32>, vector<2x8xf32>, vector<2x8xf32>, vector<2x8xf32>, vector<2x8xf32> -> vector<2x64xf32>
    %207 = vector.extract_strided_slice %3 {offsets = [0, 36], sizes = [2, 8], strides = [1, 1]} : vector<2x81xf32> to vector<2x8xf32>
    %208 = vector.extract_strided_slice %5 {offsets = [0, 36], sizes = [2, 8], strides = [1, 1]} : vector<2x81xf32> to vector<2x8xf32>
    %209 = vector.extract_strided_slice %7 {offsets = [0, 36], sizes = [2, 8], strides = [1, 1]} : vector<2x81xf32> to vector<2x8xf32>
    %210 = vector.extract_strided_slice %9 {offsets = [0, 36], sizes = [2, 8], strides = [1, 1]} : vector<2x81xf32> to vector<2x8xf32>
    %211 = vector.extract_strided_slice %11 {offsets = [0, 36], sizes = [2, 8], strides = [1, 1]} : vector<2x81xf32> to vector<2x8xf32>
    %212 = vector.extract_strided_slice %13 {offsets = [0, 36], sizes = [2, 8], strides = [1, 1]} : vector<2x81xf32> to vector<2x8xf32>
    %213 = vector.extract_strided_slice %15 {offsets = [0, 36], sizes = [2, 8], strides = [1, 1]} : vector<2x81xf32> to vector<2x8xf32>
    %214 = vector.extract_strided_slice %17 {offsets = [0, 36], sizes = [2, 8], strides = [1, 1]} : vector<2x81xf32> to vector<2x8xf32>
    %215 = tpu.concatenate %207, %208, %209, %210, %211, %212, %213, %214 in 1 : vector<2x8xf32>, vector<2x8xf32>, vector<2x8xf32>, vector<2x8xf32>, vector<2x8xf32>, vector<2x8xf32>, vector<2x8xf32>, vector<2x8xf32> -> vector<2x64xf32>
    %216 = vector.extract_strided_slice %3 {offsets = [0, 45], sizes = [2, 8], strides = [1, 1]} : vector<2x81xf32> to vector<2x8xf32>
    %217 = vector.extract_strided_slice %5 {offsets = [0, 45], sizes = [2, 8], strides = [1, 1]} : vector<2x81xf32> to vector<2x8xf32>
    %218 = vector.extract_strided_slice %7 {offsets = [0, 45], sizes = [2, 8], strides = [1, 1]} : vector<2x81xf32> to vector<2x8xf32>
    %219 = vector.extract_strided_slice %9 {offsets = [0, 45], sizes = [2, 8], strides = [1, 1]} : vector<2x81xf32> to vector<2x8xf32>
    %220 = vector.extract_strided_slice %11 {offsets = [0, 45], sizes = [2, 8], strides = [1, 1]} : vector<2x81xf32> to vector<2x8xf32>
    %221 = vector.extract_strided_slice %13 {offsets = [0, 45], sizes = [2, 8], strides = [1, 1]} : vector<2x81xf32> to vector<2x8xf32>
    %222 = vector.extract_strided_slice %15 {offsets = [0, 45], sizes = [2, 8], strides = [1, 1]} : vector<2x81xf32> to vector<2x8xf32>
    %223 = vector.extract_strided_slice %17 {offsets = [0, 45], sizes = [2, 8], strides = [1, 1]} : vector<2x81xf32> to vector<2x8xf32>
    %224 = tpu.concatenate %216, %217, %218, %219, %220, %221, %222, %223 in 1 : vector<2x8xf32>, vector<2x8xf32>, vector<2x8xf32>, vector<2x8xf32>, vector<2x8xf32>, vector<2x8xf32>, vector<2x8xf32>, vector<2x8xf32> -> vector<2x64xf32>
    %225 = vector.extract_strided_slice %3 {offsets = [0, 28], sizes = [2, 8], strides = [1, 1]} : vector<2x81xf32> to vector<2x8xf32>
    %226 = vector.extract_strided_slice %5 {offsets = [0, 28], sizes = [2, 8], strides = [1, 1]} : vector<2x81xf32> to vector<2x8xf32>
    %227 = vector.extract_strided_slice %7 {offsets = [0, 28], sizes = [2, 8], strides = [1, 1]} : vector<2x81xf32> to vector<2x8xf32>
    %228 = vector.extract_strided_slice %9 {offsets = [0, 28], sizes = [2, 8], strides = [1, 1]} : vector<2x81xf32> to vector<2x8xf32>
    %229 = vector.extract_strided_slice %11 {offsets = [0, 28], sizes = [2, 8], strides = [1, 1]} : vector<2x81xf32> to vector<2x8xf32>
    %230 = vector.extract_strided_slice %13 {offsets = [0, 28], sizes = [2, 8], strides = [1, 1]} : vector<2x81xf32> to vector<2x8xf32>
    %231 = vector.extract_strided_slice %15 {offsets = [0, 28], sizes = [2, 8], strides = [1, 1]} : vector<2x81xf32> to vector<2x8xf32>
    %232 = vector.extract_strided_slice %17 {offsets = [0, 28], sizes = [2, 8], strides = [1, 1]} : vector<2x81xf32> to vector<2x8xf32>
    %233 = tpu.concatenate %225, %226, %227, %228, %229, %230, %231, %232 in 1 : vector<2x8xf32>, vector<2x8xf32>, vector<2x8xf32>, vector<2x8xf32>, vector<2x8xf32>, vector<2x8xf32>, vector<2x8xf32>, vector<2x8xf32> -> vector<2x64xf32>
    %234 = vector.extract_strided_slice %3 {offsets = [0, 37], sizes = [2, 8], strides = [1, 1]} : vector<2x81xf32> to vector<2x8xf32>
    %235 = vector.extract_strided_slice %5 {offsets = [0, 37], sizes = [2, 8], strides = [1, 1]} : vector<2x81xf32> to vector<2x8xf32>
    %236 = vector.extract_strided_slice %7 {offsets = [0, 37], sizes = [2, 8], strides = [1, 1]} : vector<2x81xf32> to vector<2x8xf32>
    %237 = vector.extract_strided_slice %9 {offsets = [0, 37], sizes = [2, 8], strides = [1, 1]} : vector<2x81xf32> to vector<2x8xf32>
    %238 = vector.extract_strided_slice %11 {offsets = [0, 37], sizes = [2, 8], strides = [1, 1]} : vector<2x81xf32> to vector<2x8xf32>
    %239 = vector.extract_strided_slice %13 {offsets = [0, 37], sizes = [2, 8], strides = [1, 1]} : vector<2x81xf32> to vector<2x8xf32>
    %240 = vector.extract_strided_slice %15 {offsets = [0, 37], sizes = [2, 8], strides = [1, 1]} : vector<2x81xf32> to vector<2x8xf32>
    %241 = vector.extract_strided_slice %17 {offsets = [0, 37], sizes = [2, 8], strides = [1, 1]} : vector<2x81xf32> to vector<2x8xf32>
    %242 = tpu.concatenate %234, %235, %236, %237, %238, %239, %240, %241 in 1 : vector<2x8xf32>, vector<2x8xf32>, vector<2x8xf32>, vector<2x8xf32>, vector<2x8xf32>, vector<2x8xf32>, vector<2x8xf32>, vector<2x8xf32> -> vector<2x64xf32>
    %cst = arith.constant 0.000000e+00 : f32
    %243 = vector.broadcast %cst : f32 to vector<2x64xf32>
    %c0_18 = arith.constant 0 : index
    %244 = memref.load %arg2[%c0_18] : memref<8xf32, #tpu.memory_space<smem>>
    %c0_19 = arith.constant 0 : index
    %245 = memref.load %arg1[%c0_19] : memref<200xf32, #tpu.memory_space<smem>>
    %246 = vector.broadcast %245 : f32 to vector<2x64xf32>
    %247 = arith.mulf %246, %26 : vector<2x64xf32>
    %248 = vector.broadcast %244 : f32 to vector<2x64xf32>
    %249 = arith.addf %248, %247 : vector<2x64xf32>
    %c1_20 = arith.constant 1 : index
    %250 = memref.load %arg1[%c1_20] : memref<200xf32, #tpu.memory_space<smem>>
    %251 = vector.broadcast %250 : f32 to vector<2x64xf32>
    %252 = arith.mulf %251, %35 : vector<2x64xf32>
    %253 = arith.addf %249, %252 : vector<2x64xf32>
    %c2_21 = arith.constant 2 : index
    %254 = memref.load %arg1[%c2_21] : memref<200xf32, #tpu.memory_space<smem>>
    %255 = vector.broadcast %254 : f32 to vector<2x64xf32>
    %256 = arith.mulf %255, %44 : vector<2x64xf32>
    %257 = arith.addf %253, %256 : vector<2x64xf32>
    %c3_22 = arith.constant 3 : index
    %258 = memref.load %arg1[%c3_22] : memref<200xf32, #tpu.memory_space<smem>>
    %259 = vector.broadcast %258 : f32 to vector<2x64xf32>
    %260 = arith.mulf %259, %53 : vector<2x64xf32>
    %261 = arith.addf %257, %260 : vector<2x64xf32>
    %c4_23 = arith.constant 4 : index
    %262 = memref.load %arg1[%c4_23] : memref<200xf32, #tpu.memory_space<smem>>
    %263 = vector.broadcast %262 : f32 to vector<2x64xf32>
    %264 = arith.mulf %263, %62 : vector<2x64xf32>
    %265 = arith.addf %261, %264 : vector<2x64xf32>
    %c5_24 = arith.constant 5 : index
    %266 = memref.load %arg1[%c5_24] : memref<200xf32, #tpu.memory_space<smem>>
    %267 = vector.broadcast %266 : f32 to vector<2x64xf32>
    %268 = arith.mulf %267, %71 : vector<2x64xf32>
    %269 = arith.addf %265, %268 : vector<2x64xf32>
    %c6_25 = arith.constant 6 : index
    %270 = memref.load %arg1[%c6_25] : memref<200xf32, #tpu.memory_space<smem>>
    %271 = vector.broadcast %270 : f32 to vector<2x64xf32>
    %272 = arith.mulf %271, %80 : vector<2x64xf32>
    %273 = arith.addf %269, %272 : vector<2x64xf32>
    %c7_26 = arith.constant 7 : index
    %274 = memref.load %arg1[%c7_26] : memref<200xf32, #tpu.memory_space<smem>>
    %275 = vector.broadcast %274 : f32 to vector<2x64xf32>
    %276 = arith.mulf %275, %89 : vector<2x64xf32>
    %277 = arith.addf %273, %276 : vector<2x64xf32>
    %c8_27 = arith.constant 8 : index
    %278 = memref.load %arg1[%c8_27] : memref<200xf32, #tpu.memory_space<smem>>
    %279 = vector.broadcast %278 : f32 to vector<2x64xf32>
    %280 = arith.mulf %279, %98 : vector<2x64xf32>
    %281 = arith.addf %277, %280 : vector<2x64xf32>
    %c9 = arith.constant 9 : index
    %282 = memref.load %arg1[%c9] : memref<200xf32, #tpu.memory_space<smem>>
    %283 = vector.broadcast %282 : f32 to vector<2x64xf32>
    %284 = arith.mulf %283, %107 : vector<2x64xf32>
    %285 = arith.addf %281, %284 : vector<2x64xf32>
    %c10 = arith.constant 10 : index
    %286 = memref.load %arg1[%c10] : memref<200xf32, #tpu.memory_space<smem>>
    %287 = vector.broadcast %286 : f32 to vector<2x64xf32>
    %288 = arith.mulf %287, %116 : vector<2x64xf32>
    %289 = arith.addf %285, %288 : vector<2x64xf32>
    %c11 = arith.constant 11 : index
    %290 = memref.load %arg1[%c11] : memref<200xf32, #tpu.memory_space<smem>>
    %291 = vector.broadcast %290 : f32 to vector<2x64xf32>
    %292 = arith.mulf %291, %125 : vector<2x64xf32>
    %293 = arith.addf %289, %292 : vector<2x64xf32>
    %c12 = arith.constant 12 : index
    %294 = memref.load %arg1[%c12] : memref<200xf32, #tpu.memory_space<smem>>
    %295 = vector.broadcast %294 : f32 to vector<2x64xf32>
    %296 = arith.mulf %295, %134 : vector<2x64xf32>
    %297 = arith.addf %293, %296 : vector<2x64xf32>
    %c13 = arith.constant 13 : index
    %298 = memref.load %arg1[%c13] : memref<200xf32, #tpu.memory_space<smem>>
    %299 = vector.broadcast %298 : f32 to vector<2x64xf32>
    %300 = arith.mulf %299, %143 : vector<2x64xf32>
    %301 = arith.addf %297, %300 : vector<2x64xf32>
    %c14 = arith.constant 14 : index
    %302 = memref.load %arg1[%c14] : memref<200xf32, #tpu.memory_space<smem>>
    %303 = vector.broadcast %302 : f32 to vector<2x64xf32>
    %304 = arith.mulf %303, %152 : vector<2x64xf32>
    %305 = arith.addf %301, %304 : vector<2x64xf32>
    %c15 = arith.constant 15 : index
    %306 = memref.load %arg1[%c15] : memref<200xf32, #tpu.memory_space<smem>>
    %307 = vector.broadcast %306 : f32 to vector<2x64xf32>
    %308 = arith.mulf %307, %161 : vector<2x64xf32>
    %309 = arith.addf %305, %308 : vector<2x64xf32>
    %c16 = arith.constant 16 : index
    %310 = memref.load %arg1[%c16] : memref<200xf32, #tpu.memory_space<smem>>
    %311 = vector.broadcast %310 : f32 to vector<2x64xf32>
    %312 = arith.mulf %311, %170 : vector<2x64xf32>
    %313 = arith.addf %309, %312 : vector<2x64xf32>
    %c17 = arith.constant 17 : index
    %314 = memref.load %arg1[%c17] : memref<200xf32, #tpu.memory_space<smem>>
    %315 = vector.broadcast %314 : f32 to vector<2x64xf32>
    %316 = arith.mulf %315, %179 : vector<2x64xf32>
    %317 = arith.addf %313, %316 : vector<2x64xf32>
    %c18 = arith.constant 18 : index
    %318 = memref.load %arg1[%c18] : memref<200xf32, #tpu.memory_space<smem>>
    %319 = vector.broadcast %318 : f32 to vector<2x64xf32>
    %320 = arith.mulf %319, %188 : vector<2x64xf32>
    %321 = arith.addf %317, %320 : vector<2x64xf32>
    %c19 = arith.constant 19 : index
    %322 = memref.load %arg1[%c19] : memref<200xf32, #tpu.memory_space<smem>>
    %323 = vector.broadcast %322 : f32 to vector<2x64xf32>
    %324 = arith.mulf %323, %197 : vector<2x64xf32>
    %325 = arith.addf %321, %324 : vector<2x64xf32>
    %c20 = arith.constant 20 : index
    %326 = memref.load %arg1[%c20] : memref<200xf32, #tpu.memory_space<smem>>
    %327 = vector.broadcast %326 : f32 to vector<2x64xf32>
    %328 = arith.mulf %327, %206 : vector<2x64xf32>
    %329 = arith.addf %325, %328 : vector<2x64xf32>
    %c21 = arith.constant 21 : index
    %330 = memref.load %arg1[%c21] : memref<200xf32, #tpu.memory_space<smem>>
    %331 = vector.broadcast %330 : f32 to vector<2x64xf32>
    %332 = arith.mulf %331, %215 : vector<2x64xf32>
    %333 = arith.addf %329, %332 : vector<2x64xf32>
    %c22 = arith.constant 22 : index
    %334 = memref.load %arg1[%c22] : memref<200xf32, #tpu.memory_space<smem>>
    %335 = vector.broadcast %334 : f32 to vector<2x64xf32>
    %336 = arith.mulf %335, %224 : vector<2x64xf32>
    %337 = arith.addf %333, %336 : vector<2x64xf32>
    %c23 = arith.constant 23 : index
    %338 = memref.load %arg1[%c23] : memref<200xf32, #tpu.memory_space<smem>>
    %339 = vector.broadcast %338 : f32 to vector<2x64xf32>
    %340 = arith.mulf %339, %233 : vector<2x64xf32>
    %341 = arith.addf %337, %340 : vector<2x64xf32>
    %c24 = arith.constant 24 : index
    %342 = memref.load %arg1[%c24] : memref<200xf32, #tpu.memory_space<smem>>
    %343 = vector.broadcast %342 : f32 to vector<2x64xf32>
    %344 = arith.mulf %343, %242 : vector<2x64xf32>
    %345 = arith.addf %341, %344 : vector<2x64xf32>
    %cst_28 = arith.constant 0.000000e+00 : f32
    %346 = vector.broadcast %cst_28 : f32 to vector<2x64xf32>
    %347 = arith.maximumf %345, %346 : vector<2x64xf32>
    %c0_29 = arith.constant 0 : index
    %c0_30 = arith.constant 0 : index
    %348 = vector.load %arg4[%c0_29, %c0_30] : memref<512x64xf32, #tpu.memory_space<vmem>>, vector<64x64xf32>
    %cst_31 = arith.constant dense<0.000000e+00> : vector<2x64xf32>
    %349 = tpu.matmul %347, %348, %cst_31 {dimension_numbers = #tpu.dot_dimension_numbers<[1], [0], [0], [1], [0, 0, 1, 1], [], []>} : vector<2x64xf32>, vector<64x64xf32>, vector<2x64xf32> -> vector<2x64xf32>
    %350 = arith.addf %243, %349 : vector<2x64xf32>
    %c1_32 = arith.constant 1 : index
    %351 = memref.load %arg2[%c1_32] : memref<8xf32, #tpu.memory_space<smem>>
    %c25 = arith.constant 25 : index
    %352 = memref.load %arg1[%c25] : memref<200xf32, #tpu.memory_space<smem>>
    %353 = vector.broadcast %352 : f32 to vector<2x64xf32>
    %354 = arith.mulf %353, %26 : vector<2x64xf32>
    %355 = vector.broadcast %351 : f32 to vector<2x64xf32>
    %356 = arith.addf %355, %354 : vector<2x64xf32>
    %c26 = arith.constant 26 : index
    %357 = memref.load %arg1[%c26] : memref<200xf32, #tpu.memory_space<smem>>
    %358 = vector.broadcast %357 : f32 to vector<2x64xf32>
    %359 = arith.mulf %358, %35 : vector<2x64xf32>
    %360 = arith.addf %356, %359 : vector<2x64xf32>
    %c27 = arith.constant 27 : index
    %361 = memref.load %arg1[%c27] : memref<200xf32, #tpu.memory_space<smem>>
    %362 = vector.broadcast %361 : f32 to vector<2x64xf32>
    %363 = arith.mulf %362, %44 : vector<2x64xf32>
    %364 = arith.addf %360, %363 : vector<2x64xf32>
    %c28 = arith.constant 28 : index
    %365 = memref.load %arg1[%c28] : memref<200xf32, #tpu.memory_space<smem>>
    %366 = vector.broadcast %365 : f32 to vector<2x64xf32>
    %367 = arith.mulf %366, %53 : vector<2x64xf32>
    %368 = arith.addf %364, %367 : vector<2x64xf32>
    %c29 = arith.constant 29 : index
    %369 = memref.load %arg1[%c29] : memref<200xf32, #tpu.memory_space<smem>>
    %370 = vector.broadcast %369 : f32 to vector<2x64xf32>
    %371 = arith.mulf %370, %62 : vector<2x64xf32>
    %372 = arith.addf %368, %371 : vector<2x64xf32>
    %c30 = arith.constant 30 : index
    %373 = memref.load %arg1[%c30] : memref<200xf32, #tpu.memory_space<smem>>
    %374 = vector.broadcast %373 : f32 to vector<2x64xf32>
    %375 = arith.mulf %374, %71 : vector<2x64xf32>
    %376 = arith.addf %372, %375 : vector<2x64xf32>
    %c31 = arith.constant 31 : index
    %377 = memref.load %arg1[%c31] : memref<200xf32, #tpu.memory_space<smem>>
    %378 = vector.broadcast %377 : f32 to vector<2x64xf32>
    %379 = arith.mulf %378, %80 : vector<2x64xf32>
    %380 = arith.addf %376, %379 : vector<2x64xf32>
    %c32 = arith.constant 32 : index
    %381 = memref.load %arg1[%c32] : memref<200xf32, #tpu.memory_space<smem>>
    %382 = vector.broadcast %381 : f32 to vector<2x64xf32>
    %383 = arith.mulf %382, %89 : vector<2x64xf32>
    %384 = arith.addf %380, %383 : vector<2x64xf32>
    %c33 = arith.constant 33 : index
    %385 = memref.load %arg1[%c33] : memref<200xf32, #tpu.memory_space<smem>>
    %386 = vector.broadcast %385 : f32 to vector<2x64xf32>
    %387 = arith.mulf %386, %98 : vector<2x64xf32>
    %388 = arith.addf %384, %387 : vector<2x64xf32>
    %c34 = arith.constant 34 : index
    %389 = memref.load %arg1[%c34] : memref<200xf32, #tpu.memory_space<smem>>
    %390 = vector.broadcast %389 : f32 to vector<2x64xf32>
    %391 = arith.mulf %390, %107 : vector<2x64xf32>
    %392 = arith.addf %388, %391 : vector<2x64xf32>
    %c35 = arith.constant 35 : index
    %393 = memref.load %arg1[%c35] : memref<200xf32, #tpu.memory_space<smem>>
    %394 = vector.broadcast %393 : f32 to vector<2x64xf32>
    %395 = arith.mulf %394, %116 : vector<2x64xf32>
    %396 = arith.addf %392, %395 : vector<2x64xf32>
    %c36 = arith.constant 36 : index
    %397 = memref.load %arg1[%c36] : memref<200xf32, #tpu.memory_space<smem>>
    %398 = vector.broadcast %397 : f32 to vector<2x64xf32>
    %399 = arith.mulf %398, %125 : vector<2x64xf32>
    %400 = arith.addf %396, %399 : vector<2x64xf32>
    %c37 = arith.constant 37 : index
    %401 = memref.load %arg1[%c37] : memref<200xf32, #tpu.memory_space<smem>>
    %402 = vector.broadcast %401 : f32 to vector<2x64xf32>
    %403 = arith.mulf %402, %134 : vector<2x64xf32>
    %404 = arith.addf %400, %403 : vector<2x64xf32>
    %c38 = arith.constant 38 : index
    %405 = memref.load %arg1[%c38] : memref<200xf32, #tpu.memory_space<smem>>
    %406 = vector.broadcast %405 : f32 to vector<2x64xf32>
    %407 = arith.mulf %406, %143 : vector<2x64xf32>
    %408 = arith.addf %404, %407 : vector<2x64xf32>
    %c39 = arith.constant 39 : index
    %409 = memref.load %arg1[%c39] : memref<200xf32, #tpu.memory_space<smem>>
    %410 = vector.broadcast %409 : f32 to vector<2x64xf32>
    %411 = arith.mulf %410, %152 : vector<2x64xf32>
    %412 = arith.addf %408, %411 : vector<2x64xf32>
    %c40 = arith.constant 40 : index
    %413 = memref.load %arg1[%c40] : memref<200xf32, #tpu.memory_space<smem>>
    %414 = vector.broadcast %413 : f32 to vector<2x64xf32>
    %415 = arith.mulf %414, %161 : vector<2x64xf32>
    %416 = arith.addf %412, %415 : vector<2x64xf32>
    %c41 = arith.constant 41 : index
    %417 = memref.load %arg1[%c41] : memref<200xf32, #tpu.memory_space<smem>>
    %418 = vector.broadcast %417 : f32 to vector<2x64xf32>
    %419 = arith.mulf %418, %170 : vector<2x64xf32>
    %420 = arith.addf %416, %419 : vector<2x64xf32>
    %c42 = arith.constant 42 : index
    %421 = memref.load %arg1[%c42] : memref<200xf32, #tpu.memory_space<smem>>
    %422 = vector.broadcast %421 : f32 to vector<2x64xf32>
    %423 = arith.mulf %422, %179 : vector<2x64xf32>
    %424 = arith.addf %420, %423 : vector<2x64xf32>
    %c43 = arith.constant 43 : index
    %425 = memref.load %arg1[%c43] : memref<200xf32, #tpu.memory_space<smem>>
    %426 = vector.broadcast %425 : f32 to vector<2x64xf32>
    %427 = arith.mulf %426, %188 : vector<2x64xf32>
    %428 = arith.addf %424, %427 : vector<2x64xf32>
    %c44 = arith.constant 44 : index
    %429 = memref.load %arg1[%c44] : memref<200xf32, #tpu.memory_space<smem>>
    %430 = vector.broadcast %429 : f32 to vector<2x64xf32>
    %431 = arith.mulf %430, %197 : vector<2x64xf32>
    %432 = arith.addf %428, %431 : vector<2x64xf32>
    %c45 = arith.constant 45 : index
    %433 = memref.load %arg1[%c45] : memref<200xf32, #tpu.memory_space<smem>>
    %434 = vector.broadcast %433 : f32 to vector<2x64xf32>
    %435 = arith.mulf %434, %206 : vector<2x64xf32>
    %436 = arith.addf %432, %435 : vector<2x64xf32>
    %c46 = arith.constant 46 : index
    %437 = memref.load %arg1[%c46] : memref<200xf32, #tpu.memory_space<smem>>
    %438 = vector.broadcast %437 : f32 to vector<2x64xf32>
    %439 = arith.mulf %438, %215 : vector<2x64xf32>
    %440 = arith.addf %436, %439 : vector<2x64xf32>
    %c47 = arith.constant 47 : index
    %441 = memref.load %arg1[%c47] : memref<200xf32, #tpu.memory_space<smem>>
    %442 = vector.broadcast %441 : f32 to vector<2x64xf32>
    %443 = arith.mulf %442, %224 : vector<2x64xf32>
    %444 = arith.addf %440, %443 : vector<2x64xf32>
    %c48 = arith.constant 48 : index
    %445 = memref.load %arg1[%c48] : memref<200xf32, #tpu.memory_space<smem>>
    %446 = vector.broadcast %445 : f32 to vector<2x64xf32>
    %447 = arith.mulf %446, %233 : vector<2x64xf32>
    %448 = arith.addf %444, %447 : vector<2x64xf32>
    %c49 = arith.constant 49 : index
    %449 = memref.load %arg1[%c49] : memref<200xf32, #tpu.memory_space<smem>>
    %450 = vector.broadcast %449 : f32 to vector<2x64xf32>
    %451 = arith.mulf %450, %242 : vector<2x64xf32>
    %452 = arith.addf %448, %451 : vector<2x64xf32>
    %cst_33 = arith.constant 0.000000e+00 : f32
    %453 = vector.broadcast %cst_33 : f32 to vector<2x64xf32>
    %454 = arith.maximumf %452, %453 : vector<2x64xf32>
    %c64 = arith.constant 64 : index
    %c0_34 = arith.constant 0 : index
    %455 = vector.load %arg4[%c64, %c0_34] : memref<512x64xf32, #tpu.memory_space<vmem>>, vector<64x64xf32>
    %cst_35 = arith.constant dense<0.000000e+00> : vector<2x64xf32>
    %456 = tpu.matmul %454, %455, %cst_35 {dimension_numbers = #tpu.dot_dimension_numbers<[1], [0], [0], [1], [0, 0, 1, 1], [], []>} : vector<2x64xf32>, vector<64x64xf32>, vector<2x64xf32> -> vector<2x64xf32>
    %457 = arith.addf %350, %456 : vector<2x64xf32>
    %c2_36 = arith.constant 2 : index
    %458 = memref.load %arg2[%c2_36] : memref<8xf32, #tpu.memory_space<smem>>
    %c50 = arith.constant 50 : index
    %459 = memref.load %arg1[%c50] : memref<200xf32, #tpu.memory_space<smem>>
    %460 = vector.broadcast %459 : f32 to vector<2x64xf32>
    %461 = arith.mulf %460, %26 : vector<2x64xf32>
    %462 = vector.broadcast %458 : f32 to vector<2x64xf32>
    %463 = arith.addf %462, %461 : vector<2x64xf32>
    %c51 = arith.constant 51 : index
    %464 = memref.load %arg1[%c51] : memref<200xf32, #tpu.memory_space<smem>>
    %465 = vector.broadcast %464 : f32 to vector<2x64xf32>
    %466 = arith.mulf %465, %35 : vector<2x64xf32>
    %467 = arith.addf %463, %466 : vector<2x64xf32>
    %c52 = arith.constant 52 : index
    %468 = memref.load %arg1[%c52] : memref<200xf32, #tpu.memory_space<smem>>
    %469 = vector.broadcast %468 : f32 to vector<2x64xf32>
    %470 = arith.mulf %469, %44 : vector<2x64xf32>
    %471 = arith.addf %467, %470 : vector<2x64xf32>
    %c53 = arith.constant 53 : index
    %472 = memref.load %arg1[%c53] : memref<200xf32, #tpu.memory_space<smem>>
    %473 = vector.broadcast %472 : f32 to vector<2x64xf32>
    %474 = arith.mulf %473, %53 : vector<2x64xf32>
    %475 = arith.addf %471, %474 : vector<2x64xf32>
    %c54 = arith.constant 54 : index
    %476 = memref.load %arg1[%c54] : memref<200xf32, #tpu.memory_space<smem>>
    %477 = vector.broadcast %476 : f32 to vector<2x64xf32>
    %478 = arith.mulf %477, %62 : vector<2x64xf32>
    %479 = arith.addf %475, %478 : vector<2x64xf32>
    %c55 = arith.constant 55 : index
    %480 = memref.load %arg1[%c55] : memref<200xf32, #tpu.memory_space<smem>>
    %481 = vector.broadcast %480 : f32 to vector<2x64xf32>
    %482 = arith.mulf %481, %71 : vector<2x64xf32>
    %483 = arith.addf %479, %482 : vector<2x64xf32>
    %c56 = arith.constant 56 : index
    %484 = memref.load %arg1[%c56] : memref<200xf32, #tpu.memory_space<smem>>
    %485 = vector.broadcast %484 : f32 to vector<2x64xf32>
    %486 = arith.mulf %485, %80 : vector<2x64xf32>
    %487 = arith.addf %483, %486 : vector<2x64xf32>
    %c57 = arith.constant 57 : index
    %488 = memref.load %arg1[%c57] : memref<200xf32, #tpu.memory_space<smem>>
    %489 = vector.broadcast %488 : f32 to vector<2x64xf32>
    %490 = arith.mulf %489, %89 : vector<2x64xf32>
    %491 = arith.addf %487, %490 : vector<2x64xf32>
    %c58 = arith.constant 58 : index
    %492 = memref.load %arg1[%c58] : memref<200xf32, #tpu.memory_space<smem>>
    %493 = vector.broadcast %492 : f32 to vector<2x64xf32>
    %494 = arith.mulf %493, %98 : vector<2x64xf32>
    %495 = arith.addf %491, %494 : vector<2x64xf32>
    %c59 = arith.constant 59 : index
    %496 = memref.load %arg1[%c59] : memref<200xf32, #tpu.memory_space<smem>>
    %497 = vector.broadcast %496 : f32 to vector<2x64xf32>
    %498 = arith.mulf %497, %107 : vector<2x64xf32>
    %499 = arith.addf %495, %498 : vector<2x64xf32>
    %c60 = arith.constant 60 : index
    %500 = memref.load %arg1[%c60] : memref<200xf32, #tpu.memory_space<smem>>
    %501 = vector.broadcast %500 : f32 to vector<2x64xf32>
    %502 = arith.mulf %501, %116 : vector<2x64xf32>
    %503 = arith.addf %499, %502 : vector<2x64xf32>
    %c61 = arith.constant 61 : index
    %504 = memref.load %arg1[%c61] : memref<200xf32, #tpu.memory_space<smem>>
    %505 = vector.broadcast %504 : f32 to vector<2x64xf32>
    %506 = arith.mulf %505, %125 : vector<2x64xf32>
    %507 = arith.addf %503, %506 : vector<2x64xf32>
    %c62 = arith.constant 62 : index
    %508 = memref.load %arg1[%c62] : memref<200xf32, #tpu.memory_space<smem>>
    %509 = vector.broadcast %508 : f32 to vector<2x64xf32>
    %510 = arith.mulf %509, %134 : vector<2x64xf32>
    %511 = arith.addf %507, %510 : vector<2x64xf32>
    %c63 = arith.constant 63 : index
    %512 = memref.load %arg1[%c63] : memref<200xf32, #tpu.memory_space<smem>>
    %513 = vector.broadcast %512 : f32 to vector<2x64xf32>
    %514 = arith.mulf %513, %143 : vector<2x64xf32>
    %515 = arith.addf %511, %514 : vector<2x64xf32>
    %c64_37 = arith.constant 64 : index
    %516 = memref.load %arg1[%c64_37] : memref<200xf32, #tpu.memory_space<smem>>
    %517 = vector.broadcast %516 : f32 to vector<2x64xf32>
    %518 = arith.mulf %517, %152 : vector<2x64xf32>
    %519 = arith.addf %515, %518 : vector<2x64xf32>
    %c65 = arith.constant 65 : index
    %520 = memref.load %arg1[%c65] : memref<200xf32, #tpu.memory_space<smem>>
    %521 = vector.broadcast %520 : f32 to vector<2x64xf32>
    %522 = arith.mulf %521, %161 : vector<2x64xf32>
    %523 = arith.addf %519, %522 : vector<2x64xf32>
    %c66 = arith.constant 66 : index
    %524 = memref.load %arg1[%c66] : memref<200xf32, #tpu.memory_space<smem>>
    %525 = vector.broadcast %524 : f32 to vector<2x64xf32>
    %526 = arith.mulf %525, %170 : vector<2x64xf32>
    %527 = arith.addf %523, %526 : vector<2x64xf32>
    %c67 = arith.constant 67 : index
    %528 = memref.load %arg1[%c67] : memref<200xf32, #tpu.memory_space<smem>>
    %529 = vector.broadcast %528 : f32 to vector<2x64xf32>
    %530 = arith.mulf %529, %179 : vector<2x64xf32>
    %531 = arith.addf %527, %530 : vector<2x64xf32>
    %c68 = arith.constant 68 : index
    %532 = memref.load %arg1[%c68] : memref<200xf32, #tpu.memory_space<smem>>
    %533 = vector.broadcast %532 : f32 to vector<2x64xf32>
    %534 = arith.mulf %533, %188 : vector<2x64xf32>
    %535 = arith.addf %531, %534 : vector<2x64xf32>
    %c69 = arith.constant 69 : index
    %536 = memref.load %arg1[%c69] : memref<200xf32, #tpu.memory_space<smem>>
    %537 = vector.broadcast %536 : f32 to vector<2x64xf32>
    %538 = arith.mulf %537, %197 : vector<2x64xf32>
    %539 = arith.addf %535, %538 : vector<2x64xf32>
    %c70 = arith.constant 70 : index
    %540 = memref.load %arg1[%c70] : memref<200xf32, #tpu.memory_space<smem>>
    %541 = vector.broadcast %540 : f32 to vector<2x64xf32>
    %542 = arith.mulf %541, %206 : vector<2x64xf32>
    %543 = arith.addf %539, %542 : vector<2x64xf32>
    %c71 = arith.constant 71 : index
    %544 = memref.load %arg1[%c71] : memref<200xf32, #tpu.memory_space<smem>>
    %545 = vector.broadcast %544 : f32 to vector<2x64xf32>
    %546 = arith.mulf %545, %215 : vector<2x64xf32>
    %547 = arith.addf %543, %546 : vector<2x64xf32>
    %c72 = arith.constant 72 : index
    %548 = memref.load %arg1[%c72] : memref<200xf32, #tpu.memory_space<smem>>
    %549 = vector.broadcast %548 : f32 to vector<2x64xf32>
    %550 = arith.mulf %549, %224 : vector<2x64xf32>
    %551 = arith.addf %547, %550 : vector<2x64xf32>
    %c73 = arith.constant 73 : index
    %552 = memref.load %arg1[%c73] : memref<200xf32, #tpu.memory_space<smem>>
    %553 = vector.broadcast %552 : f32 to vector<2x64xf32>
    %554 = arith.mulf %553, %233 : vector<2x64xf32>
    %555 = arith.addf %551, %554 : vector<2x64xf32>
    %c74 = arith.constant 74 : index
    %556 = memref.load %arg1[%c74] : memref<200xf32, #tpu.memory_space<smem>>
    %557 = vector.broadcast %556 : f32 to vector<2x64xf32>
    %558 = arith.mulf %557, %242 : vector<2x64xf32>
    %559 = arith.addf %555, %558 : vector<2x64xf32>
    %cst_38 = arith.constant 0.000000e+00 : f32
    %560 = vector.broadcast %cst_38 : f32 to vector<2x64xf32>
    %561 = arith.maximumf %559, %560 : vector<2x64xf32>
    %c128 = arith.constant 128 : index
    %c0_39 = arith.constant 0 : index
    %562 = vector.load %arg4[%c128, %c0_39] : memref<512x64xf32, #tpu.memory_space<vmem>>, vector<64x64xf32>
    %cst_40 = arith.constant dense<0.000000e+00> : vector<2x64xf32>
    %563 = tpu.matmul %561, %562, %cst_40 {dimension_numbers = #tpu.dot_dimension_numbers<[1], [0], [0], [1], [0, 0, 1, 1], [], []>} : vector<2x64xf32>, vector<64x64xf32>, vector<2x64xf32> -> vector<2x64xf32>
    %564 = arith.addf %457, %563 : vector<2x64xf32>
    %c3_41 = arith.constant 3 : index
    %565 = memref.load %arg2[%c3_41] : memref<8xf32, #tpu.memory_space<smem>>
    %c75 = arith.constant 75 : index
    %566 = memref.load %arg1[%c75] : memref<200xf32, #tpu.memory_space<smem>>
    %567 = vector.broadcast %566 : f32 to vector<2x64xf32>
    %568 = arith.mulf %567, %26 : vector<2x64xf32>
    %569 = vector.broadcast %565 : f32 to vector<2x64xf32>
    %570 = arith.addf %569, %568 : vector<2x64xf32>
    %c76 = arith.constant 76 : index
    %571 = memref.load %arg1[%c76] : memref<200xf32, #tpu.memory_space<smem>>
    %572 = vector.broadcast %571 : f32 to vector<2x64xf32>
    %573 = arith.mulf %572, %35 : vector<2x64xf32>
    %574 = arith.addf %570, %573 : vector<2x64xf32>
    %c77 = arith.constant 77 : index
    %575 = memref.load %arg1[%c77] : memref<200xf32, #tpu.memory_space<smem>>
    %576 = vector.broadcast %575 : f32 to vector<2x64xf32>
    %577 = arith.mulf %576, %44 : vector<2x64xf32>
    %578 = arith.addf %574, %577 : vector<2x64xf32>
    %c78 = arith.constant 78 : index
    %579 = memref.load %arg1[%c78] : memref<200xf32, #tpu.memory_space<smem>>
    %580 = vector.broadcast %579 : f32 to vector<2x64xf32>
    %581 = arith.mulf %580, %53 : vector<2x64xf32>
    %582 = arith.addf %578, %581 : vector<2x64xf32>
    %c79 = arith.constant 79 : index
    %583 = memref.load %arg1[%c79] : memref<200xf32, #tpu.memory_space<smem>>
    %584 = vector.broadcast %583 : f32 to vector<2x64xf32>
    %585 = arith.mulf %584, %62 : vector<2x64xf32>
    %586 = arith.addf %582, %585 : vector<2x64xf32>
    %c80 = arith.constant 80 : index
    %587 = memref.load %arg1[%c80] : memref<200xf32, #tpu.memory_space<smem>>
    %588 = vector.broadcast %587 : f32 to vector<2x64xf32>
    %589 = arith.mulf %588, %71 : vector<2x64xf32>
    %590 = arith.addf %586, %589 : vector<2x64xf32>
    %c81 = arith.constant 81 : index
    %591 = memref.load %arg1[%c81] : memref<200xf32, #tpu.memory_space<smem>>
    %592 = vector.broadcast %591 : f32 to vector<2x64xf32>
    %593 = arith.mulf %592, %80 : vector<2x64xf32>
    %594 = arith.addf %590, %593 : vector<2x64xf32>
    %c82 = arith.constant 82 : index
    %595 = memref.load %arg1[%c82] : memref<200xf32, #tpu.memory_space<smem>>
    %596 = vector.broadcast %595 : f32 to vector<2x64xf32>
    %597 = arith.mulf %596, %89 : vector<2x64xf32>
    %598 = arith.addf %594, %597 : vector<2x64xf32>
    %c83 = arith.constant 83 : index
    %599 = memref.load %arg1[%c83] : memref<200xf32, #tpu.memory_space<smem>>
    %600 = vector.broadcast %599 : f32 to vector<2x64xf32>
    %601 = arith.mulf %600, %98 : vector<2x64xf32>
    %602 = arith.addf %598, %601 : vector<2x64xf32>
    %c84 = arith.constant 84 : index
    %603 = memref.load %arg1[%c84] : memref<200xf32, #tpu.memory_space<smem>>
    %604 = vector.broadcast %603 : f32 to vector<2x64xf32>
    %605 = arith.mulf %604, %107 : vector<2x64xf32>
    %606 = arith.addf %602, %605 : vector<2x64xf32>
    %c85 = arith.constant 85 : index
    %607 = memref.load %arg1[%c85] : memref<200xf32, #tpu.memory_space<smem>>
    %608 = vector.broadcast %607 : f32 to vector<2x64xf32>
    %609 = arith.mulf %608, %116 : vector<2x64xf32>
    %610 = arith.addf %606, %609 : vector<2x64xf32>
    %c86 = arith.constant 86 : index
    %611 = memref.load %arg1[%c86] : memref<200xf32, #tpu.memory_space<smem>>
    %612 = vector.broadcast %611 : f32 to vector<2x64xf32>
    %613 = arith.mulf %612, %125 : vector<2x64xf32>
    %614 = arith.addf %610, %613 : vector<2x64xf32>
    %c87 = arith.constant 87 : index
    %615 = memref.load %arg1[%c87] : memref<200xf32, #tpu.memory_space<smem>>
    %616 = vector.broadcast %615 : f32 to vector<2x64xf32>
    %617 = arith.mulf %616, %134 : vector<2x64xf32>
    %618 = arith.addf %614, %617 : vector<2x64xf32>
    %c88 = arith.constant 88 : index
    %619 = memref.load %arg1[%c88] : memref<200xf32, #tpu.memory_space<smem>>
    %620 = vector.broadcast %619 : f32 to vector<2x64xf32>
    %621 = arith.mulf %620, %143 : vector<2x64xf32>
    %622 = arith.addf %618, %621 : vector<2x64xf32>
    %c89 = arith.constant 89 : index
    %623 = memref.load %arg1[%c89] : memref<200xf32, #tpu.memory_space<smem>>
    %624 = vector.broadcast %623 : f32 to vector<2x64xf32>
    %625 = arith.mulf %624, %152 : vector<2x64xf32>
    %626 = arith.addf %622, %625 : vector<2x64xf32>
    %c90 = arith.constant 90 : index
    %627 = memref.load %arg1[%c90] : memref<200xf32, #tpu.memory_space<smem>>
    %628 = vector.broadcast %627 : f32 to vector<2x64xf32>
    %629 = arith.mulf %628, %161 : vector<2x64xf32>
    %630 = arith.addf %626, %629 : vector<2x64xf32>
    %c91 = arith.constant 91 : index
    %631 = memref.load %arg1[%c91] : memref<200xf32, #tpu.memory_space<smem>>
    %632 = vector.broadcast %631 : f32 to vector<2x64xf32>
    %633 = arith.mulf %632, %170 : vector<2x64xf32>
    %634 = arith.addf %630, %633 : vector<2x64xf32>
    %c92 = arith.constant 92 : index
    %635 = memref.load %arg1[%c92] : memref<200xf32, #tpu.memory_space<smem>>
    %636 = vector.broadcast %635 : f32 to vector<2x64xf32>
    %637 = arith.mulf %636, %179 : vector<2x64xf32>
    %638 = arith.addf %634, %637 : vector<2x64xf32>
    %c93 = arith.constant 93 : index
    %639 = memref.load %arg1[%c93] : memref<200xf32, #tpu.memory_space<smem>>
    %640 = vector.broadcast %639 : f32 to vector<2x64xf32>
    %641 = arith.mulf %640, %188 : vector<2x64xf32>
    %642 = arith.addf %638, %641 : vector<2x64xf32>
    %c94 = arith.constant 94 : index
    %643 = memref.load %arg1[%c94] : memref<200xf32, #tpu.memory_space<smem>>
    %644 = vector.broadcast %643 : f32 to vector<2x64xf32>
    %645 = arith.mulf %644, %197 : vector<2x64xf32>
    %646 = arith.addf %642, %645 : vector<2x64xf32>
    %c95 = arith.constant 95 : index
    %647 = memref.load %arg1[%c95] : memref<200xf32, #tpu.memory_space<smem>>
    %648 = vector.broadcast %647 : f32 to vector<2x64xf32>
    %649 = arith.mulf %648, %206 : vector<2x64xf32>
    %650 = arith.addf %646, %649 : vector<2x64xf32>
    %c96 = arith.constant 96 : index
    %651 = memref.load %arg1[%c96] : memref<200xf32, #tpu.memory_space<smem>>
    %652 = vector.broadcast %651 : f32 to vector<2x64xf32>
    %653 = arith.mulf %652, %215 : vector<2x64xf32>
    %654 = arith.addf %650, %653 : vector<2x64xf32>
    %c97 = arith.constant 97 : index
    %655 = memref.load %arg1[%c97] : memref<200xf32, #tpu.memory_space<smem>>
    %656 = vector.broadcast %655 : f32 to vector<2x64xf32>
    %657 = arith.mulf %656, %224 : vector<2x64xf32>
    %658 = arith.addf %654, %657 : vector<2x64xf32>
    %c98 = arith.constant 98 : index
    %659 = memref.load %arg1[%c98] : memref<200xf32, #tpu.memory_space<smem>>
    %660 = vector.broadcast %659 : f32 to vector<2x64xf32>
    %661 = arith.mulf %660, %233 : vector<2x64xf32>
    %662 = arith.addf %658, %661 : vector<2x64xf32>
    %c99 = arith.constant 99 : index
    %663 = memref.load %arg1[%c99] : memref<200xf32, #tpu.memory_space<smem>>
    %664 = vector.broadcast %663 : f32 to vector<2x64xf32>
    %665 = arith.mulf %664, %242 : vector<2x64xf32>
    %666 = arith.addf %662, %665 : vector<2x64xf32>
    %cst_42 = arith.constant 0.000000e+00 : f32
    %667 = vector.broadcast %cst_42 : f32 to vector<2x64xf32>
    %668 = arith.maximumf %666, %667 : vector<2x64xf32>
    %c192 = arith.constant 192 : index
    %c0_43 = arith.constant 0 : index
    %669 = vector.load %arg4[%c192, %c0_43] : memref<512x64xf32, #tpu.memory_space<vmem>>, vector<64x64xf32>
    %cst_44 = arith.constant dense<0.000000e+00> : vector<2x64xf32>
    %670 = tpu.matmul %668, %669, %cst_44 {dimension_numbers = #tpu.dot_dimension_numbers<[1], [0], [0], [1], [0, 0, 1, 1], [], []>} : vector<2x64xf32>, vector<64x64xf32>, vector<2x64xf32> -> vector<2x64xf32>
    %671 = arith.addf %564, %670 : vector<2x64xf32>
    %c4_45 = arith.constant 4 : index
    %672 = memref.load %arg2[%c4_45] : memref<8xf32, #tpu.memory_space<smem>>
    %c100 = arith.constant 100 : index
    %673 = memref.load %arg1[%c100] : memref<200xf32, #tpu.memory_space<smem>>
    %674 = vector.broadcast %673 : f32 to vector<2x64xf32>
    %675 = arith.mulf %674, %26 : vector<2x64xf32>
    %676 = vector.broadcast %672 : f32 to vector<2x64xf32>
    %677 = arith.addf %676, %675 : vector<2x64xf32>
    %c101 = arith.constant 101 : index
    %678 = memref.load %arg1[%c101] : memref<200xf32, #tpu.memory_space<smem>>
    %679 = vector.broadcast %678 : f32 to vector<2x64xf32>
    %680 = arith.mulf %679, %35 : vector<2x64xf32>
    %681 = arith.addf %677, %680 : vector<2x64xf32>
    %c102 = arith.constant 102 : index
    %682 = memref.load %arg1[%c102] : memref<200xf32, #tpu.memory_space<smem>>
    %683 = vector.broadcast %682 : f32 to vector<2x64xf32>
    %684 = arith.mulf %683, %44 : vector<2x64xf32>
    %685 = arith.addf %681, %684 : vector<2x64xf32>
    %c103 = arith.constant 103 : index
    %686 = memref.load %arg1[%c103] : memref<200xf32, #tpu.memory_space<smem>>
    %687 = vector.broadcast %686 : f32 to vector<2x64xf32>
    %688 = arith.mulf %687, %53 : vector<2x64xf32>
    %689 = arith.addf %685, %688 : vector<2x64xf32>
    %c104 = arith.constant 104 : index
    %690 = memref.load %arg1[%c104] : memref<200xf32, #tpu.memory_space<smem>>
    %691 = vector.broadcast %690 : f32 to vector<2x64xf32>
    %692 = arith.mulf %691, %62 : vector<2x64xf32>
    %693 = arith.addf %689, %692 : vector<2x64xf32>
    %c105 = arith.constant 105 : index
    %694 = memref.load %arg1[%c105] : memref<200xf32, #tpu.memory_space<smem>>
    %695 = vector.broadcast %694 : f32 to vector<2x64xf32>
    %696 = arith.mulf %695, %71 : vector<2x64xf32>
    %697 = arith.addf %693, %696 : vector<2x64xf32>
    %c106 = arith.constant 106 : index
    %698 = memref.load %arg1[%c106] : memref<200xf32, #tpu.memory_space<smem>>
    %699 = vector.broadcast %698 : f32 to vector<2x64xf32>
    %700 = arith.mulf %699, %80 : vector<2x64xf32>
    %701 = arith.addf %697, %700 : vector<2x64xf32>
    %c107 = arith.constant 107 : index
    %702 = memref.load %arg1[%c107] : memref<200xf32, #tpu.memory_space<smem>>
    %703 = vector.broadcast %702 : f32 to vector<2x64xf32>
    %704 = arith.mulf %703, %89 : vector<2x64xf32>
    %705 = arith.addf %701, %704 : vector<2x64xf32>
    %c108 = arith.constant 108 : index
    %706 = memref.load %arg1[%c108] : memref<200xf32, #tpu.memory_space<smem>>
    %707 = vector.broadcast %706 : f32 to vector<2x64xf32>
    %708 = arith.mulf %707, %98 : vector<2x64xf32>
    %709 = arith.addf %705, %708 : vector<2x64xf32>
    %c109 = arith.constant 109 : index
    %710 = memref.load %arg1[%c109] : memref<200xf32, #tpu.memory_space<smem>>
    %711 = vector.broadcast %710 : f32 to vector<2x64xf32>
    %712 = arith.mulf %711, %107 : vector<2x64xf32>
    %713 = arith.addf %709, %712 : vector<2x64xf32>
    %c110 = arith.constant 110 : index
    %714 = memref.load %arg1[%c110] : memref<200xf32, #tpu.memory_space<smem>>
    %715 = vector.broadcast %714 : f32 to vector<2x64xf32>
    %716 = arith.mulf %715, %116 : vector<2x64xf32>
    %717 = arith.addf %713, %716 : vector<2x64xf32>
    %c111 = arith.constant 111 : index
    %718 = memref.load %arg1[%c111] : memref<200xf32, #tpu.memory_space<smem>>
    %719 = vector.broadcast %718 : f32 to vector<2x64xf32>
    %720 = arith.mulf %719, %125 : vector<2x64xf32>
    %721 = arith.addf %717, %720 : vector<2x64xf32>
    %c112 = arith.constant 112 : index
    %722 = memref.load %arg1[%c112] : memref<200xf32, #tpu.memory_space<smem>>
    %723 = vector.broadcast %722 : f32 to vector<2x64xf32>
    %724 = arith.mulf %723, %134 : vector<2x64xf32>
    %725 = arith.addf %721, %724 : vector<2x64xf32>
    %c113 = arith.constant 113 : index
    %726 = memref.load %arg1[%c113] : memref<200xf32, #tpu.memory_space<smem>>
    %727 = vector.broadcast %726 : f32 to vector<2x64xf32>
    %728 = arith.mulf %727, %143 : vector<2x64xf32>
    %729 = arith.addf %725, %728 : vector<2x64xf32>
    %c114 = arith.constant 114 : index
    %730 = memref.load %arg1[%c114] : memref<200xf32, #tpu.memory_space<smem>>
    %731 = vector.broadcast %730 : f32 to vector<2x64xf32>
    %732 = arith.mulf %731, %152 : vector<2x64xf32>
    %733 = arith.addf %729, %732 : vector<2x64xf32>
    %c115 = arith.constant 115 : index
    %734 = memref.load %arg1[%c115] : memref<200xf32, #tpu.memory_space<smem>>
    %735 = vector.broadcast %734 : f32 to vector<2x64xf32>
    %736 = arith.mulf %735, %161 : vector<2x64xf32>
    %737 = arith.addf %733, %736 : vector<2x64xf32>
    %c116 = arith.constant 116 : index
    %738 = memref.load %arg1[%c116] : memref<200xf32, #tpu.memory_space<smem>>
    %739 = vector.broadcast %738 : f32 to vector<2x64xf32>
    %740 = arith.mulf %739, %170 : vector<2x64xf32>
    %741 = arith.addf %737, %740 : vector<2x64xf32>
    %c117 = arith.constant 117 : index
    %742 = memref.load %arg1[%c117] : memref<200xf32, #tpu.memory_space<smem>>
    %743 = vector.broadcast %742 : f32 to vector<2x64xf32>
    %744 = arith.mulf %743, %179 : vector<2x64xf32>
    %745 = arith.addf %741, %744 : vector<2x64xf32>
    %c118 = arith.constant 118 : index
    %746 = memref.load %arg1[%c118] : memref<200xf32, #tpu.memory_space<smem>>
    %747 = vector.broadcast %746 : f32 to vector<2x64xf32>
    %748 = arith.mulf %747, %188 : vector<2x64xf32>
    %749 = arith.addf %745, %748 : vector<2x64xf32>
    %c119 = arith.constant 119 : index
    %750 = memref.load %arg1[%c119] : memref<200xf32, #tpu.memory_space<smem>>
    %751 = vector.broadcast %750 : f32 to vector<2x64xf32>
    %752 = arith.mulf %751, %197 : vector<2x64xf32>
    %753 = arith.addf %749, %752 : vector<2x64xf32>
    %c120 = arith.constant 120 : index
    %754 = memref.load %arg1[%c120] : memref<200xf32, #tpu.memory_space<smem>>
    %755 = vector.broadcast %754 : f32 to vector<2x64xf32>
    %756 = arith.mulf %755, %206 : vector<2x64xf32>
    %757 = arith.addf %753, %756 : vector<2x64xf32>
    %c121 = arith.constant 121 : index
    %758 = memref.load %arg1[%c121] : memref<200xf32, #tpu.memory_space<smem>>
    %759 = vector.broadcast %758 : f32 to vector<2x64xf32>
    %760 = arith.mulf %759, %215 : vector<2x64xf32>
    %761 = arith.addf %757, %760 : vector<2x64xf32>
    %c122 = arith.constant 122 : index
    %762 = memref.load %arg1[%c122] : memref<200xf32, #tpu.memory_space<smem>>
    %763 = vector.broadcast %762 : f32 to vector<2x64xf32>
    %764 = arith.mulf %763, %224 : vector<2x64xf32>
    %765 = arith.addf %761, %764 : vector<2x64xf32>
    %c123 = arith.constant 123 : index
    %766 = memref.load %arg1[%c123] : memref<200xf32, #tpu.memory_space<smem>>
    %767 = vector.broadcast %766 : f32 to vector<2x64xf32>
    %768 = arith.mulf %767, %233 : vector<2x64xf32>
    %769 = arith.addf %765, %768 : vector<2x64xf32>
    %c124 = arith.constant 124 : index
    %770 = memref.load %arg1[%c124] : memref<200xf32, #tpu.memory_space<smem>>
    %771 = vector.broadcast %770 : f32 to vector<2x64xf32>
    %772 = arith.mulf %771, %242 : vector<2x64xf32>
    %773 = arith.addf %769, %772 : vector<2x64xf32>
    %cst_46 = arith.constant 0.000000e+00 : f32
    %774 = vector.broadcast %cst_46 : f32 to vector<2x64xf32>
    %775 = arith.maximumf %773, %774 : vector<2x64xf32>
    %c256 = arith.constant 256 : index
    %c0_47 = arith.constant 0 : index
    %776 = vector.load %arg4[%c256, %c0_47] : memref<512x64xf32, #tpu.memory_space<vmem>>, vector<64x64xf32>
    %cst_48 = arith.constant dense<0.000000e+00> : vector<2x64xf32>
    %777 = tpu.matmul %775, %776, %cst_48 {dimension_numbers = #tpu.dot_dimension_numbers<[1], [0], [0], [1], [0, 0, 1, 1], [], []>} : vector<2x64xf32>, vector<64x64xf32>, vector<2x64xf32> -> vector<2x64xf32>
    %778 = arith.addf %671, %777 : vector<2x64xf32>
    %c5_49 = arith.constant 5 : index
    %779 = memref.load %arg2[%c5_49] : memref<8xf32, #tpu.memory_space<smem>>
    %c125 = arith.constant 125 : index
    %780 = memref.load %arg1[%c125] : memref<200xf32, #tpu.memory_space<smem>>
    %781 = vector.broadcast %780 : f32 to vector<2x64xf32>
    %782 = arith.mulf %781, %26 : vector<2x64xf32>
    %783 = vector.broadcast %779 : f32 to vector<2x64xf32>
    %784 = arith.addf %783, %782 : vector<2x64xf32>
    %c126 = arith.constant 126 : index
    %785 = memref.load %arg1[%c126] : memref<200xf32, #tpu.memory_space<smem>>
    %786 = vector.broadcast %785 : f32 to vector<2x64xf32>
    %787 = arith.mulf %786, %35 : vector<2x64xf32>
    %788 = arith.addf %784, %787 : vector<2x64xf32>
    %c127 = arith.constant 127 : index
    %789 = memref.load %arg1[%c127] : memref<200xf32, #tpu.memory_space<smem>>
    %790 = vector.broadcast %789 : f32 to vector<2x64xf32>
    %791 = arith.mulf %790, %44 : vector<2x64xf32>
    %792 = arith.addf %788, %791 : vector<2x64xf32>
    %c128_50 = arith.constant 128 : index
    %793 = memref.load %arg1[%c128_50] : memref<200xf32, #tpu.memory_space<smem>>
    %794 = vector.broadcast %793 : f32 to vector<2x64xf32>
    %795 = arith.mulf %794, %53 : vector<2x64xf32>
    %796 = arith.addf %792, %795 : vector<2x64xf32>
    %c129 = arith.constant 129 : index
    %797 = memref.load %arg1[%c129] : memref<200xf32, #tpu.memory_space<smem>>
    %798 = vector.broadcast %797 : f32 to vector<2x64xf32>
    %799 = arith.mulf %798, %62 : vector<2x64xf32>
    %800 = arith.addf %796, %799 : vector<2x64xf32>
    %c130 = arith.constant 130 : index
    %801 = memref.load %arg1[%c130] : memref<200xf32, #tpu.memory_space<smem>>
    %802 = vector.broadcast %801 : f32 to vector<2x64xf32>
    %803 = arith.mulf %802, %71 : vector<2x64xf32>
    %804 = arith.addf %800, %803 : vector<2x64xf32>
    %c131 = arith.constant 131 : index
    %805 = memref.load %arg1[%c131] : memref<200xf32, #tpu.memory_space<smem>>
    %806 = vector.broadcast %805 : f32 to vector<2x64xf32>
    %807 = arith.mulf %806, %80 : vector<2x64xf32>
    %808 = arith.addf %804, %807 : vector<2x64xf32>
    %c132 = arith.constant 132 : index
    %809 = memref.load %arg1[%c132] : memref<200xf32, #tpu.memory_space<smem>>
    %810 = vector.broadcast %809 : f32 to vector<2x64xf32>
    %811 = arith.mulf %810, %89 : vector<2x64xf32>
    %812 = arith.addf %808, %811 : vector<2x64xf32>
    %c133 = arith.constant 133 : index
    %813 = memref.load %arg1[%c133] : memref<200xf32, #tpu.memory_space<smem>>
    %814 = vector.broadcast %813 : f32 to vector<2x64xf32>
    %815 = arith.mulf %814, %98 : vector<2x64xf32>
    %816 = arith.addf %812, %815 : vector<2x64xf32>
    %c134 = arith.constant 134 : index
    %817 = memref.load %arg1[%c134] : memref<200xf32, #tpu.memory_space<smem>>
    %818 = vector.broadcast %817 : f32 to vector<2x64xf32>
    %819 = arith.mulf %818, %107 : vector<2x64xf32>
    %820 = arith.addf %816, %819 : vector<2x64xf32>
    %c135 = arith.constant 135 : index
    %821 = memref.load %arg1[%c135] : memref<200xf32, #tpu.memory_space<smem>>
    %822 = vector.broadcast %821 : f32 to vector<2x64xf32>
    %823 = arith.mulf %822, %116 : vector<2x64xf32>
    %824 = arith.addf %820, %823 : vector<2x64xf32>
    %c136 = arith.constant 136 : index
    %825 = memref.load %arg1[%c136] : memref<200xf32, #tpu.memory_space<smem>>
    %826 = vector.broadcast %825 : f32 to vector<2x64xf32>
    %827 = arith.mulf %826, %125 : vector<2x64xf32>
    %828 = arith.addf %824, %827 : vector<2x64xf32>
    %c137 = arith.constant 137 : index
    %829 = memref.load %arg1[%c137] : memref<200xf32, #tpu.memory_space<smem>>
    %830 = vector.broadcast %829 : f32 to vector<2x64xf32>
    %831 = arith.mulf %830, %134 : vector<2x64xf32>
    %832 = arith.addf %828, %831 : vector<2x64xf32>
    %c138 = arith.constant 138 : index
    %833 = memref.load %arg1[%c138] : memref<200xf32, #tpu.memory_space<smem>>
    %834 = vector.broadcast %833 : f32 to vector<2x64xf32>
    %835 = arith.mulf %834, %143 : vector<2x64xf32>
    %836 = arith.addf %832, %835 : vector<2x64xf32>
    %c139 = arith.constant 139 : index
    %837 = memref.load %arg1[%c139] : memref<200xf32, #tpu.memory_space<smem>>
    %838 = vector.broadcast %837 : f32 to vector<2x64xf32>
    %839 = arith.mulf %838, %152 : vector<2x64xf32>
    %840 = arith.addf %836, %839 : vector<2x64xf32>
    %c140 = arith.constant 140 : index
    %841 = memref.load %arg1[%c140] : memref<200xf32, #tpu.memory_space<smem>>
    %842 = vector.broadcast %841 : f32 to vector<2x64xf32>
    %843 = arith.mulf %842, %161 : vector<2x64xf32>
    %844 = arith.addf %840, %843 : vector<2x64xf32>
    %c141 = arith.constant 141 : index
    %845 = memref.load %arg1[%c141] : memref<200xf32, #tpu.memory_space<smem>>
    %846 = vector.broadcast %845 : f32 to vector<2x64xf32>
    %847 = arith.mulf %846, %170 : vector<2x64xf32>
    %848 = arith.addf %844, %847 : vector<2x64xf32>
    %c142 = arith.constant 142 : index
    %849 = memref.load %arg1[%c142] : memref<200xf32, #tpu.memory_space<smem>>
    %850 = vector.broadcast %849 : f32 to vector<2x64xf32>
    %851 = arith.mulf %850, %179 : vector<2x64xf32>
    %852 = arith.addf %848, %851 : vector<2x64xf32>
    %c143 = arith.constant 143 : index
    %853 = memref.load %arg1[%c143] : memref<200xf32, #tpu.memory_space<smem>>
    %854 = vector.broadcast %853 : f32 to vector<2x64xf32>
    %855 = arith.mulf %854, %188 : vector<2x64xf32>
    %856 = arith.addf %852, %855 : vector<2x64xf32>
    %c144 = arith.constant 144 : index
    %857 = memref.load %arg1[%c144] : memref<200xf32, #tpu.memory_space<smem>>
    %858 = vector.broadcast %857 : f32 to vector<2x64xf32>
    %859 = arith.mulf %858, %197 : vector<2x64xf32>
    %860 = arith.addf %856, %859 : vector<2x64xf32>
    %c145 = arith.constant 145 : index
    %861 = memref.load %arg1[%c145] : memref<200xf32, #tpu.memory_space<smem>>
    %862 = vector.broadcast %861 : f32 to vector<2x64xf32>
    %863 = arith.mulf %862, %206 : vector<2x64xf32>
    %864 = arith.addf %860, %863 : vector<2x64xf32>
    %c146 = arith.constant 146 : index
    %865 = memref.load %arg1[%c146] : memref<200xf32, #tpu.memory_space<smem>>
    %866 = vector.broadcast %865 : f32 to vector<2x64xf32>
    %867 = arith.mulf %866, %215 : vector<2x64xf32>
    %868 = arith.addf %864, %867 : vector<2x64xf32>
    %c147 = arith.constant 147 : index
    %869 = memref.load %arg1[%c147] : memref<200xf32, #tpu.memory_space<smem>>
    %870 = vector.broadcast %869 : f32 to vector<2x64xf32>
    %871 = arith.mulf %870, %224 : vector<2x64xf32>
    %872 = arith.addf %868, %871 : vector<2x64xf32>
    %c148 = arith.constant 148 : index
    %873 = memref.load %arg1[%c148] : memref<200xf32, #tpu.memory_space<smem>>
    %874 = vector.broadcast %873 : f32 to vector<2x64xf32>
    %875 = arith.mulf %874, %233 : vector<2x64xf32>
    %876 = arith.addf %872, %875 : vector<2x64xf32>
    %c149 = arith.constant 149 : index
    %877 = memref.load %arg1[%c149] : memref<200xf32, #tpu.memory_space<smem>>
    %878 = vector.broadcast %877 : f32 to vector<2x64xf32>
    %879 = arith.mulf %878, %242 : vector<2x64xf32>
    %880 = arith.addf %876, %879 : vector<2x64xf32>
    %cst_51 = arith.constant 0.000000e+00 : f32
    %881 = vector.broadcast %cst_51 : f32 to vector<2x64xf32>
    %882 = arith.maximumf %880, %881 : vector<2x64xf32>
    %c320 = arith.constant 320 : index
    %c0_52 = arith.constant 0 : index
    %883 = vector.load %arg4[%c320, %c0_52] : memref<512x64xf32, #tpu.memory_space<vmem>>, vector<64x64xf32>
    %cst_53 = arith.constant dense<0.000000e+00> : vector<2x64xf32>
    %884 = tpu.matmul %882, %883, %cst_53 {dimension_numbers = #tpu.dot_dimension_numbers<[1], [0], [0], [1], [0, 0, 1, 1], [], []>} : vector<2x64xf32>, vector<64x64xf32>, vector<2x64xf32> -> vector<2x64xf32>
    %885 = arith.addf %778, %884 : vector<2x64xf32>
    %c6_54 = arith.constant 6 : index
    %886 = memref.load %arg2[%c6_54] : memref<8xf32, #tpu.memory_space<smem>>
    %c150 = arith.constant 150 : index
    %887 = memref.load %arg1[%c150] : memref<200xf32, #tpu.memory_space<smem>>
    %888 = vector.broadcast %887 : f32 to vector<2x64xf32>
    %889 = arith.mulf %888, %26 : vector<2x64xf32>
    %890 = vector.broadcast %886 : f32 to vector<2x64xf32>
    %891 = arith.addf %890, %889 : vector<2x64xf32>
    %c151 = arith.constant 151 : index
    %892 = memref.load %arg1[%c151] : memref<200xf32, #tpu.memory_space<smem>>
    %893 = vector.broadcast %892 : f32 to vector<2x64xf32>
    %894 = arith.mulf %893, %35 : vector<2x64xf32>
    %895 = arith.addf %891, %894 : vector<2x64xf32>
    %c152 = arith.constant 152 : index
    %896 = memref.load %arg1[%c152] : memref<200xf32, #tpu.memory_space<smem>>
    %897 = vector.broadcast %896 : f32 to vector<2x64xf32>
    %898 = arith.mulf %897, %44 : vector<2x64xf32>
    %899 = arith.addf %895, %898 : vector<2x64xf32>
    %c153 = arith.constant 153 : index
    %900 = memref.load %arg1[%c153] : memref<200xf32, #tpu.memory_space<smem>>
    %901 = vector.broadcast %900 : f32 to vector<2x64xf32>
    %902 = arith.mulf %901, %53 : vector<2x64xf32>
    %903 = arith.addf %899, %902 : vector<2x64xf32>
    %c154 = arith.constant 154 : index
    %904 = memref.load %arg1[%c154] : memref<200xf32, #tpu.memory_space<smem>>
    %905 = vector.broadcast %904 : f32 to vector<2x64xf32>
    %906 = arith.mulf %905, %62 : vector<2x64xf32>
    %907 = arith.addf %903, %906 : vector<2x64xf32>
    %c155 = arith.constant 155 : index
    %908 = memref.load %arg1[%c155] : memref<200xf32, #tpu.memory_space<smem>>
    %909 = vector.broadcast %908 : f32 to vector<2x64xf32>
    %910 = arith.mulf %909, %71 : vector<2x64xf32>
    %911 = arith.addf %907, %910 : vector<2x64xf32>
    %c156 = arith.constant 156 : index
    %912 = memref.load %arg1[%c156] : memref<200xf32, #tpu.memory_space<smem>>
    %913 = vector.broadcast %912 : f32 to vector<2x64xf32>
    %914 = arith.mulf %913, %80 : vector<2x64xf32>
    %915 = arith.addf %911, %914 : vector<2x64xf32>
    %c157 = arith.constant 157 : index
    %916 = memref.load %arg1[%c157] : memref<200xf32, #tpu.memory_space<smem>>
    %917 = vector.broadcast %916 : f32 to vector<2x64xf32>
    %918 = arith.mulf %917, %89 : vector<2x64xf32>
    %919 = arith.addf %915, %918 : vector<2x64xf32>
    %c158 = arith.constant 158 : index
    %920 = memref.load %arg1[%c158] : memref<200xf32, #tpu.memory_space<smem>>
    %921 = vector.broadcast %920 : f32 to vector<2x64xf32>
    %922 = arith.mulf %921, %98 : vector<2x64xf32>
    %923 = arith.addf %919, %922 : vector<2x64xf32>
    %c159 = arith.constant 159 : index
    %924 = memref.load %arg1[%c159] : memref<200xf32, #tpu.memory_space<smem>>
    %925 = vector.broadcast %924 : f32 to vector<2x64xf32>
    %926 = arith.mulf %925, %107 : vector<2x64xf32>
    %927 = arith.addf %923, %926 : vector<2x64xf32>
    %c160 = arith.constant 160 : index
    %928 = memref.load %arg1[%c160] : memref<200xf32, #tpu.memory_space<smem>>
    %929 = vector.broadcast %928 : f32 to vector<2x64xf32>
    %930 = arith.mulf %929, %116 : vector<2x64xf32>
    %931 = arith.addf %927, %930 : vector<2x64xf32>
    %c161 = arith.constant 161 : index
    %932 = memref.load %arg1[%c161] : memref<200xf32, #tpu.memory_space<smem>>
    %933 = vector.broadcast %932 : f32 to vector<2x64xf32>
    %934 = arith.mulf %933, %125 : vector<2x64xf32>
    %935 = arith.addf %931, %934 : vector<2x64xf32>
    %c162 = arith.constant 162 : index
    %936 = memref.load %arg1[%c162] : memref<200xf32, #tpu.memory_space<smem>>
    %937 = vector.broadcast %936 : f32 to vector<2x64xf32>
    %938 = arith.mulf %937, %134 : vector<2x64xf32>
    %939 = arith.addf %935, %938 : vector<2x64xf32>
    %c163 = arith.constant 163 : index
    %940 = memref.load %arg1[%c163] : memref<200xf32, #tpu.memory_space<smem>>
    %941 = vector.broadcast %940 : f32 to vector<2x64xf32>
    %942 = arith.mulf %941, %143 : vector<2x64xf32>
    %943 = arith.addf %939, %942 : vector<2x64xf32>
    %c164 = arith.constant 164 : index
    %944 = memref.load %arg1[%c164] : memref<200xf32, #tpu.memory_space<smem>>
    %945 = vector.broadcast %944 : f32 to vector<2x64xf32>
    %946 = arith.mulf %945, %152 : vector<2x64xf32>
    %947 = arith.addf %943, %946 : vector<2x64xf32>
    %c165 = arith.constant 165 : index
    %948 = memref.load %arg1[%c165] : memref<200xf32, #tpu.memory_space<smem>>
    %949 = vector.broadcast %948 : f32 to vector<2x64xf32>
    %950 = arith.mulf %949, %161 : vector<2x64xf32>
    %951 = arith.addf %947, %950 : vector<2x64xf32>
    %c166 = arith.constant 166 : index
    %952 = memref.load %arg1[%c166] : memref<200xf32, #tpu.memory_space<smem>>
    %953 = vector.broadcast %952 : f32 to vector<2x64xf32>
    %954 = arith.mulf %953, %170 : vector<2x64xf32>
    %955 = arith.addf %951, %954 : vector<2x64xf32>
    %c167 = arith.constant 167 : index
    %956 = memref.load %arg1[%c167] : memref<200xf32, #tpu.memory_space<smem>>
    %957 = vector.broadcast %956 : f32 to vector<2x64xf32>
    %958 = arith.mulf %957, %179 : vector<2x64xf32>
    %959 = arith.addf %955, %958 : vector<2x64xf32>
    %c168 = arith.constant 168 : index
    %960 = memref.load %arg1[%c168] : memref<200xf32, #tpu.memory_space<smem>>
    %961 = vector.broadcast %960 : f32 to vector<2x64xf32>
    %962 = arith.mulf %961, %188 : vector<2x64xf32>
    %963 = arith.addf %959, %962 : vector<2x64xf32>
    %c169 = arith.constant 169 : index
    %964 = memref.load %arg1[%c169] : memref<200xf32, #tpu.memory_space<smem>>
    %965 = vector.broadcast %964 : f32 to vector<2x64xf32>
    %966 = arith.mulf %965, %197 : vector<2x64xf32>
    %967 = arith.addf %963, %966 : vector<2x64xf32>
    %c170 = arith.constant 170 : index
    %968 = memref.load %arg1[%c170] : memref<200xf32, #tpu.memory_space<smem>>
    %969 = vector.broadcast %968 : f32 to vector<2x64xf32>
    %970 = arith.mulf %969, %206 : vector<2x64xf32>
    %971 = arith.addf %967, %970 : vector<2x64xf32>
    %c171 = arith.constant 171 : index
    %972 = memref.load %arg1[%c171] : memref<200xf32, #tpu.memory_space<smem>>
    %973 = vector.broadcast %972 : f32 to vector<2x64xf32>
    %974 = arith.mulf %973, %215 : vector<2x64xf32>
    %975 = arith.addf %971, %974 : vector<2x64xf32>
    %c172 = arith.constant 172 : index
    %976 = memref.load %arg1[%c172] : memref<200xf32, #tpu.memory_space<smem>>
    %977 = vector.broadcast %976 : f32 to vector<2x64xf32>
    %978 = arith.mulf %977, %224 : vector<2x64xf32>
    %979 = arith.addf %975, %978 : vector<2x64xf32>
    %c173 = arith.constant 173 : index
    %980 = memref.load %arg1[%c173] : memref<200xf32, #tpu.memory_space<smem>>
    %981 = vector.broadcast %980 : f32 to vector<2x64xf32>
    %982 = arith.mulf %981, %233 : vector<2x64xf32>
    %983 = arith.addf %979, %982 : vector<2x64xf32>
    %c174 = arith.constant 174 : index
    %984 = memref.load %arg1[%c174] : memref<200xf32, #tpu.memory_space<smem>>
    %985 = vector.broadcast %984 : f32 to vector<2x64xf32>
    %986 = arith.mulf %985, %242 : vector<2x64xf32>
    %987 = arith.addf %983, %986 : vector<2x64xf32>
    %cst_55 = arith.constant 0.000000e+00 : f32
    %988 = vector.broadcast %cst_55 : f32 to vector<2x64xf32>
    %989 = arith.maximumf %987, %988 : vector<2x64xf32>
    %c384 = arith.constant 384 : index
    %c0_56 = arith.constant 0 : index
    %990 = vector.load %arg4[%c384, %c0_56] : memref<512x64xf32, #tpu.memory_space<vmem>>, vector<64x64xf32>
    %cst_57 = arith.constant dense<0.000000e+00> : vector<2x64xf32>
    %991 = tpu.matmul %989, %990, %cst_57 {dimension_numbers = #tpu.dot_dimension_numbers<[1], [0], [0], [1], [0, 0, 1, 1], [], []>} : vector<2x64xf32>, vector<64x64xf32>, vector<2x64xf32> -> vector<2x64xf32>
    %992 = arith.addf %885, %991 : vector<2x64xf32>
    %c7_58 = arith.constant 7 : index
    %993 = memref.load %arg2[%c7_58] : memref<8xf32, #tpu.memory_space<smem>>
    %c175 = arith.constant 175 : index
    %994 = memref.load %arg1[%c175] : memref<200xf32, #tpu.memory_space<smem>>
    %995 = vector.broadcast %994 : f32 to vector<2x64xf32>
    %996 = arith.mulf %995, %26 : vector<2x64xf32>
    %997 = vector.broadcast %993 : f32 to vector<2x64xf32>
    %998 = arith.addf %997, %996 : vector<2x64xf32>
    %c176 = arith.constant 176 : index
    %999 = memref.load %arg1[%c176] : memref<200xf32, #tpu.memory_space<smem>>
    %1000 = vector.broadcast %999 : f32 to vector<2x64xf32>
    %1001 = arith.mulf %1000, %35 : vector<2x64xf32>
    %1002 = arith.addf %998, %1001 : vector<2x64xf32>
    %c177 = arith.constant 177 : index
    %1003 = memref.load %arg1[%c177] : memref<200xf32, #tpu.memory_space<smem>>
    %1004 = vector.broadcast %1003 : f32 to vector<2x64xf32>
    %1005 = arith.mulf %1004, %44 : vector<2x64xf32>
    %1006 = arith.addf %1002, %1005 : vector<2x64xf32>
    %c178 = arith.constant 178 : index
    %1007 = memref.load %arg1[%c178] : memref<200xf32, #tpu.memory_space<smem>>
    %1008 = vector.broadcast %1007 : f32 to vector<2x64xf32>
    %1009 = arith.mulf %1008, %53 : vector<2x64xf32>
    %1010 = arith.addf %1006, %1009 : vector<2x64xf32>
    %c179 = arith.constant 179 : index
    %1011 = memref.load %arg1[%c179] : memref<200xf32, #tpu.memory_space<smem>>
    %1012 = vector.broadcast %1011 : f32 to vector<2x64xf32>
    %1013 = arith.mulf %1012, %62 : vector<2x64xf32>
    %1014 = arith.addf %1010, %1013 : vector<2x64xf32>
    %c180 = arith.constant 180 : index
    %1015 = memref.load %arg1[%c180] : memref<200xf32, #tpu.memory_space<smem>>
    %1016 = vector.broadcast %1015 : f32 to vector<2x64xf32>
    %1017 = arith.mulf %1016, %71 : vector<2x64xf32>
    %1018 = arith.addf %1014, %1017 : vector<2x64xf32>
    %c181 = arith.constant 181 : index
    %1019 = memref.load %arg1[%c181] : memref<200xf32, #tpu.memory_space<smem>>
    %1020 = vector.broadcast %1019 : f32 to vector<2x64xf32>
    %1021 = arith.mulf %1020, %80 : vector<2x64xf32>
    %1022 = arith.addf %1018, %1021 : vector<2x64xf32>
    %c182 = arith.constant 182 : index
    %1023 = memref.load %arg1[%c182] : memref<200xf32, #tpu.memory_space<smem>>
    %1024 = vector.broadcast %1023 : f32 to vector<2x64xf32>
    %1025 = arith.mulf %1024, %89 : vector<2x64xf32>
    %1026 = arith.addf %1022, %1025 : vector<2x64xf32>
    %c183 = arith.constant 183 : index
    %1027 = memref.load %arg1[%c183] : memref<200xf32, #tpu.memory_space<smem>>
    %1028 = vector.broadcast %1027 : f32 to vector<2x64xf32>
    %1029 = arith.mulf %1028, %98 : vector<2x64xf32>
    %1030 = arith.addf %1026, %1029 : vector<2x64xf32>
    %c184 = arith.constant 184 : index
    %1031 = memref.load %arg1[%c184] : memref<200xf32, #tpu.memory_space<smem>>
    %1032 = vector.broadcast %1031 : f32 to vector<2x64xf32>
    %1033 = arith.mulf %1032, %107 : vector<2x64xf32>
    %1034 = arith.addf %1030, %1033 : vector<2x64xf32>
    %c185 = arith.constant 185 : index
    %1035 = memref.load %arg1[%c185] : memref<200xf32, #tpu.memory_space<smem>>
    %1036 = vector.broadcast %1035 : f32 to vector<2x64xf32>
    %1037 = arith.mulf %1036, %116 : vector<2x64xf32>
    %1038 = arith.addf %1034, %1037 : vector<2x64xf32>
    %c186 = arith.constant 186 : index
    %1039 = memref.load %arg1[%c186] : memref<200xf32, #tpu.memory_space<smem>>
    %1040 = vector.broadcast %1039 : f32 to vector<2x64xf32>
    %1041 = arith.mulf %1040, %125 : vector<2x64xf32>
    %1042 = arith.addf %1038, %1041 : vector<2x64xf32>
    %c187 = arith.constant 187 : index
    %1043 = memref.load %arg1[%c187] : memref<200xf32, #tpu.memory_space<smem>>
    %1044 = vector.broadcast %1043 : f32 to vector<2x64xf32>
    %1045 = arith.mulf %1044, %134 : vector<2x64xf32>
    %1046 = arith.addf %1042, %1045 : vector<2x64xf32>
    %c188 = arith.constant 188 : index
    %1047 = memref.load %arg1[%c188] : memref<200xf32, #tpu.memory_space<smem>>
    %1048 = vector.broadcast %1047 : f32 to vector<2x64xf32>
    %1049 = arith.mulf %1048, %143 : vector<2x64xf32>
    %1050 = arith.addf %1046, %1049 : vector<2x64xf32>
    %c189 = arith.constant 189 : index
    %1051 = memref.load %arg1[%c189] : memref<200xf32, #tpu.memory_space<smem>>
    %1052 = vector.broadcast %1051 : f32 to vector<2x64xf32>
    %1053 = arith.mulf %1052, %152 : vector<2x64xf32>
    %1054 = arith.addf %1050, %1053 : vector<2x64xf32>
    %c190 = arith.constant 190 : index
    %1055 = memref.load %arg1[%c190] : memref<200xf32, #tpu.memory_space<smem>>
    %1056 = vector.broadcast %1055 : f32 to vector<2x64xf32>
    %1057 = arith.mulf %1056, %161 : vector<2x64xf32>
    %1058 = arith.addf %1054, %1057 : vector<2x64xf32>
    %c191 = arith.constant 191 : index
    %1059 = memref.load %arg1[%c191] : memref<200xf32, #tpu.memory_space<smem>>
    %1060 = vector.broadcast %1059 : f32 to vector<2x64xf32>
    %1061 = arith.mulf %1060, %170 : vector<2x64xf32>
    %1062 = arith.addf %1058, %1061 : vector<2x64xf32>
    %c192_59 = arith.constant 192 : index
    %1063 = memref.load %arg1[%c192_59] : memref<200xf32, #tpu.memory_space<smem>>
    %1064 = vector.broadcast %1063 : f32 to vector<2x64xf32>
    %1065 = arith.mulf %1064, %179 : vector<2x64xf32>
    %1066 = arith.addf %1062, %1065 : vector<2x64xf32>
    %c193 = arith.constant 193 : index
    %1067 = memref.load %arg1[%c193] : memref<200xf32, #tpu.memory_space<smem>>
    %1068 = vector.broadcast %1067 : f32 to vector<2x64xf32>
    %1069 = arith.mulf %1068, %188 : vector<2x64xf32>
    %1070 = arith.addf %1066, %1069 : vector<2x64xf32>
    %c194 = arith.constant 194 : index
    %1071 = memref.load %arg1[%c194] : memref<200xf32, #tpu.memory_space<smem>>
    %1072 = vector.broadcast %1071 : f32 to vector<2x64xf32>
    %1073 = arith.mulf %1072, %197 : vector<2x64xf32>
    %1074 = arith.addf %1070, %1073 : vector<2x64xf32>
    %c195 = arith.constant 195 : index
    %1075 = memref.load %arg1[%c195] : memref<200xf32, #tpu.memory_space<smem>>
    %1076 = vector.broadcast %1075 : f32 to vector<2x64xf32>
    %1077 = arith.mulf %1076, %206 : vector<2x64xf32>
    %1078 = arith.addf %1074, %1077 : vector<2x64xf32>
    %c196 = arith.constant 196 : index
    %1079 = memref.load %arg1[%c196] : memref<200xf32, #tpu.memory_space<smem>>
    %1080 = vector.broadcast %1079 : f32 to vector<2x64xf32>
    %1081 = arith.mulf %1080, %215 : vector<2x64xf32>
    %1082 = arith.addf %1078, %1081 : vector<2x64xf32>
    %c197 = arith.constant 197 : index
    %1083 = memref.load %arg1[%c197] : memref<200xf32, #tpu.memory_space<smem>>
    %1084 = vector.broadcast %1083 : f32 to vector<2x64xf32>
    %1085 = arith.mulf %1084, %224 : vector<2x64xf32>
    %1086 = arith.addf %1082, %1085 : vector<2x64xf32>
    %c198 = arith.constant 198 : index
    %1087 = memref.load %arg1[%c198] : memref<200xf32, #tpu.memory_space<smem>>
    %1088 = vector.broadcast %1087 : f32 to vector<2x64xf32>
    %1089 = arith.mulf %1088, %233 : vector<2x64xf32>
    %1090 = arith.addf %1086, %1089 : vector<2x64xf32>
    %c199 = arith.constant 199 : index
    %1091 = memref.load %arg1[%c199] : memref<200xf32, #tpu.memory_space<smem>>
    %1092 = vector.broadcast %1091 : f32 to vector<2x64xf32>
    %1093 = arith.mulf %1092, %242 : vector<2x64xf32>
    %1094 = arith.addf %1090, %1093 : vector<2x64xf32>
    %cst_60 = arith.constant 0.000000e+00 : f32
    %1095 = vector.broadcast %cst_60 : f32 to vector<2x64xf32>
    %1096 = arith.maximumf %1094, %1095 : vector<2x64xf32>
    %c448 = arith.constant 448 : index
    %c0_61 = arith.constant 0 : index
    %1097 = vector.load %arg4[%c448, %c0_61] : memref<512x64xf32, #tpu.memory_space<vmem>>, vector<64x64xf32>
    %cst_62 = arith.constant dense<0.000000e+00> : vector<2x64xf32>
    %1098 = tpu.matmul %1096, %1097, %cst_62 {dimension_numbers = #tpu.dot_dimension_numbers<[1], [0], [0], [1], [0, 0, 1, 1], [], []>} : vector<2x64xf32>, vector<64x64xf32>, vector<2x64xf32> -> vector<2x64xf32>
    %1099 = arith.addf %992, %1098 : vector<2x64xf32>
    %c0_63 = arith.constant 0 : index
    %c0_64 = arith.constant 0 : index
    %1100 = vector.load %arg5[%c0_63, %c0_64] : memref<1x64xf32, #tpu.memory_space<vmem>>, vector<1x64xf32>
    %1101 = vector.broadcast %1100 : vector<1x64xf32> to vector<2x64xf32>
    %1102 = arith.addf %1099, %1101 : vector<2x64xf32>
    %cst_65 = arith.constant 0.000000e+00 : f32
    %1103 = vector.broadcast %cst_65 : f32 to vector<2x64xf32>
    %1104 = arith.maximumf %1102, %1103 : vector<2x64xf32>
    %c0_66 = arith.constant 0 : index
    %c0_67 = arith.constant 0 : index
    %1105 = vector.load %arg6[%c0_66, %c0_67] : memref<64x10xf32, #tpu.memory_space<vmem>>, vector<64x10xf32>
    %cst_68 = arith.constant dense<0.000000e+00> : vector<2x10xf32>
    %1106 = tpu.matmul %1104, %1105, %cst_68 {dimension_numbers = #tpu.dot_dimension_numbers<[1], [0], [0], [1], [0, 0, 1, 1], [], []>} : vector<2x64xf32>, vector<64x10xf32>, vector<2x10xf32> -> vector<2x10xf32>
    %c0_69 = arith.constant 0 : index
    %c0_70 = arith.constant 0 : index
    %1107 = vector.load %arg7[%c0_69, %c0_70] : memref<1x10xf32, #tpu.memory_space<vmem>>, vector<1x10xf32>
    %1108 = vector.broadcast %1107 : vector<1x10xf32> to vector<2x10xf32>
    %1109 = arith.addf %1106, %1108 : vector<2x10xf32>
    %c0_71 = arith.constant 0 : index
    %c0_72 = arith.constant 0 : index
    %1110 = vector.load %arg8[%c0_71, %c0_72] : memref<2x10xf32, #tpu.memory_space<vmem>>, vector<2x10xf32>
    tpu.vector_store %arg8[%c0_71, %c0_72], %1109 {strides = array<i32>} : memref<2x10xf32, #tpu.memory_space<vmem>>, vector<2x10xf32>,
    return
  }
  func.func @transform_0(%arg0: i32) -> i32 {
    %c0_i32 = arith.constant 0 : i32
    %c0_i32_0 = arith.constant 0 : i32
    return %c0_i32 : i32
  }
  func.func @transform_1(%arg0: i32) -> i32 {
    %c0_i32 = arith.constant 0 : i32
    %c0_i32_0 = arith.constant 0 : i32
    return %c0_i32 : i32
  }
  func.func @transform_2(%arg0: i32) -> (i32, i32, i32) {
    %c0_i32 = arith.constant 0 : i32
    %c0_i32_0 = arith.constant 0 : i32
    %c0_i32_1 = arith.constant 0 : i32
    return %c0_i32, %arg0, %c0_i32_0 : i32, i32, i32
  }
  func.func @transform_3(%arg0: i32) -> (i32, i32) {
    %c0_i32 = arith.constant 0 : i32
    %c0_i32_0 = arith.constant 0 : i32
    %c0_i32_1 = arith.constant 0 : i32
    return %c0_i32, %c0_i32_0 : i32, i32
  }
  func.func @transform_4(%arg0: i32) -> (i32, i32) {
    %c0_i32 = arith.constant 0 : i32
    %c0_i32_0 = arith.constant 0 : i32
    %c0_i32_1 = arith.constant 0 : i32
    return %c0_i32, %c0_i32_0 : i32, i32
  }
  func.func @transform_5(%arg0: i32) -> (i32, i32) {
    %c0_i32 = arith.constant 0 : i32
    %c0_i32_0 = arith.constant 0 : i32
    %c0_i32_1 = arith.constant 0 : i32
    return %c0_i32, %c0_i32_0 : i32, i32
  }
  func.func @transform_6(%arg0: i32) -> (i32, i32) {
    %c0_i32 = arith.constant 0 : i32
    %c0_i32_0 = arith.constant 0 : i32
    %c0_i32_1 = arith.constant 0 : i32
    return %c0_i32, %c0_i32_0 : i32, i32
  }
  func.func @transform_7(%arg0: i32) -> (i32, i32) {
    %c0_i32 = arith.constant 0 : i32
    %c0_i32_0 = arith.constant 0 : i32
    return %arg0, %c0_i32 : i32, i32
  }
}

</mosaic_0001>

<bundles_post_ra>
// kernel: fcn3_forward.1
= control target key start
LH: loop header
LB: loop body
LE: loop exit
PB: predicated region body
PF: predicated region fallthrough
CT: control target
= control target key end

     0   :  { %s5349_s0 = inlined_call_operand.vmem [shape: f32[200], index: 0, kind: input, shape index: {}]   ;;  %s5350_s1 = inlined_call_operand.vmem [shape: f32[8], index: 1, kind: input, shape index: {}]   ;;  %s5351_s2 = inlined_call_operand.vmem [shape: f32[9,2,81], index: 2, kind: input, shape index: {}]   ;;  %s5352_s3 = inlined_call_operand.vmem [shape: f32[512,64], index: 3, kind: input, shape index: {}]   ;;  %s5353_s4 = inlined_call_operand.vmem [shape: f32[1,64], index: 4, kind: input, shape index: {}]   ;;  %s5354_s5 = inlined_call_operand.vmem [shape: f32[64,10], index: 5, kind: input, shape index: {}]   ;;  %s5355_s6 = inlined_call_operand.vmem [shape: f32[1,10], index: 6, kind: input, shape index: {}]   ;;  %s5356_s7 = inlined_call_operand.hbm [shape: f32[2,10], index: 7, kind: output, shape index: {}]  }
   0x1   :  { %5513 = sst [smem:[#allocation96_spill]] %s5351_s2 }
   0x2   :  { %5514 = sst [smem:[#allocation97_spill]] %s5352_s3 }
   0x3   :  { %5515 = sst [smem:[#allocation98_spill]] %s5353_s4 }
   0x4   :  { %5516 = sst [smem:[#allocation99_spill]] %s5354_s5 }
   0x5   :  { %5517 = sst [smem:[#allocation100_spill]] %s5355_s6 }
   0x6   :  { %5518 = sst [smem:[#allocation101_spill]] %s5356_s7 }
   0x7   :  { %12 = vsyncpa [#allocation4], 0 }
   0x8   :  { %13 = vsyncpa [#allocation6], 0 }
   0x9   :  { %14 = vsyncpa [#allocation3], 0  ;;  %s21_s26 = sshll.u32 %s5349_s0, 4  ;;  %s31_s29 = sshll.u32 %s5350_s1, 4  ;;  %s22_s26 = int_to_ptr.vmem [resolvable:$true] %s21_s26  ;;  %s32_s29 = int_to_ptr.vmem [resolvable:$true] %s31_s29 }
   0xa   :  { %s3038_s30 = scalar_lea.vmem %s22_s26, 32  ;;  %p3043_p1 = scmp.lt.s32.totalorder %s22_s26, %s22_s26 }
   0xb   :  { %p3039_p0 = scmp.ne.s32.totalorder %s22_s26, %s3038_s30  ;;  %p3044_p2 = scmp.lt.s32.totalorder %s3038_s30, %s3038_s30 }
   0xd   :  { %p3045_p3 = por %p3044_p2, %p3043_p1 }
   0xf   :  { %p3046_p4 = pnand %p3045_p3, %p3039_p0 }
  0x11   :  { %3049 = shalt.err (!%p3046_p4)
}
  0x12   :  { %s3090_s8 = smov [#allocation2]   ;;  %s3050_s9 = scalar_lea.vmem %s32_s29, 16 }
  0x13   :  { %24 = dma.vmem_to_smem %s22_s26, 32, %s3090_s8, [#allocation4]  }
  0x14   :  { %p3051_p5 = scmp.ne.s32.totalorder %s32_s29, %s3050_s9  ;;  %p3055_p6 = scmp.lt.s32.totalorder %s32_s29, %s32_s29 }
  0x15   :  { %p3056_p7 = scmp.lt.s32.totalorder %s3050_s9, %s3050_s9 }
  0x17   :  { %p3057_p8 = por %p3056_p7, %p3055_p6 }
  0x19   :  { %p3058_p9 = pnand %p3057_p8, %p3051_p5 }
  0x1b   :  { %3061 = shalt.err (!%p3058_p9)
}
  0x1c   :  { %s3091_s0 = smov [#allocation5]  }
  0x1d   :  { %34 = dma.vmem_to_smem %s32_s29, 16, %s3091_s0, [#allocation6]  }
  0x1e   :  { %3084 = dma.done.wait [#allocation4], 32  }
  0x1f   :  { %3085 = vsyncadd [#allocation4], 4294967264 }
  0x20   :  { %3086 = dma.done.wait [#allocation6], 16  }
  0x21   :  { %3087 = vsyncadd [#allocation6], 4294967280 }
  0x22   :  { %51 = sfence }
  0x23   :  { %v3221_v0 = vld [vmem:[%s5351_s2 + $0x6] sm:$0x3]  ;;  %v3226_v1 = vld [vmem:[%s5351_s2 + $0x2] sm:$0x3]  ;;  %s5405_s13 = smov 24   ;;  %s5407_s14 = smov 8  }
  0x24   :  { %78 = vrot.lane.b32.xlu1 %v3221_v0, %s5405_s13  ;;  %70 = vrot.lane.b32.xlu0 %v3226_v1, %s5407_s14  ;;  %v3235_v2 = vld [vmem:[%s5351_s2 + $0x4] sm:$0x3]  ;;  %v3240_v3 = vld [vmem:[%s5351_s2] sm:$0x3]  ;;  %s5406_s19 = smov 16   ;;  %s5404_s20 = smov 119  }
  0x25   :  { %v3249_v4 = vld [vmem:[%s5351_s2 + $0x8] sm:$0x3]  ;;  %s5403_s23 = smov 127   ;;  %s5402_s24 = smov 32   ;;  %v3258_v5 = vld [vmem:[%s5351_s2 + $0xa] sm:$0x3] }
  0x26   :  { %s5401_s27 = smov 7   ;;  %s5400_s28 = smov 40   ;;  %v3271_v6 = vld [vmem:[%s5351_s2 + $0xc] sm:$0x3]  ;;  %v3284_v7 = vld [vmem:[%s5351_s2 + $0xe] sm:$0x3] }
  0x27   :  { %s5399_s29 = smov 15   ;;  %s5398_s30 = smov 110   ;;  %vm97_vm0 = vcmask 64512   ;;  %vm99_vm1 = vcmask 130048   ;;  %vm101_vm2 = vcmask 195584   ;;  %vm103_vm3 = vcmask 261120  }
  0x28   :  { %74 = vrot.lane.b32.xlu0 %v3235_v2, %s5406_s19  ;;  %112 = vrot.lane.b32.xlu1 %v3240_v3, %s5404_s20  ;;  %s5397_s0 = smov 118   ;;  %s5396_s1 = smov 48   ;;  %vm105_vm4 = vcmask 326656   ;;  %vm107_vm5 = vcmask 392192   ;;  %vm109_vm6 = vcmask 457728   ;;  %vm3169_vm7 = vmmov 0  }
  0x29   :  { %s5395_s10 = smov 23   ;;  %s5394_s11 = smov 126   ;;  %vm992_vm8 = vcmask 523264   ;;  %vm2346_vm9 = vcmask 74752  }
  0x2a   :  { %s5393_s16 = smov 56   ;;  %s5374_s17 = smov 31  }
  0x2b   :  { %s5357_s18 = smov 6   ;;  %s5358_s21 = smov 39  }
  0x2c   :  { %115 = vrot.lane.b32.xlu0 %v3226_v1, %s5403_s23  ;;  %82 = vrot.lane.b32.xlu1 %v3249_v4, %s5402_s24  ;;  %s5372_s22 = smov 14   ;;  %s5369_s25 = smov 47  }
  0x2d   :  { %s5361_s26 = smov 22   ;;  %s5366_s8 = smov 30  }
  0x2e   :  { %s5367_s9 = smov 38   ;;  %s5359_s12 = smov 101  }
  0x2f   :  { %s5360_s15 = smov 109   ;;  %s3543_s24 = sld [smem:[#allocation2 + $0x7d]] }
  0x30   :  { %118 = vrot.lane.b32.xlu0 %v3235_v2, %s5401_s27  ;;  %86 = vrot.lane.b32.xlu1 %v3258_v5, %s5400_s28  ;;  %s3535_s28 = sld [smem:[#allocation2 + $0x64]]  ;;  %s3547_s20 = sld [smem:[#allocation2 + $0x96]] }
  0x31   :  { %s5412_s13 = smov 80   ;;  %s3553_s19 = sld [smem:[#allocation2 + $0xaf]] }
  0x32   :  { %s3555_s14 = sld [smem:[#allocation2 + $0x1]]  ;;  %s3579_s7 = sld [smem:[#allocation2 + $0xb0]] }
  0x33   :  { %s3581_s6 = sld [smem:[#allocation2 + $0x2]]  ;;  %s3587_s4 = sld [smem:[#allocation2 + $0x1b]] }
  0x34   :  { %121 = vrot.lane.b32.xlu0 %v3221_v0, %s5399_s29  ;;  %143 = vrot.lane.b32.xlu1 %v3240_v3, %s5398_s30  ;;  %s3531_s30 = sld [smem:[#allocation5 + $0x4]]  ;;  %s3591_s3 = sld [smem:[#allocation2 + $0x4d]] }
  0x35   :  { %5540 = sst [smem:[#allocation32_spill]] %s3543_s24  ;;  %s3589_s5 = sld [smem:[#allocation2 + $0x34]] }
  0x36   :  { %5538 = sst [smem:[#allocation30_spill]] %s3535_s28  ;;  %s5426_s2 = smov 88  }
  0x37   :  { %5542 = sst [smem:[#allocation34_spill]] %s3547_s20  ;;  %s3692_s20 = sld [smem:[#allocation2 + $0x69]] }
  0x38   :  { %146 = vrot.lane.b32.xlu0 %v3226_v1, %s5397_s0  ;;  %90 = vrot.lane.b32.xlu1 %v3271_v6, %s5396_s1  ;;  %s3528_s1 = sld [smem:[#allocation2 + $0x4b]]  ;;  %5544 = sst [smem:[#allocation36_spill]] %s3553_s19 }
  0x39   :  { %5545 = sst [smem:[#allocation37_spill]] %s3555_s14  ;;  %s3698_s19 = sld [smem:[#allocation2 + $0x82]] }
  0x3a   :  { %5537 = sst [smem:[#allocation29_spill]] %s3531_s30  ;;  %s5452_s30 = smov 104  }
  0x3b   :  { %5552 = sst [smem:[#allocation44_spill]] %s3579_s7  ;;  %s5559_s7 = smov 89  }
  0x3c   :  { %124 = vrot.lane.b32.xlu0 %v3249_v4, %s5395_s10  ;;  %149 = vrot.lane.b32.xlu1 %v3235_v2, %s5394_s11  ;;  %5553 = sst [smem:[#allocation45_spill]] %s3581_s6  ;;  %s3728_s28 = sld [smem:[#allocation2 + $0x51]] }
  0x3d   :  { %5554 = sst [smem:[#allocation46_spill]] %s3587_s4  ;;  %s3601_s6 = sld [smem:[#allocation2 + $0x98]] }
  0x3e   :  { %5536 = sst [smem:[#allocation28_spill]] %s3528_s1  ;;  %s3613_s4 = sld [smem:[#allocation2 + $0x35]] }
  0x3f   :  { %5555 = sst [smem:[#allocation47_spill]] %s3589_s5  ;;  %s3607_s5 = sld [smem:[#allocation2 + $0xb1]] }
  0x40   :  { %94 = vrot.lane.b32.xlu0 %v3284_v7, %s5393_s16  ;;  %127 = vrot.lane.b32.xlu1 %v3258_v5, %s5374_s17  ;;  %5556 = sst [smem:[#allocation48_spill]] %s3591_s3  ;;  %s3673_s1 = sld [smem:[#allocation2 + $0x1e]] }
  0x41   :  { %s3609_s3 = sld [smem:[#allocation2 + $0x3]]  ;;  %5590 = sst [smem:[#allocation71_spill]] %s3698_s19 }
  0x42   :  { %s3718_s24 = sld [smem:[#allocation2 + $0x38]]  ;;  %5609 = sst [smem:[#allocation77_spill]] %s3728_s28 }
  0x43   :  { %5560 = sst [smem:[#allocation51_spill]] %s3601_s6  ;;  %s3619_s6 = sld [smem:[#allocation2 + $0x67]] }
  0x44   :  { %152 = vrot.lane.b32.xlu0 %v3221_v0, %s5357_s18  ;;  %174 = vrot.lane.b32.xlu1 %v3240_v3, %s5403_s23  ;;  %s3545_s23 = sld [smem:[#allocation5 + $0x6]]  ;;  %5565 = sst [smem:[#allocation56_spill]] %s3613_s4 }
  0x45   :  { %5562 = sst [smem:[#allocation53_spill]] %s3607_s5  ;;  %s3623_s5 = sld [smem:[#allocation2 + $0x80]] }
  0x46   :  { %s5574_s4 = smov 97   ;;  %5580 = sst [smem:[#allocation68_spill]] %s3673_s1 }
  0x47   :  { %5563 = sst [smem:[#allocation54_spill]] %s3609_s3  ;;  %s3740_s3 = sld [smem:[#allocation2 + $0x9c]] }
  0x48   :  { %177 = vrot.lane.b32.xlu0 %v3226_v1, %s5401_s27  ;;  %130 = vrot.lane.b32.xlu1 %v3271_v6, %s5358_s21  ;;  %s3537_s27 = sld [smem:[#allocation5 + $0x5]]  ;;  %5603 = sst [smem:[#allocation74_spill]] %s3718_s24 }
  0x49   :  { %5567 = sst [smem:[#allocation58_spill]] %s3619_s6  ;;  %s3635_s6 = sld [smem:[#allocation2 + $0x1d]] }
  0x4a   :  { %5541 = sst [smem:[#allocation33_spill]] %s3545_s23  ;;  %s3690_s23 = sld [smem:[#allocation2 + $0x50]] }
  0x4b   :  { %5568 = sst [smem:[#allocation59_spill]] %s3623_s5  ;;  %s3644_s5 = sld [smem:[#allocation2 + $0x68]] }
  0x4c   :  { %155 = vrot.lane.b32.xlu0 %v3249_v4, %s5372_s22  ;;  %180 = vrot.lane.b32.xlu1 %v3235_v2, %s5399_s29  ;;  %s5408_s29 = smov 105   ;;  %s3793_s1 = sld [smem:[#allocation2 + $0x84]] }
  0x4d   :  { %5613 = sst [smem:[#allocation79_spill]] %s3740_s3  ;;  %s5633_s28 = smov 96  }
  0x4e   :  { %5539 = sst [smem:[#allocation31_spill]] %s3537_s27  ;;  %s3680_s27 = sld [smem:[#allocation2 + $0x37]] }
  0x4f   :  { %5573 = sst [smem:[#allocation64_spill]] %s3635_s6  ;;  %s3770_s6 = sld [smem:[#allocation2 + $0x52]] }
  0x50   :  { %133 = vrot.lane.b32.xlu0 %v3284_v7, %s5369_s25  ;;  %158 = vrot.lane.b32.xlu1 %v3258_v5, %s5361_s26  ;;  %5585 = sst [smem:[#allocation70_spill]] %s3690_s23  ;;  %s3832_s3 = sld [smem:[#allocation2 + $0x3a]] }
  0x51   :  { %s3795_s23 = sld [smem:[#allocation2 + $0x9d]]  ;;  %s5642_s19 = sld [smem:[#allocation36_spill]] }
  0x52   :  { %5626 = sst [smem:[#allocation87_spill]] %s3793_s1  ;;  %s3922_s1 = sld [smem:[#allocation2 + $0x54]] }
  0x54   :  { %183 = vrot.lane.b32.xlu0 %v3221_v0, %s5395_s10  ;;  %205 = vrot.lane.b32.xlu1 %v3240_v3, %s5397_s0  ;;  %s3526_s10 = sld [smem:[#allocation5 + $0x3]]  ;;  %s3157_s0 = smov 2  }
  0x55   :  { %5621 = sst [smem:[#allocation85_spill]] %s3770_s6 }
  0x57   :  { %5627 = sst [smem:[#allocation88_spill]] %s3795_s23  ;;  %s3920_s23 = sld [smem:[#allocation2 + $0x3b]] }
  0x58   :  { %208 = vrot.lane.b32.xlu0 %v3226_v1, %s5394_s11  ;;  %161 = vrot.lane.b32.xlu1 %v3271_v6, %s5366_s8  ;;  %s3524_s11 = sld [smem:[#allocation2 + $0x32]] }
  0x5a   :  { %5535 = sst [smem:[#allocation27_spill]] %s3526_s10  ;;  %s3716_s10 = sld [smem:[#allocation2 + $0x1f]] }
  0x5c   :  { %186 = vrot.lane.b32.xlu0 %v3249_v4, %s5374_s17  ;;  %211 = vrot.lane.b32.xlu1 %v3235_v2, %s5357_s18  ;;  %s5362_s18 = smov 117   ;;  %s5382_s17 = smov 107  }
  0x5e   :  { %5534 = sst [smem:[#allocation26_spill]] %s3524_s11  ;;  %s3738_s11 = sld [smem:[#allocation2 + $0x83]] }
  0x5f   :  { %s5635_s24 = sld [smem:[#allocation26_spill]] }
  0x60   :  { %164 = vrot.lane.b32.xlu0 %v3284_v7, %s5367_s9  ;;  %189 = vrot.lane.b32.xlu1 %v3258_v5, %s5358_s21  ;;  %s5363_s21 = smov 55  }
  0x64   :  { %214 = vrot.lane.b32.xlu0 %v3221_v0, %s5372_s22  ;;  %236 = vrot.lane.b32.xlu1 %v3240_v3, %s5359_s12  ;;  %s5364_s12 = smov 125   ;;  %s5376_s22 = smov 29  }
  0x68   :  { %239 = vrot.lane.b32.xlu0 %v3226_v1, %s5360_s15  ;;  %192 = vrot.lane.b32.xlu1 %v3271_v6, %s5369_s25  ;;  %s5365_s15 = smov 92   ;;  %s5375_s25 = smov 21  }
  0x6c   :  { %217 = vrot.lane.b32.xlu0 %v3249_v4, %s5361_s26  ;;  %242 = vrot.lane.b32.xlu1 %v3235_v2, %s5362_s18  ;;  %s5378_s26 = smov 100   ;;  %s5368_s18 = smov 5  }
  0x70   :  { %195 = vrot.lane.b32.xlu0 %v3284_v7, %s5363_s21  ;;  %220 = vrot.lane.b32.xlu1 %v3258_v5, %s5366_s8  ;;  %s5377_s21 = smov 108   ;;  %s5379_s8 = smov 116  }
  0x74   :  { %245 = vrot.lane.b32.xlu0 %v3221_v0, %s5364_s12  ;;  %267 = vrot.lane.b32.xlu1 %v3240_v3, %s5365_s15  ;;  %s5370_s12 = smov 46   ;;  %s5371_s15 = smov 13  }
  0x78   :  { %270 = vrot.lane.b32.xlu0 %v3226_v1, %s5378_s26  ;;  %223 = vrot.lane.b32.xlu1 %v3271_v6, %s5367_s9  ;;  %s5373_s9 = smov 83  }
  0x7c   :  { %248 = vrot.lane.b32.xlu0 %v3249_v4, %s5368_s18  ;;  %273 = vrot.lane.b32.xlu1 %v3235_v2, %s5377_s21  ;;  %s5392_s18 = smov 91  }
  0x80   :  { %226 = vrot.lane.b32.xlu0 %v3284_v7, %s5370_s12  ;;  %251 = vrot.lane.b32.xlu1 %v3258_v5, %s5371_s15  ;;  %s5380_s12 = smov 124   ;;  %s5391_s15 = smov 99  }
  0x84   :  { %276 = vrot.lane.b32.xlu0 %v3221_v0, %s5379_s8  ;;  %298 = vrot.lane.b32.xlu1 %v3240_v3, %s5373_s9  ;;  %s5381_s9 = smov 4  }
  0x88   :  { %301 = vrot.lane.b32.xlu0 %v3226_v1, %s5392_s18  ;;  %254 = vrot.lane.b32.xlu1 %v3271_v6, %s5375_s25  ;;  %s5390_s25 = smov 12  }
  0x8c   :  { %279 = vrot.lane.b32.xlu0 %v3249_v4, %s5380_s12  ;;  %304 = vrot.lane.b32.xlu1 %v3235_v2, %s5391_s15 }
  0x90   :  { %257 = vrot.lane.b32.xlu0 %v3284_v7, %s5376_s22  ;;  %282 = vrot.lane.b32.xlu1 %v3258_v5, %s5381_s9  ;;  %s5383_s22 = smov 115  }
  0x94   :  { %307 = vrot.lane.b32.xlu0 %v3221_v0, %s5382_s17  ;;  %329 = vrot.lane.b32.xlu1 %v3240_v3, %s5378_s26  ;;  %s5384_s26 = smov 123  }
  0x96   :  { %v3374_v8 = vpop.permute.xlu1 %78  ;;  %v3376_v9 = vpop.permute.xlu0 %70 }
  0x98   :  { %332 = vrot.lane.b32.xlu0 %v3226_v1, %s5377_s21  ;;  %285 = vrot.lane.b32.xlu1 %v3271_v6, %s5390_s25  ;;  %s5389_s21 = smov 20  }
  0x9a   :  { %v3382_v10 = vpop.permute.xlu0 %74  ;;  %v3384_v11 = vpop.permute.xlu1 %112 }
  0x9c   :  { %310 = vrot.lane.b32.xlu0 %v3249_v4, %s5383_s22  ;;  %335 = vrot.lane.b32.xlu1 %v3235_v2, %s5379_s8  ;;  %s5387_s8 = smov 3  }
  0x9e   :  { %v3390_v12 = vpop.permute.xlu0 %115  ;;  %v3392_v13 = vpop.permute.xlu1 %82 }
  0x9f   :  { %5519 = vst [vmem:[#allocation11_spill] sm:$0xff] %v3390_v12 }
  0xa0   :  { %288 = vrot.lane.b32.xlu0 %v3284_v7, %s5389_s21  ;;  %313 = vrot.lane.b32.xlu1 %v3258_v5, %s5384_s26 }
  0xa2   :  { %v3398_v14 = vpop.permute.xlu0 %118  ;;  %v3400_v15 = vpop.permute.xlu1 %86 }
  0xa3   :  { %5520 = vst [vmem:[#allocation12_spill] sm:$0xff] %v3398_v14 }
  0xa4   :  { %338 = vrot.lane.b32.xlu0 %v3221_v0, %s5380_s12  ;;  %360 = vrot.lane.b32.xlu1 %v3240_v3, %s5392_s18  ;;  %s5386_s12 = smov 11   ;;  %s5409_s18 = smov 72  }
  0xa6   :  { %v3406_v16 = vpop.permute.xlu0 %121  ;;  %v3408_v17 = vpop.permute.xlu1 %143 }
  0xa7   :  { %5521 = vst [vmem:[#allocation13_spill] sm:$0xff] %v3406_v16 }
  0xa8   :  { %363 = vrot.lane.b32.xlu0 %v3226_v1, %s5391_s15  ;;  %316 = vrot.lane.b32.xlu1 %v3271_v6, %s5387_s8  ;;  %s3512_s15 = sld [smem:[#allocation5 + $0x1]] }
  0xaa   :  { %v3414_v18 = vpop.permute.xlu0 %146  ;;  %v3416_v19 = vpop.permute.xlu1 %90 }
  0xab   :  { %5522 = vst [vmem:[#allocation14_spill] sm:$0xff] %v3414_v18 }
  0xac   :  { %341 = vrot.lane.b32.xlu0 %v3249_v4, %s5381_s9  ;;  %366 = vrot.lane.b32.xlu1 %v3235_v2, %s5382_s17  ;;  %s3141_s9 = smov 74   ;;  %s3142_s17 = smov 82  }
  0xae   :  { %v3422_v20 = vpop.permute.xlu0 %124  ;;  %v3424_v21 = vpop.permute.xlu1 %149  ;;  %5531 = sst [smem:[#allocation23_spill]] %s3512_s15  ;;  %s3671_s15 = sld [smem:[#allocation2 + $0x5]] }
  0xaf   :  { %5523 = vst [vmem:[#allocation15_spill] sm:$0xff] %v3422_v20  ;;  %5524 = vst [vmem:[#allocation16_spill] sm:$0xff] %v3424_v21 }
  0xb0   :  { %319 = vrot.lane.b32.xlu0 %v3284_v7, %s5386_s12  ;;  %344 = vrot.lane.b32.xlu1 %v3258_v5, %s5390_s25  ;;  %s5411_s25 = smov 97  }
  0xb2   :  { %v3430_v22 = vpop.permute.xlu0 %94  ;;  %v3432_v23 = vpop.permute.xlu1 %127 }
  0xb3   :  { %5525 = vst [vmem:[#allocation17_spill] sm:$0xff] %v3432_v23 }
  0xb4   :  { %369 = vrot.lane.b32.xlu0 %v3221_v0, %s5383_s22  ;;  %391 = vrot.lane.b32.xlu1 %v3240_v3, %s3141_s9  ;;  %s3143_s22 = smov 90   ;;  %s5385_s9 = smov 28  }
  0xb5   :  { %5579 = sst [smem:[#allocation67_spill]] %s3671_s15  ;;  %s5625_s15 = smov 8  }
  0xb6   :  { %v3437_v24 = vpop.permute.xlu0 %152  ;;  %v3439_v25 = vpop.permute.xlu1 %174 }
  0xb7   :  { %5526 = vst [vmem:[#allocation18_spill] sm:$0xff] %v3437_v24 }
  0xb8   :  { %394 = vrot.lane.b32.xlu0 %v3226_v1, %s3142_s17  ;;  %347 = vrot.lane.b32.xlu1 %v3271_v6, %s5389_s21  ;;  %s3145_s17 = smov 98   ;;  %s3508_s21 = sld [smem:[#allocation2]] }
  0xba   :  { %v3444_v26 = vpop.permute.xlu0 %177  ;;  %v3446_v27 = vpop.permute.xlu1 %130 }
  0xbb   :  { %5527 = vst [vmem:[#allocation19_spill] sm:$0xff] %v3446_v27 }
  0xbc   :  { %372 = vrot.lane.b32.xlu0 %v3249_v4, %s5384_s26  ;;  %397 = vrot.lane.b32.xlu1 %v3235_v2, %s3143_s22  ;;  %s3146_s26 = smov 65   ;;  %s3147_s22 = smov 73  }
  0xbe   :  { %v3451_v28 = vpop.permute.xlu0 %155  ;;  %v3453_v29 = vpop.permute.xlu1 %180  ;;  %5530 = sst [smem:[#allocation22_spill]] %s3508_s21  ;;  %s3751_s21 = sld [smem:[#allocation2 + $0x7]] }
  0xc0   :  { %350 = vrot.lane.b32.xlu0 %v3284_v7, %s5385_s9  ;;  %375 = vrot.lane.b32.xlu1 %v3258_v5, %s5387_s8  ;;  %s3148_s9 = smov 106   ;;  %s5410_s8 = smov 64  }
  0xc2   :  { %v3459_v30 = vpop.permute.xlu0 %133  ;;  %v3461_v31 = vpop.permute.xlu1 %158 }
  0xc3   :  { %5528 = vst [vmem:[#allocation20_spill] sm:$0xff] %v3459_v30 }
  0xc4   :  { %400 = vrot.lane.b32.xlu0 %v3221_v0, %s3145_s17  ;;  %422 = vrot.lane.b32.xlu1 %v3240_v3, %s3146_s26  ;;  %s3149_s17 = smov 81   ;;  %s5388_s26 = smov 19  }
  0xc5   :  { %5615 = sst [smem:[#allocation81_spill]] %s3751_s21 }
  0xc6   :  { %v3465_v32 = vpop.permute.xlu0 %183  ;;  %v3467_v33 = vpop.permute.xlu1 %205  ;;  %s3876_s21 = sld [smem:[#allocation2 + $0x9e]] }
  0xc8   :  { %425 = vrot.lane.b32.xlu0 %v3226_v1, %s3147_s22  ;;  %378 = vrot.lane.b32.xlu1 %v3271_v6, %s5386_s12  ;;  %s3151_s12 = smov 114  }
  0xca   :  { %v3473_v34 = vpop.permute.xlu0 %208  ;;  %v3475_v35 = vpop.permute.xlu1 %161 }
  0xcc   :  { %403 = vrot.lane.b32.xlu0 %v3249_v4, %s3148_s9  ;;  %428 = vrot.lane.b32.xlu1 %v3235_v2, %s3149_s17  ;;  %s5413_s9 = smov 89  }
  0xce   :  { %v3480_v36 = vpop.permute.xlu0 %186  ;;  %v3482_v37 = vpop.permute.xlu1 %211 }
  0xd0   :  { %381 = vrot.lane.b32.xlu0 %v3284_v7, %s5388_s26  ;;  %406 = vrot.lane.b32.xlu1 %v3258_v5, %s3151_s12  ;;  %s3154_s12 = smov 122   ;;  %s3506_s26 = sld [smem:[#allocation5]] }
  0xd2   :  { %v3487_v38 = vpop.permute.xlu0 %164  ;;  %v3489_v39 = vpop.permute.xlu1 %189 }
  0xd4   :  { %431 = vrot.lane.b32.xlu0 %v3221_v0, %s5413_s9  ;;  %453 = vrot.lane.b32.xlu1 %v3240_v3, %s5393_s16  ;;  %s3516_s16 = sld [smem:[#allocation2 + $0x19]]  ;;  %s3575_s9 = sld [smem:[#allocation2 + $0x97]] }
  0xd6   :  { %v3495_v40 = vpop.permute.xlu0 %214  ;;  %v3497_v41 = vpop.permute.xlu1 %236  ;;  %5529 = sst [smem:[#allocation21_spill]] %s3506_s26  ;;  %s3664_s26 = sld [smem:[#allocation2 + $0xb3]] }
  0xd8   :  { %456 = vrot.lane.b32.xlu0 %v3226_v1, %s5410_s8  ;;  %409 = vrot.lane.b32.xlu1 %v3271_v6, %s3154_s12  ;;  %s3522_s12 = sld [smem:[#allocation5 + $0x2]]  ;;  %s3567_s8 = sld [smem:[#allocation2 + $0x4c]] }
  0xda   :  { %v3502_v42 = vpop.permute.xlu0 %239  ;;  %v3504_v43 = vpop.permute.xlu1 %192  ;;  %5532 = sst [smem:[#allocation24_spill]] %s3516_s16  ;;  %s5595_s16 = smov 105  }
  0xdb   :  { %5551 = sst [smem:[#allocation43_spill]] %s3575_s9 }
  0xdc   :  { %434 = vrot.lane.b32.xlu0 %v3249_v4, %s5411_s25  ;;  %459 = vrot.lane.b32.xlu1 %v3235_v2, %s5409_s18  ;;  %s3565_s18 = sld [smem:[#allocation2 + $0x33]]  ;;  %s3569_s25 = sld [smem:[#allocation2 + $0x65]] }
  0xde   :  { %v3518_v44 = vpop.permute.xlu0 %217  ;;  %v3520_v45 = vpop.permute.xlu1 %242  ;;  %5533 = sst [smem:[#allocation25_spill]] %s3522_s12  ;;  %s5578_s12 = smov 72  }
  0xdf   :  { %5548 = sst [smem:[#allocation40_spill]] %s3567_s8  ;;  %s3707_s8 = sld [smem:[#allocation2 + $0xb4]] }
  0xe0   :  { %412 = vrot.lane.b32.xlu0 %v3284_v7, %s3157_s0  ;;  %437 = vrot.lane.b32.xlu1 %v3258_v5, %s5408_s29  ;;  %s3549_s0 = sld [smem:[#allocation5 + $0x7]]  ;;  %s3559_s29 = sld [smem:[#allocation2 + $0x1a]] }
  0xe2   :  { %v3539_v46 = vpop.permute.xlu0 %195  ;;  %v3541_v47 = vpop.permute.xlu1 %220  ;;  %5547 = sst [smem:[#allocation39_spill]] %s3565_s18  ;;  %s5470_s18 = smov 112  }
  0xe3   :  { %5549 = sst [smem:[#allocation41_spill]] %s3569_s25  ;;  %s3709_s25 = sld [smem:[#allocation2 + $0x6]] }
  0xe4   :  { %462 = vrot.lane.b32.xlu0 %v3221_v0, %s5412_s13  ;;  %484 = vrot.lane.b32.xlu1 %v3240_v3, %s3147_s22  ;;  %s3571_s13 = sld [smem:[#allocation2 + $0x7e]]  ;;  %s5419_s22 = smov 113  }
  0xe5   :  { %5596 = sst [smem:[#allocation72_spill]] %s3707_s8  ;;  %s3758_s8 = sld [smem:[#allocation2 + $0x20]] }
  0xe6   :  { %5543 = sst [smem:[#allocation35_spill]] %s3549_s0  ;;  %v3561_v48 = vpop.permute.xlu0 %245  ;;  %v3563_v49 = vpop.permute.xlu1 %267  ;;  %s5586_s0 = sld [smem:[#allocation47_spill]] }
  0xe7   :  { %5546 = sst [smem:[#allocation38_spill]] %s3559_s29  ;;  %s3700_s29 = sld [smem:[#allocation2 + $0x9b]] }
  0xe8   :  { %487 = vrot.lane.b32.xlu0 %v3226_v1, %s3149_s17  ;;  %440 = vrot.lane.b32.xlu1 %v3271_v6, %s5419_s22  ;;  %s3593_s17 = sld [smem:[#allocation2 + $0x66]]  ;;  %s3597_s22 = sld [smem:[#allocation2 + $0x7f]] }
  0xe9   :  { %5587 = sst [smem:[#allocation47_spill]] %s3692_s20  ;;  %s5659_s6 = sld [smem:[#allocation35_spill]] }
  0xea   :  { %5550 = sst [smem:[#allocation42_spill]] %s3571_s13  ;;  %v3583_v50 = vpop.permute.xlu0 %270  ;;  %v3585_v51 = vpop.permute.xlu1 %223  ;;  %s5680_s20 = sld [smem:[#allocation44_spill]] }
  0xeb   :  { %5597 = sst [smem:[#allocation73_spill]] %s3709_s25  ;;  %s3749_s13 = sld [smem:[#allocation2 + $0xb5]] }
  0xec   :  { %465 = vrot.lane.b32.xlu0 %v3249_v4, %s5426_s2  ;;  %490 = vrot.lane.b32.xlu1 %v3235_v2, %s5559_s7  ;;  %s5431_s2 = smov 121   ;;  %s3617_s7 = sld [smem:[#allocation2 + $0x4e]] }
  0xed   :  { %5617 = sst [smem:[#allocation82_spill]] %s3758_s8  ;;  %s3856_s8 = sld [smem:[#allocation2 + $0x85]] }
  0xee   :  { %5557 = sst [smem:[#allocation49_spill]] %s3593_s17  ;;  %v3603_v52 = vpop.permute.xlu0 %248  ;;  %v3605_v53 = vpop.permute.xlu1 %273  ;;  %s5636_s25 = sld [smem:[#allocation28_spill]] }
  0xef   :  { %5558 = sst [smem:[#allocation50_spill]] %s3597_s22  ;;  %5561 = vst [vmem:[#allocation52_spill] sm:$0xff] %v3605_v53  ;;  %s3611_s17 = sld [smem:[#allocation2 + $0x1c]] }
  0xf0   :  { %443 = vrot.lane.b32.xlu0 %v3284_v7, %s5431_s2  ;;  %s5434_s22 = smov 96   ;;  %s3631_s2 = sld [smem:[#allocation2 + $0xb2]] }
  0xf1   :  { %468 = vrot.lane.b32.xlu1 %v3258_v5, %s5434_s22  ;;  %s3637_s22 = sld [smem:[#allocation2 + $0x36]]  ;;  %s5591_s14 = sld [smem:[#allocation50_spill]] }
  0xf2   :  { %5566 = sst [smem:[#allocation57_spill]] %s3617_s7  ;;  %v3627_v54 = vpop.permute.xlu0 %226  ;;  %v3629_v55 = vpop.permute.xlu1 %251  ;;  %s3633_s7 = sld [smem:[#allocation2 + $0x4]] }
  0xf3   :  { %5570 = vst [vmem:[#allocation61_spill] sm:$0xff] %v3629_v55  ;;  %5592 = sst [smem:[#allocation50_spill]] %s3700_s29  ;;  %s5601_s29 = smov 80   ;;  %v98_v55 = vsel %vm97_vm0, %v3240_v3, %v3376_v9 }
  0xf4   :  { %493 = vrot.lane.b32.xlu0 %v3221_v0, %s5574_s4  ;;  %s3652_s4 = sld [smem:[#allocation2 + $0x81]]  ;;  %v100_v56 = vsel %vm99_vm1, %v98_v55, %v3382_v10  ;;  %5614 = sst [smem:[#allocation80_spill]] %s3749_s13 }
  0xf5   :  { %5564 = sst [smem:[#allocation55_spill]] %s3611_s17  ;;  %v102_v9 = vsel %vm101_vm2, %v100_v56, %v3374_v8  ;;  %s5640_s13 = sld [smem:[#allocation34_spill]] }
  0xf6   :  { %s3625_s17 = sld [smem:[#allocation2 + $0x99]]  ;;  %5571 = sst [smem:[#allocation62_spill]] %s3631_s2  ;;  %v3654_v61 = vpop.permute.xlu0 %276  ;;  %v3656_v62 = vpop.permute.xlu1 %298  ;;  %v104_v63 = vsel %vm103_vm3, %v102_v9, %v3392_v13  ;;  %v5645_v9 = vstv %s5635_s24 }
  0xf7   :  { %s5575_s2 = smov 64   ;;  %5577 = vst [vmem:[#allocation66_spill] sm:$0xff] %v3656_v62  ;;  %s5598_s9 = sld [smem:[#allocation55_spill]] }
  0xf8   :  { %5572 = sst [smem:[#allocation63_spill]] %s3633_s7  ;;  %515 = vrot.lane.b32.xlu1 %v3240_v3, %s5575_s2  ;;  %s3662_s2 = sld [smem:[#allocation2 + $0x9a]]  ;;  %518 = vrot.lane.b32.xlu0 %v3226_v1, %s5578_s12 }
  0xf9   :  { %5602 = sst [smem:[#allocation55_spill]] %s3716_s10  ;;  %s5616_s12 = smov 113  }
  0xfa   :  { %5576 = sst [smem:[#allocation65_spill]] %s3652_s4  ;;  %v3686_v57 = vpop.permute.xlu0 %301  ;;  %v3688_v53 = vpop.permute.xlu1 %254  ;;  %s5624_s4 = smov 88  }
  0xfb   :  { %5584 = vst [vmem:[#allocation69_spill] sm:$0xff] %v3686_v57  ;;  %s5632_s7 = smov 121   ;;  %s3821_s10 = sld [smem:[#allocation2 + $0x8]] }
  0xfc   :  { %5569 = sst [smem:[#allocation60_spill]] %s3625_s17  ;;  %s3642_s17 = sld [smem:[#allocation2 + $0x4f]]  ;;  %471 = vrot.lane.b32.xlu1 %v3271_v6, %s5452_s30  ;;  %496 = vrot.lane.b32.xlu0 %v3249_v4, %s5595_s16 }
  0xfd   :  { %s3730_s30 = sld [smem:[#allocation2 + $0x6a]]  ;;  %s3760_s16 = sld [smem:[#allocation2 + $0x39]] }
  0xfe   :  { %v3724_v57 = vpop.permute.xlu0 %279  ;;  %v3726_v58 = vpop.permute.xlu1 %304  ;;  %s5654_s24 = sld [smem:[#allocation25_spill]] }
  0xff   :  { %5607 = vst [vmem:[#allocation75_spill] sm:$0xff] %v3724_v57  ;;  %5608 = vst [vmem:[#allocation76_spill] sm:$0xff] %v3726_v58 }
 0x100   :  { %521 = vrot.lane.b32.xlu1 %v3235_v2, %s5601_s29  ;;  %s5611_s29 = sld [smem:[#allocation62_spill]]  ;;  %474 = vrot.lane.b32.xlu0 %v3284_v7, %s5470_s18  ;;  %s3830_s18 = sld [smem:[#allocation2 + $0x21]] }
 0x101   :  { %5612 = sst [smem:[#allocation62_spill]] %s3738_s11  ;;  %s5638_s11 = sld [smem:[#allocation32_spill]] }
 0x102   :  { %v3766_v3 = vpop.permute.xlu0 %257  ;;  %v3768_v10 = vpop.permute.xlu1 %282 }
 0x103   :  { %5610 = sst [smem:[#allocation78_spill]] %s3730_s30  ;;  %5620 = vst [vmem:[#allocation84_spill] sm:$0xff] %v3768_v10  ;;  %v106_v10 = vsel %vm105_vm4, %v104_v63, %v3400_v15 }
 0x104   :  { %499 = vrot.lane.b32.xlu1 %v3258_v5, %s5616_s12  ;;  %5618 = sst [smem:[#allocation83_spill]] %s3760_s16  ;;  %s3772_s12 = sld [smem:[#allocation2 + $0x6b]]  ;;  %524 = vrot.lane.b32.xlu0 %v3221_v0, %s5624_s4  ;;  %v108_v13 = vsel %vm107_vm5, %v106_v10, %v3416_v19  ;;  %v136_v19 = vsel %vm97_vm0, %v3384_v11, %v3390_v12 }
 0x105   :  { %v110_v8 = vsel %vm109_vm6, %v108_v13, %v3430_v22  ;;  %s5631_s4 = sld [smem:[#allocation22_spill]]  ;;  %v137_v22 = vsel %vm99_vm1, %v136_v19, %v3398_v14  ;;  %s5634_s30 = sld [smem:[#allocation24_spill]]  ;;  %v5650_v14 = vstv %s5640_s13 }
 0x106   :  { %v3800_v15 = vpop.permute.xlu0 %307  ;;  %v3802_v63 = vpop.permute.xlu1 %329  ;;  %5639 = sst [smem:[#allocation22_spill]] %s3832_s3  ;;  %v138_v57 = vsel %vm101_vm2, %v137_v22, %v3406_v16  ;;  %s3846_s16 = sld [smem:[#allocation2 + $0x6c]]  ;;  %v1142_v55 = vmul.f32 %v5645_v9, %v110_v8 }
 0x107   :  { %5628 = vst [vmem:[#allocation89_spill] sm:$0xff] %v3800_v15  ;;  %5629 = vst [vmem:[#allocation90_spill] sm:$0xff] %v3802_v63  ;;  %v139_v58 = vsel %vm103_vm3, %v138_v57, %v3422_v20  ;;  %v5649_v16 = vstv %s5638_s11  ;;  %v1882_v15 = vmul.f32 %v5650_v14, %v110_v8  ;;  %v167_v57 = vsel %vm97_vm0, %v3408_v17, %v3414_v18  ;;  %s3166_s11 = smov 1   ;;  %s5656_s13 = sld [smem:[#allocation29_spill]] }
 0x108   :  { %546 = vrot.lane.b32.xlu1 %v3235_v2, %s5625_s15  ;;  %s3806_s15 = sld [smem:[#allocation2 + $0xb6]]  ;;  %502 = vrot.lane.b32.xlu0 %v3271_v6, %s5632_s7  ;;  %s5637_s7 = sld [smem:[#allocation30_spill]]  ;;  %v1697_v12 = vmul.f32 %v5649_v16, %v110_v8  ;;  %v5664_v14 = vstv %s5654_s24 }
 0x109   :  { %s3909_s24 = sld [smem:[#allocation2 + $0x9]]  ;;  %s3936_s3 = sld [smem:[#allocation2 + $0x86]] }
 0x10a   :  { %5622 = sst [smem:[#allocation86_spill]] %s3772_s12  ;;  %v3838_v10 = vpop.permute.xlu0 %332  ;;  %v3840_v60 = vpop.permute.xlu1 %285  ;;  %s5652_s12 = smov 16  }
 0x10b   :  { %v5641_v19 = vstv %s5631_s4  ;;  %5643 = vst [vmem:[#allocation92_spill] sm:$0xff] %v3840_v60  ;;  %v5644_v59 = vstv %s5634_s30  ;;  %s5647_s4 = sld [smem:[#allocation21_spill]]  ;;  %v5651_v60 = vstv %s5642_s19  ;;  %s5653_s30 = sld [smem:[#allocation23_spill]] }
 0x10c   :  { %527 = vrot.lane.b32.xlu1 %v3249_v4, %s5633_s28  ;;  %v773_v56 = vmul.f32 %v5641_v19, %v110_v8  ;;  %s3844_s28 = sld [smem:[#allocation2 + $0x53]]  ;;  %v884_v22 = vmul.f32 %v5644_v59, %v110_v8  ;;  %v5646_v19 = vstv %s5636_s25  ;;  %v2067_v63 = vmul.f32 %v5651_v60, %v110_v8  ;;  %549 = vrot.lane.b32.xlu0 %v3221_v0, %s5652_s12  ;;  %s5655_s25 = sld [smem:[#allocation27_spill]] }
 0x10d   :  { %v1327_v62 = vmul.f32 %v5646_v19, %v110_v8  ;;  %v140_v59 = vsel %vm105_vm4, %v139_v58, %v3432_v23  ;;  %s5657_s19 = sld [smem:[#allocation31_spill]]  ;;  %s3878_s12 = sld [smem:[#allocation2 + $0xb7]]  ;;  %v168_v0 = vsel %vm99_vm1, %v167_v57, %v3424_v21  ;;  %v1144_v23 = vadd.f32 %v5664_v14, %v1142_v55 }
 0x10e   :  { %5630 = sst [smem:[#allocation91_spill]] %s3806_s15  ;;  %v5648_v13 = vstv %s5637_s7  ;;  %s5658_s7 = sld [smem:[#allocation33_spill]]  ;;  %v141_v58 = vsel %vm107_vm5, %v140_v59, %v3446_v27  ;;  %v3888_v9 = vpop.permute.xlu1 %335  ;;  %v5667_v57 = vstv %s5656_s13 }
 0x10f   :  { %v1512_v11 = vmul.f32 %v5648_v13, %v110_v8  ;;  %v3886_v8 = vpop.permute.xlu0 %310  ;;  %5662 = vst [vmem:[#allocation94_spill] sm:$0xff] %v3888_v9  ;;  %v5671_v9 = vstv %s5659_s6  ;;  %s5673_s13 = sld [smem:[#allocation39_spill]]  ;;  %s5674_s15 = smov 24  }
 0x110   :  { %505 = vrot.lane.b32.xlu1 %v3284_v7, %s3166_s11  ;;  %5661 = vst [vmem:[#allocation93_spill] sm:$0xff] %v3886_v8  ;;  %s5668_s11 = sld [smem:[#allocation38_spill]]  ;;  %v2069_v13 = vadd.f32 %v5671_v9, %v2067_v63  ;;  %s5677_s6 = sld [smem:[#allocation42_spill]] }
 0x111   :  { %v5660_v17 = vstv %s5647_s4  ;;  %v5663_v19 = vstv %s5653_s30  ;;  %s5666_s4 = sld [smem:[#allocation37_spill]]  ;;  %v1514_v59 = vadd.f32 %v5667_v57, %v1512_v11  ;;  %s5672_s30 = smov 104  }
 0x112   :  { %v775_v60 = vadd.f32 %v5660_v17, %v773_v56  ;;  %v886_v16 = vadd.f32 %v5663_v19, %v884_v22  ;;  %v5665_v18 = vstv %s5655_s25  ;;  %v142_v56 = vsel %vm109_vm6, %v141_v58, %v3459_v30  ;;  %530 = vrot.lane.b32.xlu0 %v3258_v5, %s5672_s30  ;;  %s3911_s25 = sld [smem:[#allocation2 + $0x22]]  ;;  %s5678_s30 = sld [smem:[#allocation43_spill]]  ;;  %v3930_v14 = vpop.permute.xlu1 %313 }
 0x113   :  { %v1329_v20 = vadd.f32 %v5665_v18, %v1327_v62  ;;  %v5669_v17 = vstv %s5657_s19  ;;  %v169_v18 = vsel %vm101_vm2, %v168_v0, %v3437_v24  ;;  %s5675_s19 = sld [smem:[#allocation40_spill]]  ;;  %v3928_v22 = vpop.permute.xlu0 %288  ;;  %5683 = sst [smem:[#allocation26_spill]] %s3936_s3  ;;  %v1729_v62 = vstv %s3856_s8 }
 0x114   :  { %v1699_v27 = vadd.f32 %v5669_v17, %v1697_v12  ;;  %v5670_v21 = vstv %s5658_s7  ;;  %552 = vrot.lane.b32.xlu1 %v3249_v4, %s5674_s15  ;;  %s5676_s7 = sld [smem:[#allocation41_spill]]  ;;  %s3934_s15 = sld [smem:[#allocation2 + $0x6d]]  ;;  %v5689_v30 = vstv %s5680_s20 }
 0x115   :  { %v1884_v8 = vadd.f32 %v5670_v21, %v1882_v15  ;;  %v5684_v58 = vstv %s5673_s13  ;;  %v2072_v24 = vmul.f32 %v5689_v30, %v142_v56  ;;  %s3957_s13 = sld [smem:[#allocation2 + $0xb8]]  ;;  %s3167_s3 = smov 120  }
 0x116   :  { %v5681_v63 = vstv %s5668_s11  ;;  %v1147_v9 = vmul.f32 %v5684_v58, %v142_v56  ;;  %v5687_v21 = vstv %s5677_s6  ;;  %s3955_s11 = sld [smem:[#allocation2 + $0x9f]]  ;;  %v198_v58 = vsel %vm97_vm0, %v3439_v25, %v3444_v26  ;;  %v3974_v26 = vpop.permute.xlu1 %360  ;;  %s5692_s20 = sld [smem:[#allocation45_spill]] }
 0x117   :  { %v5679_v55 = vstv %s5666_s4  ;;  %v889_v11 = vmul.f32 %v5681_v63, %v142_v56  ;;  %v170_v63 = vsel %vm103_vm3, %v169_v18, %v3451_v28  ;;  %v1702_v12 = vmul.f32 %v5687_v21, %v142_v56  ;;  %s5690_s4 = smov 119   ;;  %v3972_v25 = vpop.permute.xlu0 %338  ;;  %s5694_s6 = smov 112  }
 0x118   :  { %v778_v15 = vmul.f32 %v5679_v55, %v142_v56  ;;  %v5688_v4 = vstv %s5678_s30  ;;  %575 = vrot.lane.b32.xlu0 %v3226_v1, %s5690_s4  ;;  %v171_v18 = vsel %vm105_vm4, %v170_v63, %v3461_v31  ;;  %v199_v1 = vsel %vm99_vm1, %v198_v58, %v3453_v29  ;;  %s5695_s30 = sld [smem:[#allocation48_spill]]  ;;  %s5696_s4 = smov 32  }
 0x119   :  { %v5685_v19 = vstv %s5675_s19  ;;  %v1887_v0 = vmul.f32 %v5688_v4, %v142_v56  ;;  %s5691_s19 = smov 127   ;;  %v890_v4 = vadd.f32 %v889_v11, %v886_v16  ;;  %s5822_s8 = sld [smem:[#allocation26_spill]] }
 0x11a   :  { %5682 = sst [smem:[#allocation24_spill]] %s3934_s15  ;;  %v1332_v57 = vmul.f32 %v5685_v19, %v142_v56  ;;  %v5686_v17 = vstv %s5676_s7  ;;  %578 = vrot.lane.b32.xlu1 %v3235_v2, %s5691_s19  ;;  %v172_v19 = vsel %vm107_vm5, %v171_v18, %v3475_v35  ;;  %v1148_v2 = vadd.f32 %v1147_v9, %v1144_v23  ;;  %s5693_s7 = sld [smem:[#allocation46_spill]] }
 0x11b   :  { %v1517_v55 = vmul.f32 %v5686_v17, %v142_v56  ;;  %v779_v56 = vadd.f32 %v778_v15, %v775_v60  ;;  %v173_v29 = vsel %vm109_vm6, %v172_v19, %v3487_v38  ;;  %v1703_v60 = vadd.f32 %v1702_v12, %v1699_v27  ;;  %s5698_s19 = sld [smem:[#allocation49_spill]]  ;;  %s5709_s15 = sld [smem:[#allocation56_spill]] }
 0x11c   :  { %v1333_v17 = vadd.f32 %v1332_v57, %v1329_v20  ;;  %v1888_v16 = vadd.f32 %v1887_v0, %v1884_v8  ;;  %v2073_v15 = vadd.f32 %v2072_v24, %v2069_v13  ;;  %533 = vrot.lane.b32.xlu0 %v3271_v6, %s5694_s6  ;;  %v200_v23 = vsel %vm101_vm2, %v199_v1, %v3465_v32  ;;  %v3992_v13 = vpop.permute.xlu0 %363  ;;  %v3994_v6 = vpop.permute.xlu1 %316  ;;  %s5702_s6 = sld [smem:[#allocation51_spill]] }
 0x11d   :  { %v1518_v63 = vadd.f32 %v1517_v55, %v1514_v59  ;;  %v201_v27 = vsel %vm103_vm3, %v200_v23, %v3480_v36  ;;  %v5697_v24 = vstv %s5692_s20  ;;  %v5700_v57 = vstv %s5586_s0  ;;  %s5705_s0 = smov 7   ;;  %s5712_s20 = sld [smem:[#allocation57_spill]] }
 0x11e   :  { %555 = vrot.lane.b32.xlu1 %v3258_v5, %s5696_s4  ;;  %v782_v8 = vmul.f32 %v5697_v24, %v173_v29  ;;  %v1151_v55 = vmul.f32 %v5700_v57, %v173_v29  ;;  %v5701_v58 = vstv %s5695_s30  ;;  %s5703_s4 = sld [smem:[#allocation53_spill]]  ;;  %v202_v36 = vsel %vm105_vm4, %v201_v27, %v3489_v39  ;;  %s5707_s30 = sld [smem:[#allocation54_spill]] }
 0x11f   :  { %v1336_v18 = vmul.f32 %v5701_v58, %v173_v29  ;;  %v229_v1 = vsel %vm97_vm0, %v3467_v33, %v3473_v34  ;;  %v203_v19 = vsel %vm107_vm5, %v202_v36, %v3504_v43  ;;  %v5708_v33 = vstv %s5591_s14  ;;  %s5714_s14 = sld [smem:[#allocation59_spill]] }
 0x120   :  { %v5699_v0 = vstv %s5693_s7  ;;  %s5704_s7 = sld [smem:[#allocation96_spill]]  ;;  %v230_v39 = vsel %vm99_vm1, %v229_v1, %v3482_v37  ;;  %v1706_v34 = vmul.f32 %v5708_v33, %v173_v29  ;;  %v204_v43 = vsel %vm109_vm6, %v203_v19, %v3539_v46  ;;  %v4035_v1 = vpop.permute.xlu0 %341 }
 0x121   :  { %v893_v5 = vmul.f32 %v5699_v0, %v173_v29  ;;  %v5706_v27 = vstv %s5698_s19  ;;  %v783_v58 = vadd.f32 %v782_v8, %v779_v56  ;;  %s5713_s19 = sld [smem:[#allocation58_spill]]  ;;  %v231_v37 = vsel %vm101_vm2, %v230_v39, %v3495_v40 }
 0x122   :  { %v1521_v57 = vmul.f32 %v5706_v27, %v173_v29  ;;  %536 = vrot.lane.b32.xlu1 %v3284_v7, %s3167_s3  ;;  %v5710_v36 = vstv %s5702_s6  ;;  %v4037_v27 = vpop.permute.xlu1 %366  ;;  %v1152_v32 = vadd.f32 %v1151_v55, %v1148_v2  ;;  %v1337_v46 = vadd.f32 %v1336_v18, %v1333_v17  ;;  %s5719_s3 = sld [smem:[#allocation60_spill]]  ;;  %s5750_s6 = sld [smem:[#allocation70_spill]] }
 0x123   :  { %v1891_v24 = vmul.f32 %v5710_v36, %v173_v29  ;;  %v894_v33 = vadd.f32 %v893_v5, %v890_v4  ;;  %v232_v7 = vsel %vm103_vm3, %v231_v37, %v3518_v44  ;;  %v5716_v19 = vstv %s5598_s9  ;;  %s5760_s9 = sld [smem:[#allocation50_spill]] }
 0x124   :  { %v5711_v0 = vstv %s5703_s4  ;;  %v5715_v56 = vstv %s5707_s30  ;;  %v897_v36 = vmul.f32 %v5716_v19, %v204_v43  ;;  %v233_v40 = vsel %vm105_vm4, %v232_v7, %v3541_v47  ;;  %s5722_s30 = smov 15   ;;  %v4076_v7 = vpop.permute.xlu0 %319  ;;  %s5729_s4 = sld [smem:[#allocation65_spill]] }
 0x125   :  { %v2076_v12 = vmul.f32 %v5711_v0, %v173_v29  ;;  %v786_v8 = vmul.f32 %v5715_v56, %v204_v43  ;;  %v5717_v29 = vstv %s5709_s15  ;;  %v1522_v4 = vadd.f32 %v1521_v57, %v1518_v63  ;;  %5726 = vst [vmem:[#allocation95_spill] sm:$0xff] %v4076_v7  ;;  %s5775_s15 = sld [smem:[#allocation77_spill]] }
 0x126   :  { %v4014_v23 = vld [vmem:[%s5704_s7 + $0x6] sm:$0x3]  ;;  %v1155_v0 = vmul.f32 %v5717_v29, %v204_v43  ;;  %v4052_v39 = vld [vmem:[%s5704_s7 + $0xc] sm:$0x3]  ;;  %v5720_v44 = vstv %s5712_s20  ;;  %v234_v55 = vsel %vm107_vm5, %v233_v40, %v3585_v51  ;;  %v4065_v47 = vld [vmem:[%s5704_s7 + $0x8] sm:$0x3]  ;;  %v1707_v18 = vadd.f32 %v1706_v34, %v1703_v60  ;;  %v4078_v56 = vpop.permute.xlu1 %344 }
 0x127   :  { %581 = vrot.lane.b32.xlu0 %v4014_v23, %s5705_s0  ;;  %s5718_s0 = smov 40   ;;  %v1340_v2 = vmul.f32 %v5720_v44, %v204_v43  ;;  %v5721_v17 = vstv %s5713_s19  ;;  %584 = vrot.lane.b32.xlu1 %v4065_v47, %s5722_s30  ;;  %v260_v63 = vsel %vm97_vm0, %v3497_v41, %v3502_v42  ;;  %v5723_v57 = vstv %s5714_s14  ;;  %s5724_s20 = sld [smem:[#allocation63_spill]] }
 0x128   :  { %v1525_v5 = vmul.f32 %v5721_v17, %v204_v43  ;;  %v1710_v37 = vmul.f32 %v5723_v57, %v204_v43  ;;  %v235_v51 = vsel %vm109_vm6, %v234_v55, %v3627_v54  ;;  %s5725_s19 = sld [smem:[#allocation64_spill]]  ;;  %v1892_v19 = vadd.f32 %v1891_v24, %v1888_v16  ;;  %v4089_v55 = vld [vmem:[%s5704_s7 + $0x2] sm:$0x3]  ;;  %s5745_s14 = sld [smem:[#allocation68_spill]] }
 0x129   :  { %v2077_v29 = vadd.f32 %v2076_v12, %v2073_v15  ;;  %v261_v60 = vsel %vm99_vm1, %v260_v63, %v3520_v45  ;;  %v5727_v34 = vstv %s5719_s3  ;;  %v787_v42 = vadd.f32 %v786_v8, %v783_v58  ;;  %s5757_s3 = sld [smem:[#allocation71_spill]]  ;;  %s5777_s30 = sld [smem:[#allocation62_spill]] }
 0x12a   :  { %v1895_v41 = vmul.f32 %v5727_v34, %v204_v43  ;;  %v898_v40 = vadd.f32 %v897_v36, %v894_v33  ;;  %v1156_v44 = vadd.f32 %v1155_v0, %v1152_v32  ;;  %v5728_v17 = vstv %s5611_s29  ;;  %v4100_v32 = vld [vmem:[%s5704_s7 + $0x4] sm:$0x3]  ;;  %s5733_s29 = smov 118  }
 0x12b   :  { %558 = vrot.lane.b32.xlu0 %v4052_v39, %s5718_s0  ;;  %v2080_v54 = vmul.f32 %v5728_v17, %v204_v43  ;;  %s5730_s0 = smov 110   ;;  %v1341_v45 = vadd.f32 %v1340_v2, %v1337_v46  ;;  %v1526_v16 = vadd.f32 %v1525_v5, %v1522_v4  ;;  %609 = vrot.lane.b32.xlu1 %v4100_v32, %s5733_s29  ;;  %v5734_v33 = vstv %s3637_s22  ;;  %v370_v2 = vpop.permute.xlu0 %369  ;;  %s5762_s29 = sld [smem:[#allocation72_spill]] }
 0x12c   :  { %v1711_v43 = vadd.f32 %v1710_v37, %v1707_v18  ;;  %v1159_v8 = vmul.f32 %v5734_v33, %v235_v51  ;;  %v5735_v36 = vstv %s3642_s17  ;;  %v5736_v46 = vstv %s3644_s5  ;;  %s5740_s17 = smov 48   ;;  %s5765_s5 = smov 31  }
 0x12d   :  { %v5731_v15 = vstv %s5724_s20  ;;  %v1344_v0 = vmul.f32 %v5735_v36, %v235_v51  ;;  %v1529_v4 = vmul.f32 %v5736_v46, %v235_v51  ;;  %v1896_v5 = vadd.f32 %v1895_v41, %v1892_v19  ;;  %v4126_v19 = vld [vmem:[%s5704_s7 + $0xe] sm:$0x3]  ;;  %s5769_s22 = smov 6   ;;  %s5779_s20 = sld [smem:[#allocation79_spill]] }
 0x12e   :  { %v790_v12 = vmul.f32 %v5731_v15, %v235_v51  ;;  %v5732_v24 = vstv %s5725_s19  ;;  %v262_v63 = vsel %vm101_vm2, %v261_v60, %v3561_v48  ;;  %v5737_v57 = vstv %s5729_s4  ;;  %v5741_v48 = vld [vmem:[#allocation52_spill] sm:$0xff]  ;;  %s5744_s19 = sld [smem:[#allocation67_spill]]  ;;  %s5753_s4 = smov 56  }
 0x12f   :  { %606 = vrot.lane.b32.xlu0 %v4089_v55, %s5730_s0  ;;  %v901_v58 = vmul.f32 %v5732_v24, %v235_v51  ;;  %v1714_v34 = vmul.f32 %v5737_v57, %v235_v51  ;;  %v5738_v17 = vstv %s3662_s2  ;;  %v392_v24 = vpop.permute.xlu1 %391  ;;  %v2081_v9 = vadd.f32 %v2080_v54, %v2077_v29  ;;  %v5742_v54 = vld [vmem:[#allocation61_spill] sm:$0xff]  ;;  %s5755_s0 = sld [smem:[#allocation47_spill]]  ;;  %s5773_s2 = sld [smem:[#allocation74_spill]] }
 0x130   :  { %v1899_v15 = vmul.f32 %v5738_v17, %v235_v51  ;;  %v291_v18 = vsel %vm97_vm0, %v3563_v49, %v3583_v50  ;;  %v263_v37 = vsel %vm103_vm3, %v262_v63, %v3603_v52  ;;  %v5739_v33 = vstv %s3664_s26  ;;  %v4137_v52 = vld [vmem:[%s5704_s7 + $0xa] sm:$0x3]  ;;  %s5743_s26 = smov 23  }
 0x131   :  { %v2084_v36 = vmul.f32 %v5739_v33, %v235_v51  ;;  %v292_v29 = vsel %vm99_vm1, %v291_v18, %v5741_v48  ;;  %v791_v60 = vadd.f32 %v790_v12, %v787_v42  ;;  %v902_v41 = vadd.f32 %v901_v58, %v898_v40  ;;  %587 = vrot.lane.b32.xlu1 %v4137_v52, %s5743_s26  ;;  %v395_v42 = vpop.permute.xlu0 %394  ;;  %v4148_v40 = vld [vmem:[%s5704_s7 + $0x10] sm:$0x3]  ;;  %s5748_s7 = smov 126   ;;  %s5776_s26 = sld [smem:[#allocation78_spill]] }
 0x132   :  { %v264_v49 = vsel %vm105_vm4, %v263_v37, %v5742_v54  ;;  %v1160_v51 = vadd.f32 %v1159_v8, %v1156_v44  ;;  %v1345_v46 = vadd.f32 %v1344_v0, %v1341_v45  ;;  %v4141_v63 = vadd.f32 %v1529_v4, %v1526_v16  ;;  %v5746_v8 = vld [vmem:[#allocation69_spill] sm:$0xff]  ;;  %v5747_v0 = vld [vmem:[#allocation66_spill] sm:$0xff] }
 0x133   :  { %561 = vrot.lane.b32.xlu0 %v4126_v19, %s5740_s17  ;;  %v265_v57 = vsel %vm107_vm5, %v264_v49, %v3688_v53  ;;  %v1715_v12 = vadd.f32 %v1714_v34, %v1711_v43  ;;  %v1900_v58 = vadd.f32 %v1899_v15, %v1896_v5  ;;  %v415_v44 = vsel %vm97_vm0, %v392_v24, %v395_v42  ;;  %v348_v45 = vpop.permute.xlu1 %347  ;;  %v5752_v15 = vld [vmem:[#allocation90_spill] sm:$0xff]  ;;  %v5756_v37 = vld [vmem:[#allocation84_spill] sm:$0xff]  ;;  %s5771_s17 = sld [smem:[#allocation55_spill]] }
 0x134   :  { %v266_v17 = vsel %vm109_vm6, %v265_v57, %v3766_v3  ;;  %v2085_v16 = vadd.f32 %v2084_v36, %v2081_v9  ;;  %v293_v53 = vsel %vm101_vm2, %v292_v29, %v3654_v61  ;;  %v322_v4 = vsel %vm97_vm0, %v5747_v0, %v5746_v8  ;;  %v5749_v3 = vld [vmem:[#allocation75_spill] sm:$0xff]  ;;  %v5751_v9 = vld [vmem:[#allocation76_spill] sm:$0xff]  ;;  %v5758_v36 = vld [vmem:[#allocation94_spill] sm:$0xff] }
 0x135   :  { %v384_v43 = vsel %vm97_vm0, %v3974_v26, %v3992_v13  ;;  %v294_v5 = vsel %vm103_vm3, %v293_v53, %v5749_v3  ;;  %v323_v34 = vsel %vm99_vm1, %v322_v4, %v5751_v9  ;;  %v353_v24 = vsel %vm97_vm0, %v5752_v15, %v3838_v10  ;;  %565 = vrot.lane.b32.xlu1 %v4148_v40, %s5753_s4  ;;  %v373_v49 = vpop.permute.xlu0 %372  ;;  %v5764_v15 = vld [vmem:[#allocation92_spill] sm:$0xff]  ;;  %s5791_s4 = sld [smem:[#allocation82_spill]] }
 0x136   :  { %v385_v18 = vsel %vm99_vm1, %v384_v43, %v4037_v27  ;;  %v5754_v26 = vstv %s5744_s19  ;;  %v295_v33 = vsel %vm105_vm4, %v294_v5, %v5756_v37  ;;  %v354_v29 = vsel %vm99_vm1, %v353_v24, %v5758_v36  ;;  %s5781_s19 = sld [smem:[#allocation80_spill]] }
 0x137   :  { %612 = vrot.lane.b32.xlu0 %v4014_v23, %s5748_s7  ;;  %v794_v13 = vmul.f32 %v5754_v26, %v266_v17  ;;  %v386_v54 = vsel %vm101_vm2, %v385_v18, %v370_v2  ;;  %v5759_v10 = vstv %s5745_s14  ;;  %v5761_v27 = vstv %s3680_s27  ;;  %v398_v4 = vpop.permute.xlu1 %397  ;;  %s5768_s27 = sld [smem:[#allocation73_spill]]  ;;  %s5782_s14 = smov 39  }
 0x138   :  { %v905_v57 = vmul.f32 %v5759_v10, %v266_v17  ;;  %v1163_v42 = vmul.f32 %v5761_v27, %v266_v17  ;;  %v355_v53 = vsel %vm101_vm2, %v354_v29, %v3972_v25  ;;  %v387_v0 = vsel %vm103_vm3, %v386_v54, %v373_v49  ;;  %v5774_v27 = vld [vmem:[#allocation89_spill] sm:$0xff]  ;;  %s5786_s7 = smov 14  }
 0x139   :  { %v5763_v43 = vstv %s5750_s6  ;;  %v296_v24 = vsel %vm107_vm5, %v295_v33, %v5764_v15  ;;  %v356_v2 = vsel %vm103_vm3, %v355_v53, %v4035_v1  ;;  %v416_v18 = vsel %vm99_vm1, %v415_v44, %v398_v4  ;;  %615 = vrot.lane.b32.xlu1 %v4065_v47, %s5769_s22  ;;  %s5790_s6 = sld [smem:[#allocation81_spill]]  ;;  %s5801_s22 = smov 22  }
 0x13a   :  { %v1348_v5 = vmul.f32 %v5763_v43, %v266_v17  ;;  %v5766_v26 = vstv %s5755_s0  ;;  %v5767_v10 = vstv %s5757_s3  ;;  %v297_v29 = vsel %vm109_vm6, %v296_v24, %v3928_v22  ;;  %v351_v43 = vpop.permute.xlu0 %350  ;;  %s5793_s0 = sld [smem:[#allocation83_spill]]  ;;  %s5794_s3 = sld [smem:[#allocation85_spill]] }
 0x13b   :  { %590 = vrot.lane.b32.xlu0 %v4052_v39, %s5765_s5  ;;  %v1533_v36 = vmul.f32 %v5766_v26, %v266_v17  ;;  %v1718_v25 = vmul.f32 %v5767_v10, %v266_v17  ;;  %v357_v54 = vsel %vm105_vm4, %v356_v2, %v4078_v56  ;;  %v5770_v1 = vstv %s5760_s9  ;;  %v5778_v2 = vld [vmem:[#allocation93_spill] sm:$0xff]  ;;  %s5795_s9 = smov 47   ;;  %s5797_s5 = sld [smem:[#allocation87_spill]] }
 0x13c   :  { %v1903_v44 = vmul.f32 %v5770_v1, %v266_v17  ;;  %v5772_v33 = vstv %s5762_s29  ;;  %v324_v53 = vsel %vm101_vm2, %v323_v34, %v5774_v27  ;;  %v358_v4 = vsel %vm107_vm5, %v357_v54, %v348_v45  ;;  %v376_v1 = vpop.permute.xlu1 %375  ;;  %s5796_s29 = sld [smem:[#allocation86_spill]] }
 0x13d   :  { %v2088_v49 = vmul.f32 %v5772_v33, %v266_v17  ;;  %v795_v24 = vadd.f32 %v794_v13, %v791_v60  ;;  %v906_v56 = vadd.f32 %v905_v57, %v902_v41  ;;  %v325_v26 = vsel %vm103_vm3, %v324_v53, %v5778_v2  ;;  %618 = vrot.lane.b32.xlu1 %v4137_v52, %s5786_s7  ;;  %s5836_s7 = smov 5  }
 0x13e   :  { %v359_v10 = vsel %vm109_vm6, %v358_v4, %v351_v43  ;;  %v1164_v59 = vadd.f32 %v1163_v42, %v1160_v51  ;;  %v1349_v17 = vadd.f32 %v1348_v5, %v1345_v46  ;;  %v5780_v33 = vstv %s5768_s27  ;;  %s5799_s27 = sld [smem:[#allocation88_spill]] }
 0x13f   :  { %v798_v20 = vmul.f32 %v5780_v33, %v297_v29  ;;  %v326_v45 = vsel %vm105_vm4, %v325_v26, %v3930_v14  ;;  %593 = vrot.lane.b32.xlu0 %v4126_v19, %s5782_s14  ;;  %v5783_v60 = vstv %s5771_s17  ;;  %v5784_v34 = vstv %s5773_s2  ;;  %v401_v33 = vpop.permute.xlu0 %400  ;;  %s5802_s17 = sld [smem:[#allocation91_spill]]  ;;  %s5804_s2 = sld [smem:[#allocation22_spill]] }
 0x140   :  { %v909_v41 = vmul.f32 %v5783_v60, %v297_v29  ;;  %v1167_v13 = vmul.f32 %v5784_v34, %v297_v29  ;;  %v5785_v57 = vstv %s5775_s15  ;;  %v327_v53 = vsel %vm107_vm5, %v326_v45, %v3994_v6  ;;  %v423_v30 = vpop.permute.xlu1 %422  ;;  %s5809_s15 = smov 30   ;;  %s5835_s14 = smov 100  }
 0x141   :  { %v1352_v54 = vmul.f32 %v5785_v57, %v297_v29  ;;  %v5787_v51 = vstv %s5776_s26  ;;  %v5788_v42 = vstv %s5777_s30  ;;  %v5789_v4 = vstv %s5779_s20  ;;  %621 = vrot.lane.b32.xlu1 %v4052_v39, %s5801_s22  ;;  %s5812_s26 = smov 38   ;;  %s4331_s30 = sld [smem:[#allocation2 + $0x87]] }
 0x142   :  { %v1537_v46 = vmul.f32 %v5787_v51, %v297_v29  ;;  %v1722_v5 = vmul.f32 %v5788_v42, %v297_v29  ;;  %v1907_v43 = vmul.f32 %v5789_v4, %v297_v29  ;;  %v328_v26 = vsel %vm109_vm6, %v327_v53, %v4076_v7  ;;  %s4333_s20 = sld [smem:[#allocation2 + $0xa0]]  ;;  %s4388_s22 = sld [smem:[#allocation2 + $0x56]] }
 0x143   :  { %v1534_v60 = vadd.f32 %v1533_v36, %v4141_v63  ;;  %v1719_v34 = vadd.f32 %v1718_v25, %v1715_v12  ;;  %v1904_v57 = vadd.f32 %v1903_v44, %v1900_v58  ;;  %v5792_v45 = vstv %s5781_s19  ;;  %596 = vrot.lane.b32.xlu0 %v4148_v40, %s5795_s9  ;;  %s4335_s19 = sld [smem:[#allocation2 + $0xb9]]  ;;  %s4370_s9 = sld [smem:[#allocation2 + $0xb]] }
 0x144   :  { %v2092_v11 = vmul.f32 %v5792_v45, %v297_v29  ;;  %v2089_v21 = vadd.f32 %v2088_v49, %v2085_v16  ;;  %v799_v51 = vadd.f32 %v798_v20, %v795_v24  ;;  %v388_v42 = vsel %vm105_vm4, %v387_v0, %v376_v1  ;;  %v426_v29 = vpop.permute.xlu0 %425 }
 0x145   :  { %v417_v4 = vsel %vm101_vm2, %v416_v18, %v401_v33  ;;  %v910_v53 = vadd.f32 %v909_v41, %v906_v56  ;;  %v1168_v63 = vadd.f32 %v1167_v13, %v1164_v59  ;;  %v5798_v12 = vstv %s5790_s6  ;;  %v379_v41 = vpop.permute.xlu1 %378  ;;  %627 = vrot.lane.b32.xlu1 %v4148_v40, %s5812_s26  ;;  %s5837_s6 = smov 108   ;;  %s4396_s26 = sld [smem:[#allocation2 + $0xa1]] }
 0x146   :  { %v802_v58 = vmul.f32 %v5798_v12, %v328_v26  ;;  %v5800_v36 = vstv %s5791_s4  ;;  %v1353_v20 = vadd.f32 %v1352_v54, %v1349_v17  ;;  %v1538_v16 = vadd.f32 %v1537_v46, %v1534_v60  ;;  %s5838_s4 = smov 46  }
 0x147   :  { %v913_v25 = vmul.f32 %v5800_v36, %v328_v26  ;;  %v1723_v0 = vadd.f32 %v1722_v5, %v1719_v34  ;;  %v1908_v18 = vadd.f32 %v1907_v43, %v1904_v57  ;;  %v2093_v44 = vadd.f32 %v2092_v11, %v2089_v21  ;;  %624 = vrot.lane.b32.xlu0 %v4126_v19, %s5809_s15  ;;  %s4394_s15 = sld [smem:[#allocation2 + $0x88]] }
 0x148   :  { %v5803_v49 = vstv %s5793_s0  ;;  %v5805_v24 = vstv %s5794_s3  ;;  %v446_v1 = vsel %vm97_vm0, %v423_v30, %v426_v29  ;;  %v5806_v13 = vstv %s5796_s29  ;;  %s5839_s0 = smov 13   ;;  %s5840_s3 = smov 116  }
 0x149   :  { %v1171_v59 = vmul.f32 %v5803_v49, %v328_v26  ;;  %v1356_v56 = vmul.f32 %v5805_v24, %v328_v26  ;;  %v1541_v17 = vmul.f32 %v5806_v13, %v328_v26  ;;  %v5807_v54 = vstv %s5797_s5  ;;  %s4380_s29 = sld [smem:[#allocation2 + $0x24]]  ;;  %s4382_s5 = sld [smem:[#allocation2 + $0x3d]] }
 0x14a   :  { %v1726_v46 = vmul.f32 %v5807_v54, %v328_v26  ;;  %v5808_v5 = vstv %s5799_s27  ;;  %v389_v21 = vsel %vm107_vm5, %v388_v42, %v379_v41  ;;  %v803_v11 = vadd.f32 %v802_v58, %v799_v51  ;;  %v404_v41 = vpop.permute.xlu0 %403  ;;  %s5841_s27 = smov 83  }
 0x14b   :  { %v1911_v43 = vmul.f32 %v5808_v5, %v328_v26  ;;  %v914_v33 = vadd.f32 %v913_v25, %v910_v53  ;;  %v5810_v60 = vstv %s5802_s17  ;;  %v5811_v30 = vstv %s3821_s10  ;;  %v429_v5 = vpop.permute.xlu1 %428  ;;  %s5819_s10 = smov 101   ;;  %s4390_s17 = sld [smem:[#allocation2 + $0x6f]] }
 0x14c   :  { %v2096_v34 = vmul.f32 %v5810_v60, %v328_v26  ;;  %v806_v57 = vmul.f32 %v5811_v30, %v359_v10  ;;  %v5813_v45 = vstv %s3830_s18  ;;  %v5814_v36 = vstv %s5804_s2  ;;  %657 = vrot.lane.b32.xlu0 %v4089_v55, %s5819_s10  ;;  %s5820_s18 = smov 109   ;;  %s5842_s2 = smov 91  }
 0x14d   :  { %v917_v12 = vmul.f32 %v5813_v45, %v359_v10  ;;  %v1175_v29 = vmul.f32 %v5814_v36, %v359_v10  ;;  %v5815_v49 = vstv %s3844_s28  ;;  %v5816_v13 = vstv %s3846_s16  ;;  %660 = vrot.lane.b32.xlu1 %v4100_v32, %s5820_s18  ;;  %s5827_s16 = smov 117   ;;  %s5832_s28 = smov 55  }
 0x14e   :  { %v1360_v24 = vmul.f32 %v5815_v49, %v359_v10  ;;  %v1545_v42 = vmul.f32 %v5816_v13, %v359_v10  ;;  %v1730_v54 = vmul.f32 %v1729_v62, %v359_v10  ;;  %v5817_v51 = vstv %s3876_s21  ;;  %s5821_s21 = sld [smem:[#allocation24_spill]]  ;;  %s4398_s10 = sld [smem:[#allocation2 + $0xba]] }
 0x14f   :  { %v1915_v53 = vmul.f32 %v5817_v51, %v359_v10  ;;  %v5818_v58 = vstv %s3878_s12  ;;  %v418_v25 = vsel %vm103_vm3, %v417_v4, %v404_v41  ;;  %v1172_v60 = vadd.f32 %v1171_v59, %v1168_v63  ;;  %s5833_s12 = smov 125   ;;  %s5843_s18 = smov 21  }
 0x150   :  { %v2100_v26 = vmul.f32 %v5818_v58, %v359_v10  ;;  %v1357_v30 = vadd.f32 %v1356_v56, %v1353_v20  ;;  %v1542_v7 = vadd.f32 %v1541_v17, %v1538_v16  ;;  %v447_v45 = vsel %vm99_vm1, %v446_v1, %v429_v5  ;;  %v382_v16 = vpop.permute.xlu0 %381  ;;  %663 = vrot.lane.b32.xlu0 %v4014_v23, %s5827_s16  ;;  %s5846_s16 = smov 29  }
 0x151   :  { %v1727_v36 = vadd.f32 %v1726_v46, %v1723_v0  ;;  %v1912_v49 = vadd.f32 %v1911_v43, %v1908_v18  ;;  %v2097_v62 = vadd.f32 %v2096_v34, %v2093_v44  ;;  %v807_v13 = vadd.f32 %v806_v57, %v803_v11  ;;  %v407_v44 = vpop.permute.xlu1 %406  ;;  %637 = vrot.lane.b32.xlu1 %v4148_v40, %s5832_s28  ;;  %s4501_s28 = sld [smem:[#allocation2 + $0xa2]] }
 0x152   :  { %v918_v10 = vadd.f32 %v917_v12, %v914_v33  ;;  %v1176_v4 = vadd.f32 %v1175_v29, %v1172_v60  ;;  %v1361_v63 = vadd.f32 %v1360_v24, %v1357_v30  ;;  %v1546_v20 = vadd.f32 %v1545_v42, %v1542_v7 }
 0x153   :  { %v1731_v59 = vadd.f32 %v1730_v54, %v1727_v36  ;;  %v1916_v0 = vadd.f32 %v1915_v53, %v1912_v49  ;;  %v2101_v56 = vadd.f32 %v2100_v26, %v2097_v62  ;;  %v390_v18 = vsel %vm109_vm6, %v389_v21, %v382_v16 }
 0x154   :  { %v5823_v1 = vstv %s3909_s24  ;;  %v5824_v46 = vstv %s3911_s25  ;;  %v5825_v11 = vstv %s3920_s23  ;;  %v5826_v33 = vstv %s3922_s1  ;;  %v432_v5 = vpop.permute.xlu0 %431  ;;  %s4315_s23 = sld [smem:[#allocation2 + $0xa]]  ;;  %s4317_s1 = sld [smem:[#allocation2 + $0x23]] }
 0x155   :  { %v810_v17 = vmul.f32 %v5823_v1, %v390_v18  ;;  %v921_v43 = vmul.f32 %v5824_v46, %v390_v18  ;;  %v1179_v34 = vmul.f32 %v5825_v11, %v390_v18  ;;  %v1364_v57 = vmul.f32 %v5826_v33, %v390_v18  ;;  %v454_v62 = vpop.permute.xlu1 %453  ;;  %666 = vrot.lane.b32.xlu0 %v4065_v47, %s5833_s12  ;;  %s4323_s24 = sld [smem:[#allocation2 + $0x3c]]  ;;  %s4325_s25 = sld [smem:[#allocation2 + $0x55]] }
 0x156   :  { %v5828_v12 = vstv %s5821_s21  ;;  %v5829_v29 = vstv %s5822_s8  ;;  %v5830_v42 = vstv %s3955_s11  ;;  %v5831_v54 = vstv %s3957_s13  ;;  %s5834_s11 = smov 92   ;;  %s4329_s13 = sld [smem:[#allocation2 + $0x6e]] }
 0x157   :  { %v1549_v7 = vmul.f32 %v5828_v12, %v390_v18  ;;  %v1734_v24 = vmul.f32 %v5829_v29, %v390_v18  ;;  %v1919_v41 = vmul.f32 %v5830_v42, %v390_v18  ;;  %v2104_v21 = vmul.f32 %v5831_v54, %v390_v18  ;;  %688 = vrot.lane.b32.xlu1 %v4089_v55, %s5834_s11  ;;  %s5844_s21 = smov 124   ;;  %s5845_s8 = smov 99  }
 0x158   :  { %v811_v51 = vadd.f32 %v810_v17, %v807_v13  ;;  %v922_v53 = vadd.f32 %v921_v43, %v918_v10  ;;  %v1180_v58 = vadd.f32 %v1179_v34, %v1176_v4  ;;  %v1365_v26 = vadd.f32 %v1364_v57, %v1361_v63  ;;  %v457_v13 = vpop.permute.xlu0 %456  ;;  %s2493_s12 = sld [smem:[#allocation2 + $0x72]]  ;;  %s2574_s11 = sld [smem:[#allocation2 + $0xbd]] }
 0x159   :  { %v1550_v60 = vadd.f32 %v1549_v7, %v1546_v20  ;;  %v1735_v30 = vadd.f32 %v1734_v24, %v1731_v59  ;;  %v1920_v36 = vadd.f32 %v1919_v41, %v1916_v0  ;;  %v2105_v49 = vadd.f32 %v2104_v21, %v2101_v56  ;;  %691 = vrot.lane.b32.xlu0 %v4100_v32, %s5835_s14  ;;  %s2494_s14 = sld [smem:[#allocation2 + $0x73]] }
 0x15a   :  { %v419_v16 = vsel %vm105_vm4, %v418_v25, %v407_v44  ;;  %v448_v18 = vsel %vm101_vm2, %v447_v45, %v432_v5  ;;  %v477_v25 = vsel %vm97_vm0, %v454_v62, %v457_v13  ;;  %v410_v45 = vpop.permute.xlu1 %409  ;;  %v813_v0 = vstv %s4315_s23  ;;  %s4503_s23 = sld [smem:[#allocation2 + $0xbb]] }
 0x15b   :  { %v420_v10 = vsel %vm107_vm5, %v419_v16, %v410_v45  ;;  %669 = vrot.lane.b32.xlu1 %v4137_v52, %s5836_s7  ;;  %v924_v56 = vstv %s4317_s1  ;;  %v1182_v44 = vstv %s4323_s24  ;;  %v1367_v1 = vstv %s4325_s25  ;;  %s5847_s1 = sld [smem:[#allocation97_spill]]  ;;  %s2547_s25 = sld [smem:[#allocation2 + $0xa4]] }
 0x15c   :  { %v435_v4 = vpop.permute.xlu0 %434  ;;  %v1552_v17 = vstv %s4329_s13  ;;  %v1737_v46 = vstv %s4331_s30  ;;  %v1922_v43 = vstv %s4333_s20  ;;  %v2107_v11 = vstv %s4335_s19  ;;  %s5848_s20 = smov 4   ;;  %s5849_s19 = smov 107  }
 0x15d   :  { %v449_v63 = vsel %vm103_vm3, %v448_v18, %v435_v4  ;;  %694 = vrot.lane.b32.xlu0 %v4014_v23, %s5837_s6  ;;  %s2520_s24 = sld [smem:[#allocation2 + $0x8b]]  ;;  %s2386_s13 = sld [smem:[#allocation2 + $0xf]] }
 0x15e   :  { %v460_v20 = vpop.permute.xlu1 %459  ;;  %s2412_s30 = sld [smem:[#allocation2 + $0x28]]  ;;  %s2521_s7 = sld [smem:[#allocation2 + $0x8c]] }
 0x15f   :  { %v478_v59 = vsel %vm99_vm1, %v477_v25, %v460_v20  ;;  %647 = vrot.lane.b32.xlu1 %v4148_v40, %s5838_s4  ;;  %s2548_s6 = sld [smem:[#allocation2 + $0xa5]]  ;;  %s2575_s4 = sld [smem:[#allocation2 + $0xbe]] }
 0x160   :  { %v413_v34 = vpop.permute.xlu0 %412 }
 0x161   :  { %v421_v33 = vsel %vm109_vm6, %v420_v10, %v413_v34  ;;  %672 = vrot.lane.b32.xlu0 %v4052_v39, %s5839_s0  ;;  %v2111_v34 = vstv %s4398_s10  ;;  %s5851_s10 = smov 115   ;;  %s4608_s0 = sld [smem:[#allocation2 + $0x10]] }
 0x162   :  { %v438_v57 = vpop.permute.xlu1 %437  ;;  %v814_v12 = vmul.f32 %v813_v0, %v421_v33  ;;  %v925_v7 = vmul.f32 %v924_v56, %v421_v33  ;;  %v1183_v29 = vmul.f32 %v1182_v44, %v421_v33  ;;  %v1368_v24 = vmul.f32 %v1367_v1, %v421_v33 }
 0x163   :  { %v1553_v42 = vmul.f32 %v1552_v17, %v421_v33  ;;  %v1738_v41 = vmul.f32 %v1737_v46, %v421_v33  ;;  %v1923_v54 = vmul.f32 %v1922_v43, %v421_v33  ;;  %v2108_v21 = vmul.f32 %v2107_v11, %v421_v33  ;;  %697 = vrot.lane.b32.xlu1 %v4065_v47, %s5840_s3  ;;  %v984_v17 = vld [vmem:[%s5847_s1 + $0x40] sm:$0xff]  ;;  %v985_v46 = vld [vmem:[%s5847_s1 + $0x48] sm:$0xff]  ;;  %s5853_s3 = smov 123  }
 0x164   :  { %v4362_v5 = vadd.f32 %v814_v12, %v811_v51  ;;  %v4364_v62 = vadd.f32 %v925_v7, %v922_v53  ;;  %v4366_v16 = vadd.f32 %v1183_v29, %v1180_v58  ;;  %v4368_v18 = vadd.f32 %v1368_v24, %v1365_v26  ;;  %v463_v13 = vpop.permute.xlu0 %462  ;;  %v873_v43 = vld [vmem:[%s5847_s1] sm:$0xff]  ;;  %v874_v7 = vld [vmem:[%s5847_s1 + $0x8] sm:$0xff] }
 0x165   :  { %v4372_v25 = vadd.f32 %v1553_v42, %v1550_v60  ;;  %v4374_v45 = vadd.f32 %v1738_v41, %v1735_v30  ;;  %v4376_v10 = vadd.f32 %v1923_v54, %v1920_v36  ;;  %v4378_v4 = vadd.f32 %v2108_v21, %v2105_v49  ;;  %719 = vrot.lane.b32.xlu0 %v4089_v55, %s5841_s27  ;;  %s5855_s27 = smov 11  }
 0x166   :  { %v485_v20 = vpop.permute.xlu1 %484  ;;  %v450_v51 = vsel %vm105_vm4, %v449_v63, %v438_v57  ;;  %v479_v53 = vsel %vm101_vm2, %v478_v59, %v463_v13  ;;  %v817_v63 = vstv %s4370_s9  ;;  %v928_v59 = vstv %s4380_s29  ;;  %s4472_s9 = sld [smem:[#allocation2 + $0xc]]  ;;  %s4474_s29 = sld [smem:[#allocation2 + $0x25]] }
 0x167   :  { %722 = vrot.lane.b32.xlu1 %v4100_v32, %s5842_s2  ;;  %v1186_v56 = vstv %s4382_s5  ;;  %v1371_v44 = vstv %s4388_s22  ;;  %v1556_v1 = vstv %s4390_s17  ;;  %v3168_v57 = vmov 0.0|0.0   ;;  %s5850_s22 = smov 12   ;;  %s4483_s17 = sld [smem:[#allocation2 + $0x3e]] }
 0x168   :  { %v488_v58 = vpop.permute.xlu0 %487  ;;  %v1741_v11 = vstv %s4394_s15  ;;  %2841 = vmatprep.subr.bf16.mxu0 %v3168_v57  ;;  %2853 = vmatprep.subr.bf16.mxu1 %v3168_v57  ;;  %v2842_v12 = vpack.c.bf16 %v985_v46, %v984_v17  ;;  %v2854_v42 = vpack.c.bf16 %v874_v7, %v873_v43  ;;  %s4485_s2 = sld [smem:[#allocation2 + $0x57]]  ;;  %v878_v17 = vld [vmem:[%s5847_s1 + $0x28] sm:$0xff]  ;;  %v879_v7 = vld [vmem:[%s5847_s1 + $0x30] sm:$0xff]  ;;  %s5854_s5 = smov 3  }
 0x169   :  { %v508_v26 = vsel %vm97_vm0, %v485_v20, %v488_v58  ;;  %675 = vrot.lane.b32.xlu0 %v4126_v19, %s5843_s18  ;;  %s4493_s18 = sld [smem:[#allocation2 + $0x70]] }
 0x16a   :  { %v441_v60 = vpop.permute.xlu1 %440  ;;  %2843 = vmatpush3.bf16.msra.mxu0 %v2842_v12  ;;  %2855 = vmatpush3.bf16.msra.mxu1 %v2854_v42  ;;  %v991_v12 = vld [vmem:[%s5847_s1 + $0x78] sm:$0xff]  ;;  %v3170_v42 = vmov 0.0   ;;  %s4562_s15 = sld [smem:[#allocation2 + $0x58]] }
 0x16b   :  { %v451_v30 = vsel %vm107_vm5, %v450_v51, %v441_v60  ;;  %700 = vrot.lane.b32.xlu1 %v4137_v52, %s5844_s21  ;;  %2844 = vmatprep.subr.bf16.mxu0 %v3168_v57  ;;  %s4495_s21 = sld [smem:[#allocation2 + $0x89]] }
 0x16c   :  { %v466_v32 = vpop.permute.xlu0 %465  ;;  %2856 = vmatprep.subr.bf16.mxu1 %v3168_v57  ;;  %2686 = vmatprep.mubr.msk.f32.mxu0 %vm3169_vm7, %v3170_v42 }
 0x16d   :  { %v480_v36 = vsel %vm103_vm3, %v479_v53, %v466_v32  ;;  %725 = vrot.lane.b32.xlu0 %v4014_v23, %s5845_s8  ;;  %v1926_v23 = vstv %s4396_s26  ;;  %2705 = vmatprep.mubr.msk.f32.mxu1 %vm3169_vm7, %v3170_v42  ;;  %s4568_s26 = sld [smem:[#allocation2 + $0x71]]  ;;  %s2385_s8 = sld [smem:[#allocation2 + $0xe]] }
 0x16e   :  { %v491_v49 = vpop.permute.xlu1 %490 }
 0x16f   :  { %v509_v0 = vsel %vm99_vm1, %v508_v26, %v491_v49  ;;  %678 = vrot.lane.b32.xlu1 %v4148_v40, %s5846_s16  ;;  %s2411_s16 = sld [smem:[#allocation2 + $0x27]] }
 0x170   :  { %v444_v33 = vpop.permute.xlu0 %443 }
 0x171   :  { %v452_v29 = vsel %vm109_vm6, %v451_v30, %v444_v33  ;;  %703 = vrot.lane.b32.xlu0 %v4052_v39, %s5848_s20  ;;  %s5852_s20 = smov 20  }
 0x172   :  { %v469_v24 = vpop.permute.xlu1 %468  ;;  %v818_v41 = vmul.f32 %v817_v63, %v452_v29  ;;  %v929_v54 = vmul.f32 %v928_v59, %v452_v29  ;;  %v1187_v21 = vmul.f32 %v1186_v56, %v452_v29  ;;  %v1372_v13 = vmul.f32 %v1371_v44, %v452_v29  ;;  %v986_v63 = vld [vmem:[%s5847_s1 + $0x50] sm:$0xff] }
 0x173   :  { %v1557_v20 = vmul.f32 %v1556_v1, %v452_v29  ;;  %v1742_v51 = vmul.f32 %v1741_v11, %v452_v29  ;;  %v1927_v53 = vmul.f32 %v1926_v23, %v452_v29  ;;  %v2112_v58 = vmul.f32 %v2111_v34, %v452_v29  ;;  %728 = vrot.lane.b32.xlu1 %v4065_v47, %s5849_s19  ;;  %v987_v47 = vld [vmem:[%s5847_s1 + $0x58] sm:$0xff]  ;;  %v990_v34 = vld [vmem:[%s5847_s1 + $0x70] sm:$0xff]  ;;  %s2467_s19 = sld [smem:[#allocation2 + $0x5a]] }
 0x174   :  { %v4440_v26 = vadd.f32 %v818_v41, %v4362_v5  ;;  %v4443_v60 = vadd.f32 %v929_v54, %v4364_v62  ;;  %v4446_v30 = vadd.f32 %v1187_v21, %v4366_v16  ;;  %v4449_v32 = vadd.f32 %v1372_v13, %v4368_v18  ;;  %v494_v49 = vpop.permute.xlu0 %493  ;;  %v875_v5 = vld [vmem:[%s5847_s1 + $0x10] sm:$0xff]  ;;  %v880_v29 = vld [vmem:[%s5847_s1 + $0x38] sm:$0xff] }
 0x175   :  { %v4461_v62 = vadd.f32 %v1557_v20, %v4372_v25  ;;  %v4464_v16 = vadd.f32 %v1742_v51, %v4374_v45  ;;  %v4467_v18 = vadd.f32 %v1927_v53, %v4376_v10  ;;  %v4470_v59 = vadd.f32 %v2112_v58, %v4378_v4  ;;  %v876_v25 = vld [vmem:[%s5847_s1 + $0x18] sm:$0xff]  ;;  %706 = vrot.lane.b32.xlu0 %v4126_v19, %s5850_s22  ;;  %v988_v10 = vld [vmem:[%s5847_s1 + $0x60] sm:$0xff]  ;;  %s4556_s22 = sld [smem:[#allocation2 + $0x26]] }
 0x176   :  { %v516_v56 = vpop.permute.xlu1 %515  ;;  %v481_v44 = vsel %vm105_vm4, %v480_v36, %v469_v24  ;;  %v510_v45 = vsel %vm101_vm2, %v509_v0, %v494_v49  ;;  %v2845_v4 = vpack.c.bf16 %v987_v47, %v986_v63  ;;  %v2857_v36 = vpack.c.bf16 %v876_v25, %v875_v5  ;;  %v989_v0 = vld [vmem:[%s5847_s1 + $0x68] sm:$0xff] }
 0x177   :  { %731 = vrot.lane.b32.xlu1 %v4137_v52, %s5851_s10  ;;  %v877_v52 = vld [vmem:[%s5847_s1 + $0x20] sm:$0xff]  ;;  %v2848_v11 = vpack.c.bf16 %v989_v0, %v988_v10  ;;  %v2863_v21 = vpack.c.bf16 %v880_v29, %v879_v7  ;;  %v821_v20 = vstv %s4472_s9  ;;  %v932_v51 = vstv %s4474_s29  ;;  %s5856_s9 = smov 28   ;;  %s4554_s29 = sld [smem:[#allocation2 + $0xd]] }
 0x178   :  { %v519_v1 = vpop.permute.xlu0 %518  ;;  %2846 = vmatpush3.bf16.msra.mxu0 %v2845_v4  ;;  %2858 = vmatpush3.bf16.msra.mxu1 %v2857_v36  ;;  %v2860_v23 = vpack.c.bf16 %v878_v17, %v877_v52  ;;  %v1190_v53 = vstv %s4483_s17  ;;  %v1375_v58 = vstv %s4485_s2  ;;  %v1560_v49 = vstv %s4493_s18  ;;  %s5857_s17 = smov 19   ;;  %s4560_s2 = sld [smem:[#allocation2 + $0x3f]] }
 0x179   :  { %v539_v46 = vsel %vm97_vm0, %v516_v56, %v519_v1  ;;  %709 = vrot.lane.b32.xlu0 %v4148_v40, %s5852_s20  ;;  %2847 = vmatprep.subr.bf16.mxu0 %v3168_v57  ;;  %v1745_v63 = vstv %s4495_s21  ;;  %v1930_v47 = vstv %s4501_s28  ;;  %v2115_v5 = vstv %s4503_s23  ;;  %s4570_s10 = sld [smem:[#allocation2 + $0x8a]]  ;;  %s2546_s18 = sld [smem:[#allocation2 + $0xa3]] }
 0x17a   :  { %v472_v43 = vpop.permute.xlu1 %471  ;;  %2859 = vmatprep.subr.bf16.mxu1 %v3168_v57  ;;  %s2573_s21 = sld [smem:[#allocation2 + $0xbc]]  ;;  %s2439_s28 = sld [smem:[#allocation2 + $0x40]] }
 0x17b   :  { %v482_v33 = vsel %vm107_vm5, %v481_v44, %v472_v43  ;;  %734 = vrot.lane.b32.xlu1 %v4052_v39, %s5853_s3  ;;  %v2851_v39 = vpack.c.bf16 %v991_v12, %v990_v34  ;;  %s2466_s23 = sld [smem:[#allocation2 + $0x59]] }
 0x17c   :  { %v497_v24 = vpop.permute.xlu0 %496  ;;  %2849 = vmatpush3.bf16.msra.mxu0 %v2848_v11  ;;  %2861 = vmatpush3.bf16.msra.mxu1 %v2860_v23  ;;  %s2440_s20 = sld [smem:[#allocation2 + $0x41]] }
 0x17d   :  { %v511_v41 = vsel %vm103_vm3, %v510_v45, %v497_v24  ;;  %737 = vrot.lane.b32.xlu0 %v4126_v19, %s5854_s5  ;;  %2850 = vmatprep.subr.bf16.mxu0 %v3168_v57  ;;  %v825_v7 = vstv %s4554_s29  ;;  %s4610_s3 = sld [smem:[#allocation2 + $0x29]]  ;;  %s4613_s5 = sld [smem:[#allocation2 + $0x42]] }
 0x17e   :  { %v522_v54 = vpop.permute.xlu1 %521  ;;  %2862 = vmatprep.subr.bf16.mxu1 %v3168_v57  ;;  %s4619_s29 = sld [smem:[#allocation2 + $0x8d]] }
 0x17f   :  { %v540_v13 = vsel %vm99_vm1, %v539_v46, %v522_v54  ;;  %740 = vrot.lane.b32.xlu1 %v4148_v40, %s5855_s27  ;;  %v1194_v54 = vstv %s4560_s2  ;;  %s4615_s27 = sld [smem:[#allocation2 + $0x5b]]  ;;  %s4687_s2 = sld [smem:[#allocation2 + $0x11]] }
 0x180   :  { %v475_v56 = vpop.permute.xlu0 %474  ;;  %2852 = vmatpush3.bf16.msra.mxu0 %v2851_v39  ;;  %2864 = vmatpush3.bf16.msra.mxu1 %v2863_v21  ;;  %v1379_v39 = vstv %s4562_s15  ;;  %v1564_v21 = vstv %s4568_s26  ;;  %s4689_s15 = sld [smem:[#allocation2 + $0x2a]]  ;;  %s4694_s26 = sld [smem:[#allocation2 + $0x43]] }
 0x181   :  { %v483_v25 = vsel %vm109_vm6, %v482_v33, %v475_v56  ;;  %750 = vrot.lane.b32.xlu0 %v4148_v40, %s5856_s9  ;;  %2865 = vmatprep.subr.bf16.mxu0 %v3168_v57  ;;  %s4617_s9 = sld [smem:[#allocation2 + $0x74]] }
 0x182   :  { %v500_v44 = vpop.permute.xlu1 %499  ;;  %v822_v19 = vmul.f32 %v821_v20, %v483_v25  ;;  %v933_v45 = vmul.f32 %v932_v51, %v483_v25  ;;  %v1191_v10 = vmul.f32 %v1190_v53, %v483_v25  ;;  %v1376_v4 = vmul.f32 %v1375_v58, %v483_v25  ;;  %2877 = vmatprep.subr.bf16.mxu1 %v3168_v57 }
 0x183   :  { %v1561_v36 = vmul.f32 %v1560_v49, %v483_v25  ;;  %v1746_v0 = vmul.f32 %v1745_v63, %v483_v25  ;;  %v1931_v1 = vmul.f32 %v1930_v47, %v483_v25  ;;  %v2116_v52 = vmul.f32 %v2115_v5, %v483_v25  ;;  %760 = vrot.lane.b32.xlu1 %v4148_v40, %s5857_s17  ;;  %s4623_s17 = sld [smem:[#allocation2 + $0xbf]] }
 0x184   :  { %v823_v17 = vadd.f32 %v822_v19, %v4440_v26  ;;  %v934_v46 = vadd.f32 %v933_v45, %v4443_v60  ;;  %v1192_v43 = vadd.f32 %v1191_v10, %v4446_v30  ;;  %v1377_v11 = vadd.f32 %v1376_v4, %v4449_v32  ;;  %v525_v23 = vpop.permute.xlu0 %524 }
 0x185   :  { %v1562_v40 = vadd.f32 %v1561_v36, %v4461_v62  ;;  %v1747_v34 = vadd.f32 %v1746_v0, %v4464_v16  ;;  %v1932_v26 = vadd.f32 %v1931_v1, %v4467_v18  ;;  %v2117_v60 = vadd.f32 %v2116_v52, %v4470_v59 }
 0x186   :  { %v547_v30 = vpop.permute.xlu1 %546  ;;  %v512_v32 = vsel %vm105_vm4, %v511_v41, %v500_v44  ;;  %v541_v33 = vsel %vm101_vm2, %v540_v13, %v525_v23  ;;  %v936_v59 = vstv %s4556_s22  ;;  %v1749_v41 = vstv %s4570_s10  ;;  %s4621_s22 = sld [smem:[#allocation2 + $0xa6]]  ;;  %s4696_s10 = sld [smem:[#allocation2 + $0x5c]] }
 0x187   :  { %v568_v29 = vsel %vm97_vm0, %v4089_v55, %v547_v30  ;;  %v1934_v51 = vstv %s2546_s18  ;;  %v2119_v13 = vstv %s2573_s21  ;;  %s4702_s18 = sld [smem:[#allocation2 + $0x12]]  ;;  %s4704_s21 = sld [smem:[#allocation2 + $0x2b]] }
 0x188   :  { %v503_v62 = vpop.permute.xlu0 %502 }
 0x189   :  { %v513_v16 = vsel %vm107_vm5, %v512_v32, %v503_v62 }
 0x18a   :  { %v528_v12 = vpop.permute.xlu1 %527 }
 0x18b   :  { %v542_v18 = vsel %vm103_vm3, %v541_v33, %v528_v12  ;;  %v1198_v12 = vstv %s2439_s28  ;;  %s4721_s28 = sld [smem:[#allocation2 + $0x13]] }
 0x18c   :  { %v550_v24 = vpop.permute.xlu0 %549 }
 0x18d   :  { %v569_v20 = vsel %vm99_vm1, %v568_v29, %v550_v24  ;;  %v1753_v29 = vstv %s2520_s24  ;;  %v1938_v24 = vstv %s2547_s25  ;;  %s4738_s24 = sld [smem:[#allocation2 + $0x5e]]  ;;  %s4752_s25 = sld [smem:[#allocation2 + $0x14]] }
 0x18e   :  { %v506_v53 = vpop.permute.xlu1 %505 }
 0x18f   :  { %v514_v58 = vsel %vm109_vm6, %v513_v16, %v506_v53  ;;  %v940_v16 = vstv %s2411_s16  ;;  %s4715_s16 = sld [smem:[#allocation2 + $0x5d]] }
 0x190   :  { %v826_v49 = vmul.f32 %v825_v7, %v514_v58  ;;  %v937_v63 = vmul.f32 %v936_v59, %v514_v58  ;;  %v1195_v47 = vmul.f32 %v1194_v54, %v514_v58  ;;  %v1380_v5 = vmul.f32 %v1379_v39, %v514_v58  ;;  %v531_v19 = vpop.permute.xlu0 %530 }
 0x191   :  { %v1565_v56 = vmul.f32 %v1564_v21, %v514_v58  ;;  %v1750_v25 = vmul.f32 %v1749_v41, %v514_v58  ;;  %v1935_v44 = vmul.f32 %v1934_v51, %v514_v58  ;;  %v2120_v55 = vmul.f32 %v2119_v13, %v514_v58 }
 0x192   :  { %v827_v45 = vadd.f32 %v826_v49, %v823_v17  ;;  %v938_v10 = vadd.f32 %v937_v63, %v934_v46  ;;  %v1196_v4 = vadd.f32 %v1195_v47, %v1192_v43  ;;  %v1381_v36 = vadd.f32 %v1380_v5, %v1377_v11  ;;  %v553_v0 = vpop.permute.xlu1 %552 }
 0x193   :  { %v1566_v1 = vadd.f32 %v1565_v56, %v1562_v40  ;;  %v1751_v52 = vadd.f32 %v1750_v25, %v1747_v34  ;;  %v1936_v23 = vadd.f32 %v1935_v44, %v1932_v26  ;;  %v2121_v30 = vadd.f32 %v2120_v55, %v2117_v60 }
 0x194   :  { %v543_v32 = vsel %vm105_vm4, %v542_v18, %v531_v19  ;;  %v570_v33 = vsel %vm101_vm2, %v569_v20, %v553_v0  ;;  %v576_v62 = vpop.permute.xlu0 %575  ;;  %v829_v26 = vstv %s2385_s8  ;;  %v1383_v18 = vstv %s2466_s23  ;;  %s4713_s8 = sld [smem:[#allocation2 + $0x44]] }
 0x195   :  { %v1568_v7 = vstv %s2493_s12  ;;  %v2123_v54 = vstv %s2574_s11  ;;  %s4723_s23 = sld [smem:[#allocation2 + $0x2c]]  ;;  %s4736_s12 = sld [smem:[#allocation2 + $0x45]] }
 0x196   :  { %v579_v17 = vpop.permute.xlu1 %578  ;;  %s4754_s11 = sld [smem:[#allocation2 + $0x2d]] }
 0x197   :  { %v599_v46 = vsel %vm97_vm0, %v576_v62, %v579_v17 }
 0x198   :  { %v534_v43 = vpop.permute.xlu0 %533 }
 0x199   :  { %v544_v11 = vsel %vm107_vm5, %v543_v32, %v534_v43  ;;  %v1572_v43 = vstv %s2494_s14  ;;  %s4806_s14 = sld [smem:[#allocation2 + $0x2e]] }
 0x19a   :  { %v556_v40 = vpop.permute.xlu1 %555 }
 0x19b   :  { %v571_v34 = vsel %vm103_vm3, %v570_v33, %v556_v40  ;;  %v1757_v40 = vstv %s2521_s7  ;;  %s4825_s7 = sld [smem:[#allocation2 + $0x15]] }
 0x19c   :  { %v582_v60 = vpop.permute.xlu0 %581 }
 0x19d   :  { %v600_v59 = vsel %vm99_vm1, %v599_v46, %v582_v60 }
 0x19e   :  { %v537_v39 = vpop.permute.xlu1 %536 }
 0x19f   :  { %v545_v21 = vsel %vm109_vm6, %v544_v11, %v537_v39 }
 0x1a0   :  { %v830_v20 = vmul.f32 %v829_v26, %v545_v21  ;;  %v941_v41 = vmul.f32 %v940_v16, %v545_v21  ;;  %v1199_v51 = vmul.f32 %v1198_v12, %v545_v21  ;;  %v1384_v13 = vmul.f32 %v1383_v18, %v545_v21  ;;  %v559_v47 = vpop.permute.xlu0 %558 }
 0x1a1   :  { %v1569_v53 = vmul.f32 %v1568_v7, %v545_v21  ;;  %v1754_v58 = vmul.f32 %v1753_v29, %v545_v21  ;;  %v1939_v49 = vmul.f32 %v1938_v24, %v545_v21  ;;  %v2124_v63 = vmul.f32 %v2123_v54, %v545_v21 }
 0x1a2   :  { %v831_v5 = vadd.f32 %v830_v20, %v827_v45  ;;  %v942_v56 = vadd.f32 %v941_v41, %v938_v10  ;;  %v1200_v25 = vadd.f32 %v1199_v51, %v1196_v4  ;;  %v1385_v44 = vadd.f32 %v1384_v13, %v1381_v36  ;;  %v585_v55 = vpop.permute.xlu1 %584 }
 0x1a3   :  { %v1570_v19 = vadd.f32 %v1569_v53, %v1566_v1  ;;  %v1755_v0 = vadd.f32 %v1754_v58, %v1751_v52  ;;  %v1940_v32 = vadd.f32 %v1939_v49, %v1936_v23  ;;  %v2125_v33 = vadd.f32 %v2124_v63, %v2121_v30 }
 0x1a4   :  { %v572_v62 = vsel %vm105_vm4, %v571_v34, %v559_v47  ;;  %v601_v17 = vsel %vm101_vm2, %v600_v59, %v585_v55  ;;  %v4601_v46 = vpop.permute.xlu0 %606  ;;  %v833_v36 = vstv %s2386_s13  ;;  %v944_v52 = vstv %s2412_s30  ;;  %s4764_s13 = sld [smem:[#allocation2 + $0x46]]  ;;  %s4766_s30 = sld [smem:[#allocation2 + $0x5f]] }
 0x1a5   :  { %v1202_v23 = vstv %s2440_s20  ;;  %v1387_v30 = vstv %s2467_s19  ;;  %v1942_v34 = vstv %s2548_s6  ;;  %v2127_v26 = vstv %s2575_s4  ;;  %s4776_s20 = sld [smem:[#allocation2 + $0x47]]  ;;  %s4800_s19 = sld [smem:[#allocation2 + $0x60]] }
 0x1a6   :  { %v4603_v45 = vpop.permute.xlu1 %609  ;;  %s4842_s6 = sld [smem:[#allocation2 + $0x48]]  ;;  %s4844_s4 = sld [smem:[#allocation2 + $0x2f]] }
 0x1a8   :  { %v562_v10 = vpop.permute.xlu0 %561 }
 0x1a9   :  { %v573_v11 = vsel %vm107_vm5, %v572_v62, %v562_v10 }
 0x1aa   :  { %v588_v4 = vpop.permute.xlu1 %587 }
 0x1ab   :  { %v602_v10 = vsel %vm103_vm3, %v601_v17, %v588_v4 }
 0x1ac   :  { %v4605_v1 = vpop.permute.xlu0 %612 }
 0x1ae   :  { %v566_v60 = vpop.permute.xlu1 %565 }
 0x1af   :  { %v574_v16 = vsel %vm109_vm6, %v573_v11, %v566_v60 }
 0x1b0   :  { %v834_v12 = vmul.f32 %v833_v36, %v574_v16  ;;  %v945_v18 = vmul.f32 %v944_v52, %v574_v16  ;;  %v1203_v7 = vmul.f32 %v1202_v23, %v574_v16  ;;  %v1388_v59 = vmul.f32 %v1387_v30, %v574_v16  ;;  %v591_v21 = vpop.permute.xlu0 %590 }
 0x1b1   :  { %v1573_v29 = vmul.f32 %v1572_v43, %v574_v16  ;;  %v1758_v24 = vmul.f32 %v1757_v40, %v574_v16  ;;  %v1943_v54 = vmul.f32 %v1942_v34, %v574_v16  ;;  %v2128_v39 = vmul.f32 %v2127_v26, %v574_v16 }
 0x1b2   :  { %v835_v20 = vadd.f32 %v834_v12, %v831_v5  ;;  %v946_v41 = vadd.f32 %v945_v18, %v942_v56  ;;  %v1204_v51 = vadd.f32 %v1203_v7, %v1200_v25  ;;  %v1389_v13 = vadd.f32 %v1388_v59, %v1385_v44  ;;  %v4625_v53 = vpop.permute.xlu1 %615 }
 0x1b3   :  { %v1574_v58 = vadd.f32 %v1573_v29, %v1570_v19  ;;  %v1759_v49 = vadd.f32 %v1758_v24, %v1755_v0  ;;  %v1944_v63 = vadd.f32 %v1943_v54, %v1940_v32  ;;  %v2129_v47 = vadd.f32 %v2128_v39, %v2125_v33 }
 0x1b4   :  { %v594_v55 = vpop.permute.xlu0 %593  ;;  %v837_v5 = vstv %s4608_s0  ;;  %v948_v36 = vstv %s4610_s3  ;;  %v603_v56 = vsel %vm105_vm4, %v602_v10, %v591_v21  ;;  %v1206_v25 = vstv %s4613_s5  ;;  %s4861_s0 = sld [smem:[#allocation2 + $0x30]]  ;;  %s4863_s3 = sld [smem:[#allocation2 + $0x16]] }
 0x1b5   :  { %v1391_v44 = vstv %s4615_s27  ;;  %v1576_v52 = vstv %s4617_s9  ;;  %v604_v23 = vsel %vm107_vm5, %v603_v56, %v594_v55  ;;  %v1761_v30 = vstv %s4619_s29  ;;  %s4871_s5 = sld [smem:[#allocation2 + $0x31]]  ;;  %s4879_s27 = sld [smem:[#allocation2 + $0x17]] }
 0x1b6   :  { %v4627_v62 = vpop.permute.xlu1 %618  ;;  %v1946_v19 = vstv %s4621_s22  ;;  %v2131_v43 = vstv %s4623_s17  ;;  %s4881_s9 = sld [smem:[#allocation2 + $0x18]]  ;;  %s4900_s29 = sld [smem:[#allocation2 + $0x61]] }
 0x1b7   :  { %s4937_s22 = sld [smem:[#allocation2 + $0x49]]  ;;  %s4944_s17 = sld [smem:[#allocation2 + $0x62]] }
 0x1b8   :  { %v597_v0 = vpop.permute.xlu0 %596 }
 0x1b9   :  { %v605_v32 = vsel %vm109_vm6, %v604_v23, %v597_v0  ;;  %v5861_v0 = vld [vmem:[#allocation15_spill] sm:$0xff] }
 0x1ba   :  { %v4641_v33 = vpop.permute.xlu1 %621  ;;  %v838_v11 = vmul.f32 %v837_v5, %v605_v32  ;;  %v949_v40 = vmul.f32 %v948_v36, %v605_v32  ;;  %v1207_v17 = vmul.f32 %v1206_v25, %v605_v32  ;;  %v1392_v4 = vmul.f32 %v1391_v44, %v605_v32  ;;  %v5858_v25 = vld [vmem:[#allocation12_spill] sm:$0xff]  ;;  %v5859_v44 = vld [vmem:[#allocation11_spill] sm:$0xff] }
 0x1bb   :  { %v1577_v34 = vmul.f32 %v1576_v52, %v605_v32  ;;  %v1762_v26 = vmul.f32 %v1761_v30, %v605_v32  ;;  %v1947_v60 = vmul.f32 %v1946_v19, %v605_v32  ;;  %v2132_v16 = vmul.f32 %v2131_v43, %v605_v32  ;;  %v5860_v30 = vld [vmem:[#allocation13_spill] sm:$0xff] }
 0x1bc   :  { %v4643_v12 = vadd.f32 %v838_v11, %v835_v20  ;;  %v4645_v18 = vadd.f32 %v949_v40, %v946_v41  ;;  %v4647_v7 = vadd.f32 %v1207_v17, %v1204_v51  ;;  %v4649_v59 = vadd.f32 %v1392_v4, %v1389_v13  ;;  %v4651_v29 = vpop.permute.xlu0 %624  ;;  %v5862_v11 = vld [vmem:[#allocation16_spill] sm:$0xff]  ;;  %v5863_v40 = vld [vmem:[#allocation14_spill] sm:$0xff]  ;;  %v5864_v4 = vld [vmem:[#allocation17_spill] sm:$0xff] }
 0x1bd   :  { %v4653_v24 = vadd.f32 %v1577_v34, %v1574_v58  ;;  %v4655_v54 = vadd.f32 %v1762_v26, %v1759_v49  ;;  %v4657_v39 = vadd.f32 %v1947_v60, %v1944_v63  ;;  %v4659_v21 = vadd.f32 %v2132_v16, %v2129_v47  ;;  %v5865_v26 = vld [vmem:[#allocation18_spill] sm:$0xff]  ;;  %v5866_v16 = vld [vmem:[#allocation19_spill] sm:$0xff] }
 0x1be   :  { %v4661_v55 = vpop.permute.xlu1 %627  ;;  %v640_v52 = vsel %vm97_vm0, %v5859_v44, %v5858_v25  ;;  %v650_v17 = vsel %vm97_vm0, %v5863_v40, %v5862_v11  ;;  %v753_v44 = vsel %vm97_vm0, %v3583_v50, %v5741_v48 }
 0x1bf   :  { %v641_v19 = vsel %vm99_vm1, %v640_v52, %v5860_v30  ;;  %v651_v60 = vsel %vm99_vm1, %v650_v17, %v5865_v26  ;;  %v763_v52 = vsel %vm97_vm0, %v5746_v8, %v5751_v9  ;;  %v630_v30 = vsel %vm97_vm0, %v4601_v46, %v4603_v45  ;;  %v5867_v46 = vld [vmem:[#allocation20_spill] sm:$0xff] }
 0x1c0   :  { %v4663_v20 = vpop.permute.xlu0 %657  ;;  %v642_v32 = vsel %vm101_vm2, %v641_v19, %v5861_v0  ;;  %v652_v0 = vsel %vm101_vm2, %v651_v60, %v3451_v28  ;;  %v754_v50 = vsel %vm99_vm1, %v753_v44, %v3654_v61  ;;  %v764_v48 = vsel %vm99_vm1, %v763_v52, %v5774_v27 }
 0x1c1   :  { %v643_v34 = vsel %vm103_vm3, %v642_v32, %v5864_v4  ;;  %v631_v8 = vsel %vm99_vm1, %v630_v30, %v4605_v1  ;;  %v755_v28 = vsel %vm101_vm2, %v754_v50, %v5749_v3  ;;  %v765_v61 = vsel %vm101_vm2, %v764_v48, %v5778_v2 }
 0x1c2   :  { %v4665_v41 = vpop.permute.xlu1 %660  ;;  %v644_v25 = vsel %vm105_vm4, %v643_v34, %v5866_v16  ;;  %v632_v27 = vsel %vm101_vm2, %v631_v8, %v4625_v53  ;;  %v653_v1 = vsel %vm103_vm3, %v652_v0, %v3461_v31  ;;  %v756_v32 = vsel %vm103_vm3, %v755_v28, %v5756_v37 }
 0x1c3   :  { %v645_v45 = vsel %vm107_vm5, %v644_v25, %v5867_v46  ;;  %v766_v3 = vsel %vm103_vm3, %v765_v61, %v3930_v14  ;;  %v633_v2 = vsel %vm103_vm3, %v632_v27, %v4627_v62  ;;  %v654_v53 = vsel %vm105_vm4, %v653_v1, %v3475_v35 }
 0x1c4   :  { %v4667_v51 = vpop.permute.xlu0 %663  ;;  %v757_v31 = vsel %vm105_vm4, %v756_v32, %v5764_v15  ;;  %v767_v37 = vsel %vm105_vm4, %v766_v3, %v3994_v6  ;;  %v634_v14 = vsel %vm105_vm4, %v633_v2, %v4641_v33  ;;  %v655_v11 = vsel %vm107_vm5, %v654_v53, %v3487_v38  ;;  %v5868_v15 = vld [vmem:[#allocation95_spill] sm:$0xff] }
 0x1c5   :  { %v4792_v35 = vsel %vm107_vm5, %v757_v31, %v3928_v22  ;;  %v4796_v40 = vsel %vm107_vm5, %v767_v37, %v5868_v15  ;;  %v635_v6 = vsel %vm107_vm5, %v634_v14, %v4651_v29  ;;  %v841_v17 = vstv %s4687_s2  ;;  %s4946_s2 = sld [smem:[#allocation2 + $0x75]] }
 0x1c6   :  { %v4669_v13 = vpop.permute.xlu1 %637  ;;  %v952_v38 = vstv %s4689_s15  ;;  %v1210_v4 = vstv %s4694_s26  ;;  %v1395_v22 = vstv %s4696_s10  ;;  %v845_v34 = vstv %s4702_s18  ;;  %s4954_s15 = sld [smem:[#allocation2 + $0x8e]]  ;;  %s5115_s18 = sld [smem:[#allocation2 + $0xaa]] }
 0x1c7   :  { %v956_v26 = vstv %s4704_s21  ;;  %v1214_v60 = vstv %s4713_s8  ;;  %v1399_v16 = vstv %s4715_s16  ;;  %v4814_v29 = vsel %vm109_vm6, %v635_v6, %v4661_v55  ;;  %s4956_s26 = sld [smem:[#allocation2 + $0x76]]  ;;  %s4968_s16 = sld [smem:[#allocation2 + $0x8f]] }
 0x1c8   :  { %v4671_v10 = vpop.permute.xlu0 %666  ;;  %v849_v25 = vstv %s4721_s28  ;;  %v960_v44 = vstv %s4723_s23  ;;  %v1218_v52 = vstv %s4736_s12  ;;  %v681_v0 = vsel %vm97_vm0, %v4663_v20, %v4665_v41  ;;  %s4970_s28 = sld [smem:[#allocation2 + $0x77]]  ;;  %s5122_s21 = sld [smem:[#allocation2 + $0x7c]] }
 0x1c9   :  { %v1403_v50 = vstv %s4738_s24  ;;  %v853_v48 = vstv %s4752_s25  ;;  %v964_v8 = vstv %s4754_s11  ;;  %v682_v28 = vsel %vm99_vm1, %v681_v0, %v4667_v51  ;;  %s4982_s11 = sld [smem:[#allocation2 + $0x90]]  ;;  %s5132_s24 = sld [smem:[#allocation2 + $0x95]] }
 0x1ca   :  { %v4673_v58 = vpop.permute.xlu1 %688  ;;  %v4831_v55 = vsel %vm109_vm6, %v645_v45, %v4669_v13  ;;  %v1222_v61 = vstv %s4764_s13  ;;  %v1407_v27 = vstv %s4766_s30  ;;  %v953_v1 = vmul.f32 %v952_v38, %v4814_v29  ;;  %s4984_s13 = sld [smem:[#allocation2 + $0x78]]  ;;  %s4989_s30 = sld [smem:[#allocation2 + $0x91]] }
 0x1cb   :  { %v683_v20 = vsel %vm101_vm2, %v682_v28, %v4671_v10  ;;  %v1226_v32 = vstv %s4776_s20  ;;  %v842_v51 = vmul.f32 %v841_v17, %v4814_v29  ;;  %v1411_v31 = vstv %s4800_s19  ;;  %s5089_s19 = sld [smem:[#allocation2 + $0xa8]]  ;;  %s5150_s20 = sld [smem:[#allocation2 + $0xc4]] }
 0x1cc   :  { %v4675_v49 = vpop.permute.xlu0 %691  ;;  %v968_v37 = vstv %s4806_s14  ;;  %v972_v0 = vstv %s4844_s4  ;;  %s4994_s14 = sld [smem:[#allocation2 + $0x4a]]  ;;  %s5082_s4 = sld [smem:[#allocation2 + $0xa7]] }
 0x1cd   :  { %v712_v41 = vsel %vm97_vm0, %v4673_v58, %v4675_v49  ;;  %v957_v58 = vmul.f32 %v956_v26, %v4831_v55  ;;  %s5208_s23 = sld [smem:[#allocation2 + $0xc6]] }
 0x1ce   :  { %v4677_v63 = vpop.permute.xlu1 %669 }
 0x1cf   :  { %v684_v13 = vsel %vm103_vm3, %v683_v20, %v4677_v63  ;;  %v846_v63 = vmul.f32 %v845_v34, %v4831_v55  ;;  %v1211_v20 = vmul.f32 %v1210_v4, %v4814_v29  ;;  %v865_v4 = vstv %s4879_s27  ;;  %s5100_s27 = sld [smem:[#allocation2 + $0xc1]] }
 0x1d0   :  { %v4679_v47 = vpop.permute.xlu0 %694 }
 0x1d1   :  { %v713_v45 = vsel %vm99_vm1, %v712_v41, %v4679_v47 }
 0x1d2   :  { %v4681_v5 = vpop.permute.xlu1 %647 }
 0x1d3   :  { %v4853_v10 = vsel %vm109_vm6, %v655_v11, %v4681_v5 }
 0x1d4   :  { %v4683_v36 = vpop.permute.xlu0 %672 }
 0x1d5   :  { %v685_v49 = vsel %vm105_vm4, %v684_v13, %v4683_v36  ;;  %v954_v36 = vadd.f32 %v953_v1, %v4645_v18  ;;  %v976_v13 = vstv %s4861_s0  ;;  %s5005_s0 = sld [smem:[#allocation2 + $0x63]] }
 0x1d6   :  { %v4685_v56 = vpop.permute.xlu1 %697 }
 0x1d7   :  { %v714_v2 = vsel %vm101_vm2, %v713_v45, %v4685_v56  ;;  %v961_v56 = vmul.f32 %v960_v44, %v4853_v10  ;;  %v861_v45 = vstv %s4863_s3  ;;  %s5007_s3 = sld [smem:[#allocation2 + $0x79]] }
 0x1d8   :  { %v4698_v23 = vpop.permute.xlu0 %719 }
 0x1da   :  { %v4706_v43 = vpop.permute.xlu1 %722 }
 0x1db   :  { %v743_v18 = vsel %vm97_vm0, %v4698_v23, %v4706_v43 }
 0x1dc   :  { %v4740_v19 = vpop.permute.xlu0 %675 }
 0x1dd   :  { %v686_v47 = vsel %vm107_vm5, %v685_v49, %v4740_v19  ;;  %v843_v19 = vadd.f32 %v842_v51, %v4643_v12  ;;  %v857_v12 = vstv %s4825_s7  ;;  %v980_v49 = vstv %s4871_s5  ;;  %s5080_s7 = sld [smem:[#allocation2 + $0x94]] }
 0x1de   :  { %v4750_v9 = vpop.permute.xlu1 %700 }
 0x1df   :  { %v715_v5 = vsel %vm103_vm3, %v714_v2, %v4750_v9  ;;  %v850_v9 = vmul.f32 %v849_v25, %v4853_v10  ;;  %v847_v26 = vadd.f32 %v846_v63, %v843_v19  ;;  %v1215_v63 = vmul.f32 %v1214_v60, %v4831_v55 }
 0x1e0   :  { %v4786_v62 = vpop.permute.xlu0 %725  ;;  %v1212_v19 = vadd.f32 %v1211_v20, %v4647_v7 }
 0x1e1   :  { %v744_v17 = vsel %vm99_vm1, %v743_v18, %v4786_v62  ;;  %v851_v1 = vadd.f32 %v850_v9, %v847_v26  ;;  %v1400_v9 = vmul.f32 %v1399_v16, %v4831_v55  ;;  %v1404_v16 = vmul.f32 %v1403_v50, %v4853_v10  ;;  %v1243_v50 = vld [vmem:[%s5847_s1 + $0x88] sm:$0xff] }
 0x1e2   :  { %v679_v33 = vpop.permute.xlu1 %678 }
 0x1e3   :  { %v4876_v14 = vsel %vm109_vm6, %v686_v47, %v679_v33  ;;  %v958_v33 = vadd.f32 %v957_v58, %v954_v36  ;;  %v869_v47 = vstv %s4881_s9  ;;  %s5102_s9 = sld [smem:[#allocation2 + $0xa9]] }
 0x1e4   :  { %v704_v30 = vpop.permute.xlu0 %703  ;;  %v854_v25 = vmul.f32 %v853_v48, %v4876_v14  ;;  %v965_v23 = vmul.f32 %v964_v8, %v4876_v14 }
 0x1e5   :  { %v716_v11 = vsel %vm105_vm4, %v715_v5, %v704_v30  ;;  %v1230_v30 = vstv %s4842_s6  ;;  %v962_v62 = vadd.f32 %v961_v56, %v958_v33 }
 0x1e6   :  { %v729_v46 = vpop.permute.xlu1 %728  ;;  %v855_v2 = vadd.f32 %v854_v25, %v851_v1 }
 0x1e7   :  { %v745_v43 = vsel %vm101_vm2, %v744_v17, %v729_v46  ;;  %v966_v58 = vadd.f32 %v965_v23, %v962_v62  ;;  %v1428_v62 = vld [vmem:[%s5847_s1 + $0xc8] sm:$0xff] }
 0x1e8   :  { %v707_v3 = vpop.permute.xlu0 %706 }
 0x1e9   :  { %v717_v15 = vsel %vm107_vm5, %v716_v11, %v707_v3 }
 0x1ea   :  { %v732_v53 = vpop.permute.xlu1 %731 }
 0x1eb   :  { %v746_v44 = vsel %vm103_vm3, %v745_v43, %v732_v53  ;;  %v1396_v53 = vmul.f32 %v1395_v22, %v4814_v29  ;;  %v1219_v22 = vmul.f32 %v1218_v52, %v4853_v10  ;;  %v1415_v52 = vstv %s4900_s29  ;;  %s5022_s29 = sld [smem:[#allocation2 + $0x92]] }
 0x1ec   :  { %v710_v6 = vpop.permute.xlu0 %709 }
 0x1ed   :  { %v4892_v38 = vsel %vm109_vm6, %v717_v15, %v710_v6 }
 0x1ee   :  { %v735_v34 = vpop.permute.xlu1 %734  ;;  %v969_v8 = vmul.f32 %v968_v37, %v4892_v38  ;;  %v858_v46 = vmul.f32 %v857_v12, %v4892_v38 }
 0x1ef   :  { %v747_v28 = vsel %vm105_vm4, %v746_v44, %v735_v34  ;;  %v1223_v34 = vmul.f32 %v1222_v61, %v4876_v14  ;;  %v1408_v61 = vmul.f32 %v1407_v27, %v4876_v14  ;;  %v1427_v44 = vld [vmem:[%s5847_s1 + $0xc0] sm:$0xff]  ;;  %v1227_v27 = vmul.f32 %v1226_v32, %v4892_v38 }
 0x1f0   :  { %v738_v48 = vpop.permute.xlu0 %737  ;;  %v970_v37 = vadd.f32 %v969_v8, %v966_v58  ;;  %v859_v56 = vadd.f32 %v858_v46, %v855_v2  ;;  %v1412_v8 = vmul.f32 %v1411_v31, %v4892_v38  ;;  %v1245_v31 = vld [vmem:[%s5847_s1 + $0x98] sm:$0xff] }
 0x1f1   :  { %v748_v41 = vsel %vm107_vm5, %v747_v28, %v738_v48  ;;  %v1430_v2 = vld [vmem:[%s5847_s1 + $0xd8] sm:$0xff] }
 0x1f2   :  { %v741_v51 = vpop.permute.xlu1 %740 }
 0x1f3   :  { %v4913_v3 = vsel %vm109_vm6, %v748_v41, %v741_v51  ;;  %v2878_v51 = vpack.c.bf16 %v1428_v62, %v1427_v44  ;;  %v1434_v44 = vld [vmem:[%s5847_s1 + $0xf8] sm:$0xff] }
 0x1f4   :  { %v751_v5 = vpop.permute.xlu0 %750  ;;  %v973_v36 = vmul.f32 %v972_v0, %v4913_v3  ;;  %v862_v11 = vmul.f32 %v861_v45, %v4913_v3  ;;  %v1231_v41 = vmul.f32 %v1230_v30, %v4913_v3  ;;  %v1416_v58 = vmul.f32 %v1415_v52, %v4913_v3 }
 0x1f5   :  { %v4935_v60 = vsel %vm109_vm6, %v4792_v35, %v751_v5  ;;  %v1397_v35 = vadd.f32 %v1396_v53, %v4649_v59  ;;  %v1242_v59 = vld [vmem:[%s5847_s1 + $0x80] sm:$0xff]  ;;  %v1234_v53 = vstv %s4937_s22  ;;  %v1769_v52 = vstv %s4968_s16  ;;  %s5134_s16 = sld [smem:[#allocation2 + $0xab]] }
 0x1f6   :  { %v761_v18 = vpop.permute.xlu1 %760  ;;  %v974_v6 = vadd.f32 %v973_v36, %v970_v37  ;;  %v977_v7 = vmul.f32 %v976_v13, %v4935_v60  ;;  %v863_v33 = vadd.f32 %v862_v11, %v859_v56  ;;  %v866_v17 = vmul.f32 %v865_v4, %v4935_v60  ;;  %v1244_v13 = vld [vmem:[%s5847_s1 + $0x90] sm:$0xff]  ;;  %v1246_v11 = vld [vmem:[%s5847_s1 + $0xa0] sm:$0xff] }
 0x1f7   :  { %v4941_v15 = vsel %vm109_vm6, %v4796_v40, %v761_v18  ;;  %v1216_v40 = vadd.f32 %v1215_v63, %v1212_v19  ;;  %v1401_v25 = vadd.f32 %v1400_v9, %v1397_v35  ;;  %v2866_v46 = vpack.c.bf16 %v1243_v50, %v1242_v59  ;;  %v1247_v19 = vld [vmem:[%s5847_s1 + $0xa8] sm:$0xff]  ;;  %v1248_v59 = vld [vmem:[%s5847_s1 + $0xb0] sm:$0xff]  ;;  %v1249_v50 = vld [vmem:[%s5847_s1 + $0xb8] sm:$0xff] }
 0x1f8   :  { %v978_v12 = vadd.f32 %v977_v7, %v974_v6  ;;  %v981_v26 = vmul.f32 %v980_v49, %v4941_v15  ;;  %v867_v23 = vadd.f32 %v866_v17, %v863_v33  ;;  %v870_v43 = vmul.f32 %v869_v47, %v4941_v15  ;;  %v1429_v49 = vld [vmem:[%s5847_s1 + $0xd0] sm:$0xff]  ;;  %v1431_v6 = vld [vmem:[%s5847_s1 + $0xe0] sm:$0xff]  ;;  %v1432_v7 = vld [vmem:[%s5847_s1 + $0xe8] sm:$0xff] }
 0x1f9   :  { %v1220_v0 = vadd.f32 %v1219_v22, %v1216_v40  ;;  %v1405_v48 = vadd.f32 %v1404_v16, %v1401_v25  ;;  %v1419_v4 = vstv %s4944_s17  ;;  %v1580_v47 = vstv %s4946_s2  ;;  %s5113_s2 = sld [smem:[#allocation2 + $0xc2]] }
 0x1fa   :  { %v982_v28 = vadd.f32 %v981_v26, %v978_v12  ;;  %v871_v1 = vadd.f32 %v870_v43, %v867_v23  ;;  %v2869_v5 = vpack.c.bf16 %v1245_v31, %v1244_v13  ;;  %v1765_v36 = vstv %s4954_s15  ;;  %s5033_s15 = sld [smem:[#allocation2 + $0x7a]]  ;;  %v1433_v43 = vld [vmem:[%s5847_s1 + $0xf0] sm:$0xff] }
 0x1fb   :  { %v1224_v20 = vadd.f32 %v1223_v34, %v1220_v0  ;;  %v1409_v45 = vadd.f32 %v1408_v61, %v1405_v48  ;;  %v2881_v56 = vpack.c.bf16 %v1430_v2, %v1429_v49  ;;  %v1235_v22 = vmul.f32 %v1234_v53, %v4935_v60  ;;  %v1613_v49 = vld [vmem:[%s5847_s1 + $0x108] sm:$0xff] }
 0x1fc   :  { %v983_v32 = vmax.f32 %v982_v28, 0.0  ;;  %v872_v30 = vmax.f32 %v871_v1, 0.0  ;;  %v1584_v18 = vstv %s4956_s26  ;;  %v1420_v35 = vmul.f32 %v1419_v4, %v4935_v60  ;;  %s5049_s26 = sld [smem:[#allocation2 + $0x93]] }
 0x1fd   :  { %v1228_v63 = vadd.f32 %v1227_v27, %v1224_v20  ;;  %v1413_v37 = vadd.f32 %v1412_v8, %v1409_v45  ;;  %v1581_v16 = vmul.f32 %v1580_v47, %v4814_v29  ;;  %v1588_v17 = vstv %s4970_s28  ;;  %v1797_v47 = vld [vmem:[%s5847_s1 + $0x140] sm:$0xff]  ;;  %s5869_s28 = sld [smem:[#allocation99_spill]] }
 0x1fe   :  { %2687 = vmatmul.mubr.msk.f32.vlgmr.msra.gmra.mrb[0].mxu0 %vm992_vm8, %v983_v32  ;;  %2706 = vmatmul.mubr.msk.f32.vlgmr.msra.gmra.mrb[0].mxu1 %vm992_vm8, %v872_v30  ;;  %v1773_v40 = vstv %s4982_s11  ;;  %v1766_v34 = vmul.f32 %v1765_v36, %v4814_v29  ;;  %v1592_v12 = vstv %s4984_s13  ;;  %v2872_v26 = vpack.c.bf16 %v1247_v19, %v1246_v11  ;;  %s5234_s13 = sld [smem:[#allocation2 + $0xae]] }
 0x1ff   :  { %2867 = vmatpush3.bf16.msra.mxu0 %v2866_v46  ;;  %2879 = vmatpush3.bf16.msra.mxu1 %v2878_v51  ;;  %v1232_v9 = vadd.f32 %v1231_v41, %v1228_v63  ;;  %v1417_v33 = vadd.f32 %v1416_v58, %v1413_v37  ;;  %v1238_v25 = vstv %s4994_s14  ;;  %v1585_v61 = vmul.f32 %v1584_v18, %v4831_v55  ;;  %s5075_s14 = sld [smem:[#allocation2 + $0x7b]] }
 0x200   :  { %2868 = vmatprep.subr.bf16.mxu0 %v3168_v57  ;;  %2880 = vmatprep.subr.bf16.mxu1 %v3168_v57  ;;  %v2884_v23 = vpack.c.bf16 %v1432_v7, %v1431_v6  ;;  %v1423_v0 = vstv %s5005_s0  ;;  %v1770_v27 = vmul.f32 %v1769_v52, %v4831_v55  ;;  %v1777_v28 = vstv %s4989_s30  ;;  %s5087_s30 = sld [smem:[#allocation2 + $0xc0]] }
 0x201   :  { %2724 = vmatprep.mubr.msk.f32.mxu0 %vm3169_vm7, %v3170_v42  ;;  %2743 = vmatprep.mubr.msk.f32.mxu1 %vm3169_vm7, %v3170_v42  ;;  %v1236_v62 = vadd.f32 %v1235_v22, %v1232_v9  ;;  %v1596_v48 = vstv %s5007_s3  ;;  %v1421_v8 = vadd.f32 %v1420_v35, %v1417_v33  ;;  %v1582_v1 = vadd.f32 %v1581_v16, %v4653_v24  ;;  %v1614_v33 = vld [vmem:[%s5847_s1 + $0x110] sm:$0xff]  ;;  %v1615_v35 = vld [vmem:[%s5847_s1 + $0x118] sm:$0xff] }
 0x202   :  { %v1589_v46 = vmul.f32 %v1588_v17, %v4853_v10  ;;  %v2875_v20 = vpack.c.bf16 %v1249_v50, %v1248_v59  ;;  %v1239_v41 = vmul.f32 %v1238_v25, %v4941_v15  ;;  %v1767_v32 = vadd.f32 %v1766_v34, %v4655_v54  ;;  %v1612_v54 = vld [vmem:[%s5847_s1 + $0x100] sm:$0xff]  ;;  %v1800_v34 = vld [vmem:[%s5847_s1 + $0x158] sm:$0xff] }
 0x203   :  { %2870 = vmatpush3.bf16.msra.mxu0 %v2869_v5  ;;  %2882 = vmatpush3.bf16.msra.mxu1 %v2881_v56  ;;  %v1774_v51 = vmul.f32 %v1773_v40, %v4853_v10  ;;  %v2887_v13 = vpack.c.bf16 %v1434_v44, %v1433_v43  ;;  %v1424_v31 = vmul.f32 %v1423_v0, %v4941_v15  ;;  %v1781_v58 = vstv %s5022_s29  ;;  %v1798_v5 = vld [vmem:[%s5847_s1 + $0x148] sm:$0xff]  ;;  %v1799_v40 = vld [vmem:[%s5847_s1 + $0x150] sm:$0xff]  ;;  %v1616_v44 = vld [vmem:[%s5847_s1 + $0x120] sm:$0xff] }
 0x204   :  { %2871 = vmatprep.subr.bf16.mxu0 %v3168_v57  ;;  %2883 = vmatprep.subr.bf16.mxu1 %v3168_v57  ;;  %v1586_v24 = vadd.f32 %v1585_v61, %v1582_v1  ;;  %v1593_v45 = vmul.f32 %v1592_v12, %v4876_v14  ;;  %v1240_v30 = vadd.f32 %v1239_v41, %v1236_v62  ;;  %v1600_v63 = vstv %s5033_s15  ;;  %s5119_s15 = sld [smem:[#allocation2 + $0xc3]]  ;;  %v1617_v62 = vld [vmem:[%s5847_s1 + $0x128] sm:$0xff] }
 0x205   :  { %v1771_v2 = vadd.f32 %v1770_v27, %v1767_v32  ;;  %v1778_v53 = vmul.f32 %v1777_v28, %v4876_v14  ;;  %v1425_v4 = vadd.f32 %v1424_v31, %v1421_v8  ;;  %v1597_v36 = vmul.f32 %v1596_v48, %v4892_v38  ;;  %v1801_v48 = vld [vmem:[%s5847_s1 + $0x160] sm:$0xff]  ;;  %v1802_v8 = vld [vmem:[%s5847_s1 + $0x168] sm:$0xff] }
 0x206   :  { %v1590_v37 = vadd.f32 %v1589_v46, %v1586_v24  ;;  %v1785_v56 = vstv %s5049_s26  ;;  %v1782_v19 = vmul.f32 %v1781_v58, %v4892_v38  ;;  %v2890_v9 = vpack.c.bf16 %v1613_v49, %v1612_v54  ;;  %v1619_v58 = vld [vmem:[%s5847_s1 + $0x138] sm:$0xff]  ;;  %v1803_v49 = vld [vmem:[%s5847_s1 + $0x170] sm:$0xff] }
 0x207   :  { %2873 = vmatpush3.bf16.msra.mxu0 %v2872_v26  ;;  %2885 = vmatpush3.bf16.msra.mxu1 %v2884_v23  ;;  %v1775_v11 = vadd.f32 %v1774_v51, %v1771_v2  ;;  %v1601_v18 = vmul.f32 %v1600_v63, %v4913_v3  ;;  %v1241_v6 = vmax.f32 %v1240_v30, 0.0  ;;  %v2902_v7 = vpack.c.bf16 %v1798_v5, %v1797_v47  ;;  %v1804_v2 = vld [vmem:[%s5847_s1 + $0x178] sm:$0xff] }
 0x208   :  { %2874 = vmatprep.subr.bf16.mxu0 %v3168_v57  ;;  %2886 = vmatprep.subr.bf16.mxu1 %v3168_v57  ;;  %v1594_v22 = vadd.f32 %v1593_v45, %v1590_v37  ;;  %v1786_v52 = vmul.f32 %v1785_v56, %v4913_v3  ;;  %v1426_v17 = vmax.f32 %v1425_v4, 0.0  ;;  %v1604_v12 = vstv %s5075_s14  ;;  %v1618_v45 = vld [vmem:[%s5847_s1 + $0x130] sm:$0xff] }
 0x209   :  { %v1779_v16 = vadd.f32 %v1778_v53, %v1775_v11  ;;  %v1789_v59 = vstv %s5080_s7  ;;  %v1950_v50 = vstv %s5082_s4  ;;  %v2893_v25 = vpack.c.bf16 %v1615_v35, %v1614_v33  ;;  %v1982_v35 = vld [vmem:[%s5847_s1 + $0x180] sm:$0xff]  ;;  %s5244_s4 = sld [smem:[#allocation2 + $0xc7]] }
 0x20a   :  { %v1598_v26 = vadd.f32 %v1597_v36, %v1594_v22  ;;  %v2135_v23 = vstv %s5087_s30  ;;  %v2905_v43 = vpack.c.bf16 %v1800_v34, %v1799_v40  ;;  %v1605_v27 = vmul.f32 %v1604_v12, %v4935_v60  ;;  %s5161_s30 = sld [smem:[#allocation2 + $0xac]]  ;;  %v2167_v40 = vld [vmem:[%s5847_s1 + $0x1c0] sm:$0xff]  ;;  %v2168_v34 = vld [vmem:[%s5847_s1 + $0x1c8] sm:$0xff] }
 0x20b   :  { %2876 = vmatpush3.bf16.msra.mxu0 %v2875_v20  ;;  %2888 = vmatpush3.bf16.msra.mxu1 %v2887_v13  ;;  %v1783_v61 = vadd.f32 %v1782_v19, %v1779_v16  ;;  %v1954_v28 = vstv %s5089_s19  ;;  %v1790_v46 = vmul.f32 %v1789_v59, %v4935_v60  ;;  %v1951_v20 = vmul.f32 %v1950_v50, %v4814_v29  ;;  %s5177_s19 = sld [smem:[#allocation2 + $0xc5]] }
 0x20c   :  { %2889 = vmatprep.subr.bf16.mxu0 %v3168_v57  ;;  %2901 = vmatprep.subr.bf16.mxu1 %v3168_v57  ;;  %v1602_v0 = vadd.f32 %v1601_v18, %v1598_v26  ;;  %v2139_v41 = vstv %s5100_s27  ;;  %v1958_v32 = vstv %s5102_s9  ;;  %v2143_v51 = vstv %s5113_s2  ;;  %s5870_s27 = sld [smem:[#allocation98_spill]]  ;;  %s5871_s2 = sld [smem:[#allocation100_spill]] }
 0x20d   :  { %v1787_v1 = vadd.f32 %v1786_v52, %v1783_v61  ;;  %v2136_v13 = vmul.f32 %v2135_v23, %v4814_v29  ;;  %v1962_v31 = vstv %s5115_s18  ;;  %v2896_v24 = vpack.c.bf16 %v1617_v62, %v1616_v44  ;;  %v1984_v62 = vld [vmem:[%s5847_s1 + $0x190] sm:$0xff]  ;;  %s3171_s18 = smov [#allocation7]  }
 0x20e   :  { %2725 = vmatmul.mubr.msk.f32.vlgmr.msra.gmra.mrb[2].mxu0 %vm992_vm8, %v1241_v6  ;;  %2744 = vmatmul.mubr.msk.f32.vlgmr.msra.gmra.mrb[2].mxu1 %vm992_vm8, %v1426_v17  ;;  %v1608_v30 = vstv %s5122_s21  ;;  %v1955_v54 = vmul.f32 %v1954_v28, %v4831_v55  ;;  %v2908_v29 = vpack.c.bf16 %v1802_v8, %v1801_v48  ;;  %v1606_v53 = vadd.f32 %v1605_v27, %v1602_v0  ;;  %s5203_s21 = sld [smem:[#allocation2 + $0xad]]  ;;  %v2169_v48 = vld [vmem:[%s5847_s1 + $0x1d0] sm:$0xff]  ;;  %v2170_v8 = vld [vmem:[%s5847_s1 + $0x1d8] sm:$0xff]  ;;  %s2354_s8 = sshll.u32 %s3171_s18, 4  ;;  %s2355_s8 = int_to_ptr.vmem [resolvable:$true] %s2354_s8 }
 0x20f   :  { %2891 = vmatpush3.bf16.msra.mxu0 %v2890_v9  ;;  %2903 = vmatpush3.bf16.msra.mxu1 %v2902_v7  ;;  %v1793_v63 = vstv %s5132_s24  ;;  %v2140_v4 = vmul.f32 %v2139_v41, %v4831_v55  ;;  %v2147_v47 = vstv %s5119_s15  ;;  %v1966_v5 = vstv %s5134_s16  ;;  %p3067_p11 = scmp.lt.s32.totalorder %s2355_s8, %s2355_s8 }
 0x210   :  { %2892 = vmatprep.subr.bf16.mxu0 %v3168_v57  ;;  %2904 = vmatprep.subr.bf16.mxu1 %v3168_v57  ;;  %v1791_v37 = vadd.f32 %v1790_v46, %v1787_v1  ;;  %v1952_v36 = vadd.f32 %v1951_v20, %v4657_v39  ;;  %v1959_v56 = vmul.f32 %v1958_v32, %v4853_v10  ;;  %v2151_v39 = vstv %s5150_s20 }
 0x211   :  { %2762 = vmatprep.mubr.msk.f32.mxu0 %vm3169_vm7, %v3170_v42  ;;  %2781 = vmatprep.mubr.msk.f32.mxu1 %vm3169_vm7, %v3170_v42  ;;  %v2899_v11 = vpack.c.bf16 %v1619_v58, %v1618_v45  ;;  %v1609_v19 = vmul.f32 %v1608_v30, %v4941_v15  ;;  %v2137_v55 = vadd.f32 %v2136_v13, %v4659_v21  ;;  %v1983_v21 = vld [vmem:[%s5847_s1 + $0x188] sm:$0xff]  ;;  %v1970_v52 = vstv %s5161_s30  ;;  %v2171_v45 = vld [vmem:[%s5847_s1 + $0x1e0] sm:$0xff] }
 0x212   :  { %v2144_v9 = vmul.f32 %v2143_v51, %v4853_v10  ;;  %v2911_v22 = vpack.c.bf16 %v1804_v2, %v1803_v49  ;;  %v1794_v18 = vmul.f32 %v1793_v63, %v4941_v15  ;;  %v1956_v6 = vadd.f32 %v1955_v54, %v1952_v36  ;;  %v1986_v51 = vld [vmem:[%s5847_s1 + $0x1a0] sm:$0xff]  ;;  %v1987_v13 = vld [vmem:[%s5847_s1 + $0x1a8] sm:$0xff]  ;;  %v1989_v63 = vld [vmem:[%s5847_s1 + $0x1b8] sm:$0xff] }
 0x213   :  { %2894 = vmatpush3.bf16.msra.mxu0 %v2893_v25  ;;  %2906 = vmatpush3.bf16.msra.mxu1 %v2905_v43  ;;  %v1963_v7 = vmul.f32 %v1962_v31, %v4876_v14  ;;  %v1610_v33 = vadd.f32 %v1609_v19, %v1606_v53  ;;  %v2141_v10 = vadd.f32 %v2140_v4, %v2137_v55  ;;  %v2155_v59 = vstv %s5177_s19  ;;  %v2172_v58 = vld [vmem:[%s5847_s1 + $0x1e8] sm:$0xff]  ;;  %v1988_v53 = vld [vmem:[%s5847_s1 + $0x1b0] sm:$0xff] }
 0x214   :  { %2895 = vmatprep.subr.bf16.mxu0 %v3168_v57  ;;  %2907 = vmatprep.subr.bf16.mxu1 %v3168_v57  ;;  %v2148_v16 = vmul.f32 %v2147_v47, %v4876_v14  ;;  %v1795_v17 = vadd.f32 %v1794_v18, %v1791_v37  ;;  %v1960_v12 = vadd.f32 %v1959_v56, %v1956_v6  ;;  %v1974_v1 = vstv %s5203_s21  ;;  %v2173_v47 = vld [vmem:[%s5847_s1 + $0x1f0] sm:$0xff]  ;;  %v2259_v6 = vld [vmem:[%s5869_s28 + $0x8] sm:$0xff]  ;;  %s3062_s21 = scalar_lea.vmem %s2355_s8, 32 }
 0x215   :  { %v1967_v26 = vmul.f32 %v1966_v5, %v4892_v38  ;;  %v2145_v50 = vadd.f32 %v2144_v9, %v2141_v10  ;;  %v2152_v25 = vmul.f32 %v2151_v39, %v4892_v38  ;;  %v2914_v14 = vpack.c.bf16 %v1983_v21, %v1982_v35  ;;  %v1985_v38 = vld [vmem:[%s5847_s1 + $0x198] sm:$0xff]  ;;  %v2263_v21 = vld [vmem:[%s5869_s28 + $0x28] sm:$0xff]  ;;  %v2264_v10 = vld [vmem:[%s5869_s28 + $0x30] sm:$0xff]  ;;  %p3063_p10 = scmp.ne.s32.totalorder %s2355_s8, %s3062_s21  ;;  %p3068_p12 = scmp.lt.s32.totalorder %s3062_s21, %s3062_s21 }
 0x216   :  { %v1964_v61 = vadd.f32 %v1963_v7, %v1960_v12  ;;  %v1971_v23 = vmul.f32 %v1970_v52, %v4913_v3  ;;  %v1611_v43 = vmax.f32 %v1610_v33, 0.0  ;;  %v2926_v44 = vpack.c.bf16 %v2168_v34, %v2167_v40  ;;  %v2174_v5 = vld [vmem:[%s5847_s1 + $0x1f8] sm:$0xff]  ;;  %v2260_v7 = vld [vmem:[%s5869_s28 + $0x10] sm:$0xff] }
 0x217   :  { %2897 = vmatpush3.bf16.msra.mxu0 %v2896_v24  ;;  %2909 = vmatpush3.bf16.msra.mxu1 %v2908_v29  ;;  %v2149_v0 = vadd.f32 %v2148_v16, %v2145_v50  ;;  %v2156_v27 = vmul.f32 %v2155_v59, %v4913_v3  ;;  %v1796_v28 = vmax.f32 %v1795_v17, 0.0  ;;  %v2159_v20 = vstv %s5208_s23  ;;  %v2261_v33 = vld [vmem:[%s5869_s28 + $0x18] sm:$0xff]  ;;  %p3069_p13 = por %p3068_p12, %p3067_p11 }
 0x218   :  { %2898 = vmatprep.subr.bf16.mxu0 %v3168_v57  ;;  %2910 = vmatprep.subr.bf16.mxu1 %v3168_v57  ;;  %v1968_v46 = vadd.f32 %v1967_v26, %v1964_v61  ;;  %v2917_v3 = vpack.c.bf16 %v1985_v38, %v1984_v62  ;;  %v2929_v32 = vpack.c.bf16 %v2170_v8, %v2169_v48  ;;  %v1978_v49 = vstv %s5234_s13  ;;  %v2265_v52 = vld [vmem:[%s5869_s28 + $0x38] sm:$0xff] }
 0x219   :  { %v2153_v41 = vadd.f32 %v2152_v25, %v2149_v0  ;;  %v1975_v24 = vmul.f32 %v1974_v1, %v4935_v60  ;;  %v2160_v54 = vmul.f32 %v2159_v20, %v4935_v60  ;;  %v2920_v29 = vpack.c.bf16 %v1987_v13, %v1986_v51  ;;  %v2587_v51 = vld [vmem:[%s5871_s2] ss:$0 sm:$0xff]  ;;  %p3070_p0 = pnand %p3069_p13, %p3063_p10 }
 0x21a   :  { %v1972_v31 = vadd.f32 %v1971_v23, %v1968_v46  ;;  %v2932_v2 = vpack.c.bf16 %v2172_v58, %v2171_v45  ;;  %v2163_v60 = vstv %s5244_s4  ;;  %v1979_v36 = vmul.f32 %v1978_v49, %v4941_v15  ;;  %v2586_v46 = vld [vmem:[%s5870_s27] ss:$0 sm:$0xff] }
 0x21b   :  { %2900 = vmatpush3.bf16.msra.mxu0 %v2899_v11  ;;  %2912 = vmatpush3.bf16.msra.mxu1 %v2911_v22  ;;  %v2157_v30 = vadd.f32 %v2156_v27, %v2153_v41  ;;  %v2923_v56 = vpack.c.bf16 %v1989_v63, %v1988_v53  ;;  %v2164_v11 = vmul.f32 %v2163_v60, %v4941_v15  ;;  %v2258_v15 = vld [vmem:[%s5869_s28] sm:$0xff] }
 0x21c   :  { %2913 = vmatprep.subr.bf16.mxu0 %v3168_v57  ;;  %2925 = vmatprep.subr.bf16.mxu1 %v3168_v57  ;;  %v1976_v4 = vadd.f32 %v1975_v24, %v1972_v31  ;;  %v2935_v19 = vpack.c.bf16 %v2174_v5, %v2173_v47  ;;  %v2938_v39 = vpack.c.bf16 %v2259_v6, %v2258_v15 }
 0x21d   :  { %v2161_v37 = vadd.f32 %v2160_v54, %v2157_v30  ;;  %v2941_v35 = vpack.c.bf16 %v2261_v33, %v2260_v7  ;;  %v2947_v17 = vpack.c.bf16 %v2265_v52, %v2264_v10 }
 0x21e   :  { %2763 = vmatmul.mubr.msk.f32.vlgmr.msra.gmra.mrb[4].mxu0 %vm992_vm8, %v1611_v43  ;;  %2782 = vmatmul.mubr.msk.f32.vlgmr.msra.gmra.mrb[4].mxu1 %vm992_vm8, %v1796_v28  ;;  %v1980_v55 = vadd.f32 %v1979_v36, %v1976_v4 }
 0x21f   :  { %2915 = vmatpush3.bf16.msra.mxu0 %v2914_v14  ;;  %2927 = vmatpush3.bf16.msra.mxu1 %v2926_v44  ;;  %v2165_v9 = vadd.f32 %v2164_v11, %v2161_v37 }
 0x220   :  { %2916 = vmatprep.subr.bf16.mxu0 %v3168_v57  ;;  %2928 = vmatprep.subr.bf16.mxu1 %v3168_v57  ;;  %v1981_v22 = vmax.f32 %v1980_v55, 0.0 }
 0x221   :  { %2800 = vmatprep.mubr.msk.f32.mxu0 %vm3169_vm7, %v3170_v42  ;;  %2819 = vmatprep.mubr.msk.f32.mxu1 %vm3169_vm7, %v3170_v42  ;;  %v2166_v18 = vmax.f32 %v2165_v9, 0.0 }
 0x223   :  { %2918 = vmatpush3.bf16.msra.mxu0 %v2917_v3  ;;  %2930 = vmatpush3.bf16.msra.mxu1 %v2929_v32 }
 0x224   :  { %2919 = vmatprep.subr.bf16.mxu0 %v3168_v57  ;;  %2931 = vmatprep.subr.bf16.mxu1 %v3168_v57 }
 0x227   :  { %2921 = vmatpush3.bf16.msra.mxu0 %v2920_v29  ;;  %2933 = vmatpush3.bf16.msra.mxu1 %v2932_v2 }
 0x228   :  { %2922 = vmatprep.subr.bf16.mxu0 %v3168_v57  ;;  %2934 = vmatprep.subr.bf16.mxu1 %v3168_v57 }
 0x22b   :  { %2924 = vmatpush3.bf16.msra.mxu0 %v2923_v56  ;;  %2936 = vmatpush3.bf16.msra.mxu1 %v2935_v19 }
 0x22c   :  { %2937 = vmatprep.subr.bf16.mxu0 %v3168_v57 }
 0x22e   :  { %2801 = vmatmul.mubr.msk.f32.vlgmr.msra.gmra.mrb[6].mxu0 %vm992_vm8, %v1981_v22  ;;  %2820 = vmatmul.mubr.msk.f32.vlgmr.msra.gmra.mrb[6].mxu1 %vm992_vm8, %v2166_v18 }
 0x22f   :  { %2838 = vmatprep.mubr.msk.f32.mxu0 %vm3169_vm7, %v3170_v42  ;;  %2939 = vmatpush3.bf16.msra.mxu0 %v2938_v39  ;;  %v2262_v42 = vld [vmem:[%s5869_s28 + $0x20] sm:$0xff] }
 0x230   :  { %2940 = vmatprep.subr.bf16.mxu0 %v3168_v57  ;;  %v2944_v16 = vpack.c.bf16 %v2263_v21, %v2262_v42 }
 0x233   :  { %2942 = vmatpush3.bf16.msra.mxu0 %v2941_v35 }
 0x234   :  { %2943 = vmatprep.subr.bf16.mxu0 %v3168_v57 }
 0x237   :  { %2945 = vmatpush3.bf16.msra.mxu0 %v2944_v16 }
 0x238   :  { %2946 = vmatprep.subr.bf16.mxu0 %v3168_v57 }
 0x23b   :  { %2948 = vmatpush3.bf16.msra.mxu0 %v2947_v17 }
 0x2d1   :  { %v1062_v40 = vpop.f32.mrb[0].mxu0  ;;  %v1135_v34 = vpop.f32.mrb[0].mxu1 }
 0x2d2   :  { %v2688_v12 = vpop.f32.mrb[1].mxu0  ;;  %v1136_v26 = vadd.f32 %v1135_v34, %v1062_v40  ;;  %v2707_v59 = vpop.f32.mrb[1].mxu1 }
 0x2e1   :  { %v1319_v50 = vpop.f32.mrb[2].mxu0  ;;  %v1504_v14 = vpop.f32.mrb[2].mxu1 }
 0x2e2   :  { %v1323_v25 = vadd.f32 %v1319_v50, %v1136_v26  ;;  %v2726_v61 = vpop.f32.mrb[3].mxu0  ;;  %v2745_v23 = vpop.f32.mrb[3].mxu1 }
 0x2e4   :  { %v1508_v43 = vadd.f32 %v1504_v14, %v1323_v25 }
 0x2f1   :  { %v1689_v44 = vpop.f32.mrb[4].mxu0  ;;  %v1874_v38 = vpop.f32.mrb[4].mxu1 }
 0x2f2   :  { %v1693_v62 = vadd.f32 %v1689_v44, %v1508_v43  ;;  %v2764_v0 = vpop.f32.mrb[5].mxu0  ;;  %v2783_v27 = vpop.f32.mrb[5].mxu1 }
 0x2f4   :  { %v1878_v28 = vadd.f32 %v1874_v38, %v1693_v62 }
 0x301   :  { %v2059_v48 = vpop.f32.mrb[6].mxu0  ;;  %v2244_v8 = vpop.f32.mrb[6].mxu1 }
 0x302   :  { %v2063_v57 = vadd.f32 %v2059_v48, %v1878_v28  ;;  %v2802_v1 = vpop.f32.mrb[7].mxu0  ;;  %v2821_v20 = vpop.f32.mrb[7].mxu1 }
 0x304   :  { %v2248_v3 = vadd.f32 %v2244_v8, %v2063_v57 }
 0x306   :  { %v2256_v41 = vadd.f32 %v2586_v46, %v2248_v3 }
 0x308   :  { %v2257_v32 = vmax.f32 %v2256_v41, 0.0 }
 0x30a   :  { %2839 = vmatmul.mubr.msk.f32.vlgmr.msra.gmra.mrb[8].mxu0 %vm992_vm8, %v2257_v32 }
 0x3dd   :  { %v2342_v13 = vpop.f32.mrb[8].mxu0 }
 0x3de   :  { %v2343_v31 = vadd.f32 %v2587_v51, %v2342_v13  ;;  %v2840_v24 = vpop.f32.mrb[9].mxu0 }
 0x3e0   :  { %2347 = vst.msk [vmem:[#allocation7] sm:$0x3] %vm2346_vm9, %v2343_v31 }
 0x3e1   :  { %3073 = shalt.err (!%p3070_p0)
}
 0x3e2   :  { %s5872_s26 = sld [smem:[#allocation101_spill]] }
 0x3e8   :  { %s3074_s12 = scalar_lea.hbm %s5872_s26, 32 }
 0x3e9   :  { %p3075_p1 = scmp.ne.s32.totalorder %s5872_s26, %s3074_s12  ;;  %p3078_p2 = scmp.lt.u32.totalorder %s3074_s12, %s5872_s26 }
 0x3eb   :  { %p3080_p3 = pnand %p3078_p2, %p3075_p1 }
 0x3ed   :  { %3083 = shalt.err (!%p3080_p3)
}
 0x3ee   :  { %2357 = dma.vmem_to_hbm [thread:$0]  %s2355_s8, 32, %s5872_s26, [#allocation3]  }
 0x3ef   :  { %3088 = dma.done.wait [#allocation3], 32  }
 0x3f0   :  { %3089 = vsyncadd [#allocation3], 4294967264 }
 0x3f1   :  { %2361 = vsyncpa [#allocation3], 1 }
 0x3f2   :  { %2362 = vsyncpa [#allocation4], 1 }
 0x3f3   :  { %2363 = vsyncpa [#allocation6], 1 }

</bundles_post_ra>
